<compile_context>
chip_gen: v7x
topology: tpu7x:2x2x1
jax: 0.10.0
libtpu: 0.0.40
codegen_flags: <defaults>
</compile_context>

<pallas_src>
import functools

import jax
import jax.numpy as jnp
from jax.experimental import pallas as pl
from jax.experimental.pallas import tpu as pltpu

LANE = 128


def _round_up(x, m):
    return (x + m - 1) // m * m


def _resblock_kernel(*refs, has_projection):
    """Fused residual block for one batch tile.

    refs (projection):  xpad, w1, b1, w2, b2, ws, out, mid_scr
    refs (identity):    xpad, w1, b1, w2, b2,     out, mid_scr

    xpad    : (Nb, H+2, W+2, Cinp)   bf16, zero-padded (spatial halo + channel pad)
    w1      : (9*Cinp, Cmidp)        bf16, tap-major fused-K conv1 weights
    b1      : (1, Cmidp)             f32
    w2      : (9*Cmidp, Coutp)       bf16, tap-major fused-K conv2 weights
    b2      : (1, Coutp)             f32
    ws      : (Cinp, Coutp)          bf16 (projection shortcut only)
    out     : (Nb, H, W, Coutp)      f32
    mid_scr : (Nb, H+2, W+16, Cmidp) bf16 VMEM scratch; conv1 activations live at
              rows [1:H+1], cols [8:8+W] so the interior store is sublane-aligned.
    """
    if has_projection:
        (xpad_ref, w1_ref, b1_ref, w2_ref, b2_ref, ws_ref,
         out_ref, mid_scr) = refs
    else:
        (xpad_ref, w1_ref, b1_ref, w2_ref, b2_ref,
         out_ref, mid_scr) = refs
        ws_ref = None

    Nb, H, W, Coutp = out_ref.shape
    Cinp = xpad_ref.shape[3]
    Cmidp = mid_scr.shape[3]
    HW = Nb * H * W

    x = xpad_ref[...]                                   # (Nb, H+2, W+2, Cinp) bf16

    # ---- conv1 (3x3, pad=1) as ONE matmul with K = 9*Cinp ----
    taps1 = [x[:, dy:dy + H, dx:dx + W, :].reshape(HW, Cinp)
             for dy in range(3) for dx in range(3)]
    im1 = jnp.concatenate(taps1, axis=1)                # (HW, 9*Cinp) bf16
    acc1 = jnp.dot(im1, w1_ref[...], preferred_element_type=jnp.float32)
    mid = jnp.maximum(acc1 + b1_ref[...], 0.0)          # (HW, Cmidp) f32, ReLU

    # ---- stage conv1 output into scratch for conv2 ----
    # Zero only the halo strips (small, aligned writes); interior is overwritten
    # every step so no full-scratch memset is needed.
    zrow = jnp.zeros((Nb, 1, W + 16, Cmidp), jnp.bfloat16)
    zcol = jnp.zeros((Nb, H + 2, 8, Cmidp), jnp.bfloat16)
    mid_scr[:, 0:1, :, :] = zrow
    mid_scr[:, H + 1:H + 2, :, :] = zrow
    mid_scr[:, :, 0:8, :] = zcol
    mid_scr[:, :, W + 8:W + 16, :] = zcol
    # Aligned, lane-dense interior store (W-offset 8 is a sublane multiple).
    mid_scr[:, 1:1 + H, 8:8 + W, :] = (
        mid.astype(jnp.bfloat16).reshape(Nb, H, W, Cmidp))

    # ---- conv2 (3x3, pad=1) as ONE matmul with K = 9*Cmidp ----
    taps2 = [mid_scr[:, dy:dy + H, 7 + dx:7 + dx + W, :].reshape(HW, Cmidp)
             for dy in range(3) for dx in range(3)]
    im2 = jnp.concatenate(taps2, axis=1)                # (HW, 9*Cmidp) bf16
    acc2 = jnp.dot(im2, w2_ref[...], preferred_element_type=jnp.float32)
    acc2 = acc2 + b2_ref[...]

    # ---- shortcut (identity add or 1x1 projection) + residual + ReLU ----
    xs = x[:, 1:1 + H, 1:1 + W, :].reshape(HW, Cinp)
    if has_projection:
        sc = jnp.dot(xs, ws_ref[...], preferred_element_type=jnp.float32)
    else:
        sc = xs.astype(jnp.float32)                     # Cinp == Coutp here

    out = jnp.maximum(acc2 + sc, 0.0)
    out_ref[...] = out.reshape(Nb, H, W, Coutp).astype(out_ref.dtype)


def residual_block_nobn(x_nchw, w1, b1, w2, b2, ws=None, *, stride=1,
                        batch_tile=1):
    """x_nchw: (N, Cin, H, W). Weights in HWIO: w1 (3,3,Cin,Cout),
    w2 (3,3,Cout,Cout), ws (Cin, Cout) or None for the identity shortcut.
    Returns (N, Cout, H, W)."""
    if stride != 1:
        # TODO(synk): strided 3x3 / strided 1x1 shortcut path not implemented.
        raise NotImplementedError("stride != 1 not supported in this kernel")

    x = jnp.transpose(x_nchw, (0, 2, 3, 1))             # NCHW -> NHWC
    N, H, W, Cin = x.shape
    Cout = w2.shape[3]
    assert w1.shape == (3, 3, Cin, Cout) and w2.shape == (3, 3, Cout, Cout)
    has_projection = ws is not None
    if not has_projection:
        assert Cin == Cout, "identity shortcut requires Cin == Cout"

    # Lane-dense channel padding (biggest lever for small-channel configs).
    Cinp = _round_up(Cin, LANE)
    Coutp = _round_up(Cout, LANE)
    Cmidp = Coutp
    Hp, Wp = H + 2, W + 2

    Nb = batch_tile
    assert N % Nb == 0

    # Input: spatial halo (pad=1) + channel pad, cast to bf16 for the MXU.
    # TODO(synk): for large images / v7x, drop this HBM-side pad and tile H
    # spatially with an in-kernel halo (manual DMA) to respect 64 MiB VMEM.
    xpad = jnp.pad(x, ((0, 0), (1, 1), (1, 1), (0, Cinp - Cin))
                   ).astype(jnp.bfloat16)

    def fuse_w(w, cin, cinp, cout, coutp):
        wp = jnp.pad(w, ((0, 0), (0, 0), (0, cinp - cin), (0, coutp - cout)))
        return wp.reshape(9 * cinp, coutp).astype(jnp.bfloat16)

    w1r = fuse_w(w1, Cin, Cinp, Cout, Coutp)             # (9*Cinp, Cmidp)
    w2r = fuse_w(w2, Cout, Cmidp, Cout, Coutp)           # (9*Cmidp, Coutp)
    b1r = jnp.pad(b1, (0, Coutp - Cout)).reshape(1, Coutp).astype(jnp.float32)
    b2r = jnp.pad(b2, (0, Coutp - Cout)).reshape(1, Coutp).astype(jnp.float32)

    in_specs = [
        pl.BlockSpec((Nb, Hp, Wp, Cinp), lambda n: (n, 0, 0, 0)),
        # Weights/biases are grid-invariant (constant index maps).
        pl.BlockSpec((9 * Cinp, Cmidp), lambda n: (0, 0)),
        pl.BlockSpec((1, Cmidp), lambda n: (0, 0)),
        pl.BlockSpec((9 * Cmidp, Coutp), lambda n: (0, 0)),
        pl.BlockSpec((1, Coutp), lambda n: (0, 0)),
    ]
    args = [xpad, w1r, b1r, w2r, b2r]
    if has_projection:
        wsr = jnp.pad(ws, ((0, Cinp - Cin), (0, Coutp - Cout))
                      ).astype(jnp.bfloat16)
        in_specs.append(pl.BlockSpec((Cinp, Coutp), lambda n: (0, 0)))
        args.append(wsr)

    kernel = functools.partial(_resblock_kernel, has_projection=has_projection)

    out_nhwc = pl.pallas_call(
        kernel,
        out_shape=jax.ShapeDtypeStruct((N, H, W, Coutp), jnp.float32),
        grid_spec=pltpu.PrefetchScalarGridSpec(
            num_scalar_prefetch=0,
            grid=(N // Nb,),
            in_specs=in_specs,
            out_specs=pl.BlockSpec((Nb, H, W, Coutp), lambda n: (n, 0, 0, 0)),
            scratch_shapes=[pltpu.VMEM((Nb, Hp, W + 16, Cmidp), jnp.bfloat16)],
        ),
        compiler_params=pltpu.CompilerParams(
            dimension_semantics=("parallel",)),
    )(*args)

    out = out_nhwc[:, :, :, :Cout]                       # drop channel padding
    return jnp.transpose(out, (0, 3, 1, 2)).astype(x_nchw.dtype)


def _ref_forward(x_nchw, w1, b1, w2, b2, ws=None, match_precision=True):
    """Pure-JAX reference. With match_precision=True it applies the same
    mixed-precision policy as the kernel (bf16 MXU inputs, f32 accumulation)."""
    cast = (lambda a: a.astype(jnp.bfloat16)) if match_precision else (lambda a: a)
    x = jnp.transpose(x_nchw, (0, 2, 3, 1))
    dn = ("NHWC", "HWIO", "NHWC")
    h1 = jax.lax.conv_general_dilated(
        cast(x), cast(w1), (1, 1), "SAME", dimension_numbers=dn,
        preferred_element_type=jnp.float32) + b1
    h1 = jax.nn.relu(h1)
    h2 = jax.lax.conv_general_dilated(
        cast(h1), cast(w2), (1, 1), "SAME", dimension_numbers=dn,
        preferred_element_type=jnp.float32) + b2
    if ws is None:
        sc = cast(x).astype(jnp.float32)
    else:
        ws4 = ws.reshape(1, 1, ws.shape[0], ws.shape[1])
        sc = jax.lax.conv_general_dilated(
            cast(x), cast(ws4), (1, 1), "VALID", dimension_numbers=dn,
            preferred_element_type=jnp.float32)
    out = jax.nn.relu(h2 + sc)
    return jnp.transpose(out, (0, 3, 1, 2))


if __name__ == "__main__":
    key = jax.random.PRNGKey(0)
    ks = jax.random.split(key, 12)

    def make_params(kseq, cin, cout, proj):
        w1 = 0.1 * jax.random.normal(kseq[0], (3, 3, cin, cout), jnp.float32)
        b1 = 0.1 * jax.random.normal(kseq[1], (cout,), jnp.float32)
        w2 = 0.1 * jax.random.normal(kseq[2], (3, 3, cout, cout), jnp.float32)
        b2 = 0.1 * jax.random.normal(kseq[3], (cout,), jnp.float32)
        ws = (0.1 * jax.random.normal(kseq[4], (cin, cout), jnp.float32)
              if proj else None)
        return w1, b1, w2, b2, ws

    fwd = jax.jit(residual_block_nobn, static_argnames=("stride", "batch_tile"))

    N, H, W = 2, 16, 16

    # Config A: projection shortcut (Cin=4 != Cout=8) -> 1x1 conv shortcut.
    xA = jax.random.normal(ks[0], (N, 4, H, W), dtype=jnp.float32)
    pA = make_params(ks[1:6], 4, 8, True)
    outA = jax.block_until_ready(fwd(xA, *pA))
    assert outA.shape == (N, 8, H, W), outA.shape
    refA = _ref_forward(xA, *pA, match_precision=True)
    assert jnp.allclose(outA, refA, atol=5e-3, rtol=5e-3), (
        float(jnp.max(jnp.abs(outA - refA))))
    refA32 = _ref_forward(xA, *pA, match_precision=False)
    assert jnp.allclose(outA, refA32, atol=1e-1, rtol=1e-1), (
        float(jnp.max(jnp.abs(outA - refA32))))

    # Config B: identity shortcut (Cin == Cout == 8) -> plain residual add.
    xB = jax.random.normal(ks[6], (N, 8, H, W), dtype=jnp.float32)
    pB = make_params(ks[7:12], 8, 8, False)
    outB = jax.block_until_ready(fwd(xB, *pB))
    assert outB.shape == (N, 8, H, W), outB.shape
    refB = _ref_forward(xB, *pB, match_precision=True)
    assert jnp.allclose(outB, refB, atol=5e-3, rtol=5e-3), (
        float(jnp.max(jnp.abs(outB - refB))))
    refB32 = _ref_forward(xB, *pB, match_precision=False)
    assert jnp.allclose(outB, refB32, atol=1e-1, rtol=1e-1), (
        float(jnp.max(jnp.abs(outB - refB32))))

    print("KERNEL_OK")
</pallas_src>

<mosaic_0001>
module attributes {stable_mosaic.version = 11 : i64} {
  func.func @_resblock_kernel(%arg0: i32, %arg1: memref<1x18x18x128xbf16, #tpu.memory_space<vmem>>, %arg2: memref<1152x128xbf16, #tpu.memory_space<vmem>>, %arg3: memref<1x128xf32, #tpu.memory_space<vmem>>, %arg4: memref<1152x128xbf16, #tpu.memory_space<vmem>>, %arg5: memref<1x128xf32, #tpu.memory_space<vmem>>, %arg6: memref<128x128xbf16, #tpu.memory_space<vmem>>, %arg7: memref<1x16x16x128xf32, #tpu.memory_space<vmem>>, %arg8: memref<1x18x32x128xbf16, #tpu.memory_space<vmem>>) attributes {dimension_semantics = [#tpu.dimension_semantics<parallel>], iteration_bounds = array<i64: 2>, scalar_prefetch = 0 : i64, scratch_operands = 1 : i64, tpu.core_type = #tpu.core_type<tc>, window_params = [{transform_indices = @transform_0, window_bounds = array<i64: 1, 18, 18, 128>}, {pipeline_mode = #tpu.pipeline_mode<synchronous>, transform_indices = @transform_1, window_bounds = array<i64: 1152, 128>}, {pipeline_mode = #tpu.pipeline_mode<synchronous>, transform_indices = @transform_2, window_bounds = array<i64: 1, 128>}, {pipeline_mode = #tpu.pipeline_mode<synchronous>, transform_indices = @transform_3, window_bounds = array<i64: 1152, 128>}, {pipeline_mode = #tpu.pipeline_mode<synchronous>, transform_indices = @transform_4, window_bounds = array<i64: 1, 128>}, {pipeline_mode = #tpu.pipeline_mode<synchronous>, transform_indices = @transform_5, window_bounds = array<i64: 128, 128>}, {transform_indices = @transform_6, window_bounds = array<i64: 1, 16, 16, 128>}]} {
    %c0 = arith.constant 0 : index
    %c0_0 = arith.constant 0 : index
    %c0_1 = arith.constant 0 : index
    %c0_2 = arith.constant 0 : index
    %0 = vector.load %arg1[%c0, %c0_0, %c0_1, %c0_2] : memref<1x18x18x128xbf16, #tpu.memory_space<vmem>>, vector<1x18x18x128xbf16>
    %1 = vector.extract_strided_slice %0 {offsets = [0, 0, 0, 0], sizes = [1, 16, 16, 128], strides = [1, 1, 1, 1]} : vector<1x18x18x128xbf16> to vector<1x16x16x128xbf16>
    %2 = vector.shape_cast %1 : vector<1x16x16x128xbf16> to vector<256x128xbf16>
    %3 = vector.extract_strided_slice %0 {offsets = [0, 0, 1, 0], sizes = [1, 16, 16, 128], strides = [1, 1, 1, 1]} : vector<1x18x18x128xbf16> to vector<1x16x16x128xbf16>
    %4 = vector.shape_cast %3 : vector<1x16x16x128xbf16> to vector<256x128xbf16>
    %5 = vector.extract_strided_slice %0 {offsets = [0, 0, 2, 0], sizes = [1, 16, 16, 128], strides = [1, 1, 1, 1]} : vector<1x18x18x128xbf16> to vector<1x16x16x128xbf16>
    %6 = vector.shape_cast %5 : vector<1x16x16x128xbf16> to vector<256x128xbf16>
    %7 = vector.extract_strided_slice %0 {offsets = [0, 1, 0, 0], sizes = [1, 16, 16, 128], strides = [1, 1, 1, 1]} : vector<1x18x18x128xbf16> to vector<1x16x16x128xbf16>
    %8 = vector.shape_cast %7 : vector<1x16x16x128xbf16> to vector<256x128xbf16>
    %9 = vector.extract_strided_slice %0 {offsets = [0, 1, 1, 0], sizes = [1, 16, 16, 128], strides = [1, 1, 1, 1]} : vector<1x18x18x128xbf16> to vector<1x16x16x128xbf16>
    %10 = vector.shape_cast %9 : vector<1x16x16x128xbf16> to vector<256x128xbf16>
    %11 = vector.extract_strided_slice %0 {offsets = [0, 1, 2, 0], sizes = [1, 16, 16, 128], strides = [1, 1, 1, 1]} : vector<1x18x18x128xbf16> to vector<1x16x16x128xbf16>
    %12 = vector.shape_cast %11 : vector<1x16x16x128xbf16> to vector<256x128xbf16>
    %13 = vector.extract_strided_slice %0 {offsets = [0, 2, 0, 0], sizes = [1, 16, 16, 128], strides = [1, 1, 1, 1]} : vector<1x18x18x128xbf16> to vector<1x16x16x128xbf16>
    %14 = vector.shape_cast %13 : vector<1x16x16x128xbf16> to vector<256x128xbf16>
    %15 = vector.extract_strided_slice %0 {offsets = [0, 2, 1, 0], sizes = [1, 16, 16, 128], strides = [1, 1, 1, 1]} : vector<1x18x18x128xbf16> to vector<1x16x16x128xbf16>
    %16 = vector.shape_cast %15 : vector<1x16x16x128xbf16> to vector<256x128xbf16>
    %17 = vector.extract_strided_slice %0 {offsets = [0, 2, 2, 0], sizes = [1, 16, 16, 128], strides = [1, 1, 1, 1]} : vector<1x18x18x128xbf16> to vector<1x16x16x128xbf16>
    %18 = vector.shape_cast %17 : vector<1x16x16x128xbf16> to vector<256x128xbf16>
    %19 = tpu.concatenate %2, %4, %6, %8, %10, %12, %14, %16, %18 in 1 : vector<256x128xbf16>, vector<256x128xbf16>, vector<256x128xbf16>, vector<256x128xbf16>, vector<256x128xbf16>, vector<256x128xbf16>, vector<256x128xbf16>, vector<256x128xbf16>, vector<256x128xbf16> -> vector<256x1152xbf16>
    %c0_3 = arith.constant 0 : index
    %c0_4 = arith.constant 0 : index
    %20 = vector.load %arg2[%c0_3, %c0_4] : memref<1152x128xbf16, #tpu.memory_space<vmem>>, vector<1152x128xbf16>
    %cst = arith.constant dense<0.000000e+00> : vector<256x128xf32>
    %21 = tpu.matmul %19, %20, %cst {dimension_numbers = #tpu.dot_dimension_numbers<[1], [0], [0], [1], [0, 0, 1, 1], [], []>} : vector<256x1152xbf16>, vector<1152x128xbf16>, vector<256x128xf32> -> vector<256x128xf32>
    %c0_5 = arith.constant 0 : index
    %c0_6 = arith.constant 0 : index
    %22 = vector.load %arg3[%c0_5, %c0_6] : memref<1x128xf32, #tpu.memory_space<vmem>>, vector<1x128xf32>
    %23 = vector.broadcast %22 : vector<1x128xf32> to vector<256x128xf32>
    %24 = arith.addf %21, %23 : vector<256x128xf32>
    %cst_7 = arith.constant 0.000000e+00 : f32
    %25 = vector.broadcast %cst_7 : f32 to vector<256x128xf32>
    %26 = arith.maximumf %24, %25 : vector<256x128xf32>
    %cst_8 = arith.constant 0.000000e+00 : bf16
    %27 = vector.broadcast %cst_8 : bf16 to vector<1x1x32x128xbf16>
    %cst_9 = arith.constant 0.000000e+00 : bf16
    %28 = vector.broadcast %cst_9 : bf16 to vector<1x18x8x128xbf16>
    %c0_10 = arith.constant 0 : index
    %c0_11 = arith.constant 0 : index
    %c0_12 = arith.constant 0 : index
    %c0_13 = arith.constant 0 : index
    %29 = vector.load %arg8[%c0_10, %c0_11, %c0_12, %c0_13] : memref<1x18x32x128xbf16, #tpu.memory_space<vmem>>, vector<1x1x32x128xbf16>
    tpu.vector_store %arg8[%c0_10, %c0_11, %c0_12, %c0_13], %27 {strides = array<i32>} : memref<1x18x32x128xbf16, #tpu.memory_space<vmem>>, vector<1x1x32x128xbf16>,
    %c0_14 = arith.constant 0 : index
    %c17 = arith.constant 17 : index
    %c0_15 = arith.constant 0 : index
    %c0_16 = arith.constant 0 : index
    %30 = vector.load %arg8[%c0_14, %c17, %c0_15, %c0_16] : memref<1x18x32x128xbf16, #tpu.memory_space<vmem>>, vector<1x1x32x128xbf16>
    tpu.vector_store %arg8[%c0_14, %c17, %c0_15, %c0_16], %27 {strides = array<i32>} : memref<1x18x32x128xbf16, #tpu.memory_space<vmem>>, vector<1x1x32x128xbf16>,
    %c0_17 = arith.constant 0 : index
    %c0_18 = arith.constant 0 : index
    %c0_19 = arith.constant 0 : index
    %c0_20 = arith.constant 0 : index
    %31 = vector.load %arg8[%c0_17, %c0_18, %c0_19, %c0_20] : memref<1x18x32x128xbf16, #tpu.memory_space<vmem>>, vector<1x18x8x128xbf16>
    tpu.vector_store %arg8[%c0_17, %c0_18, %c0_19, %c0_20], %28 {strides = array<i32>} : memref<1x18x32x128xbf16, #tpu.memory_space<vmem>>, vector<1x18x8x128xbf16>,
    %c0_21 = arith.constant 0 : index
    %c0_22 = arith.constant 0 : index
    %c24 = arith.constant 24 : index
    %c0_23 = arith.constant 0 : index
    %32 = vector.load %arg8[%c0_21, %c0_22, %c24, %c0_23] : memref<1x18x32x128xbf16, #tpu.memory_space<vmem>>, vector<1x18x8x128xbf16>
    tpu.vector_store %arg8[%c0_21, %c0_22, %c24, %c0_23], %28 {strides = array<i32>} : memref<1x18x32x128xbf16, #tpu.memory_space<vmem>>, vector<1x18x8x128xbf16>,
    %33 = arith.truncf %26 : vector<256x128xf32> to vector<256x128xbf16>
    %34 = vector.shape_cast %33 : vector<256x128xbf16> to vector<1x16x16x128xbf16>
    %c0_24 = arith.constant 0 : index
    %c1 = arith.constant 1 : index
    %c8 = arith.constant 8 : index
    %c0_25 = arith.constant 0 : index
    %35 = vector.load %arg8[%c0_24, %c1, %c8, %c0_25] : memref<1x18x32x128xbf16, #tpu.memory_space<vmem>>, vector<1x16x16x128xbf16>
    tpu.vector_store %arg8[%c0_24, %c1, %c8, %c0_25], %34 {strides = array<i32>} : memref<1x18x32x128xbf16, #tpu.memory_space<vmem>>, vector<1x16x16x128xbf16>,
    %c0_26 = arith.constant 0 : index
    %c0_27 = arith.constant 0 : index
    %c7 = arith.constant 7 : index
    %c0_28 = arith.constant 0 : index
    %36 = vector.load %arg8[%c0_26, %c0_27, %c7, %c0_28] : memref<1x18x32x128xbf16, #tpu.memory_space<vmem>>, vector<1x16x16x128xbf16>
    %37 = vector.shape_cast %36 : vector<1x16x16x128xbf16> to vector<256x128xbf16>
    %c0_29 = arith.constant 0 : index
    %c0_30 = arith.constant 0 : index
    %c8_31 = arith.constant 8 : index
    %c0_32 = arith.constant 0 : index
    %38 = vector.load %arg8[%c0_29, %c0_30, %c8_31, %c0_32] : memref<1x18x32x128xbf16, #tpu.memory_space<vmem>>, vector<1x16x16x128xbf16>
    %39 = vector.shape_cast %38 : vector<1x16x16x128xbf16> to vector<256x128xbf16>
    %c0_33 = arith.constant 0 : index
    %c0_34 = arith.constant 0 : index
    %c9 = arith.constant 9 : index
    %c0_35 = arith.constant 0 : index
    %40 = vector.load %arg8[%c0_33, %c0_34, %c9, %c0_35] : memref<1x18x32x128xbf16, #tpu.memory_space<vmem>>, vector<1x16x16x128xbf16>
    %41 = vector.shape_cast %40 : vector<1x16x16x128xbf16> to vector<256x128xbf16>
    %c0_36 = arith.constant 0 : index
    %c1_37 = arith.constant 1 : index
    %c7_38 = arith.constant 7 : index
    %c0_39 = arith.constant 0 : index
    %42 = vector.load %arg8[%c0_36, %c1_37, %c7_38, %c0_39] : memref<1x18x32x128xbf16, #tpu.memory_space<vmem>>, vector<1x16x16x128xbf16>
    %43 = vector.shape_cast %42 : vector<1x16x16x128xbf16> to vector<256x128xbf16>
    %c0_40 = arith.constant 0 : index
    %c1_41 = arith.constant 1 : index
    %c8_42 = arith.constant 8 : index
    %c0_43 = arith.constant 0 : index
    %44 = vector.load %arg8[%c0_40, %c1_41, %c8_42, %c0_43] : memref<1x18x32x128xbf16, #tpu.memory_space<vmem>>, vector<1x16x16x128xbf16>
    %45 = vector.shape_cast %44 : vector<1x16x16x128xbf16> to vector<256x128xbf16>
    %c0_44 = arith.constant 0 : index
    %c1_45 = arith.constant 1 : index
    %c9_46 = arith.constant 9 : index
    %c0_47 = arith.constant 0 : index
    %46 = vector.load %arg8[%c0_44, %c1_45, %c9_46, %c0_47] : memref<1x18x32x128xbf16, #tpu.memory_space<vmem>>, vector<1x16x16x128xbf16>
    %47 = vector.shape_cast %46 : vector<1x16x16x128xbf16> to vector<256x128xbf16>
    %c0_48 = arith.constant 0 : index
    %c2 = arith.constant 2 : index
    %c7_49 = arith.constant 7 : index
    %c0_50 = arith.constant 0 : index
    %48 = vector.load %arg8[%c0_48, %c2, %c7_49, %c0_50] : memref<1x18x32x128xbf16, #tpu.memory_space<vmem>>, vector<1x16x16x128xbf16>
    %49 = vector.shape_cast %48 : vector<1x16x16x128xbf16> to vector<256x128xbf16>
    %c0_51 = arith.constant 0 : index
    %c2_52 = arith.constant 2 : index
    %c8_53 = arith.constant 8 : index
    %c0_54 = arith.constant 0 : index
    %50 = vector.load %arg8[%c0_51, %c2_52, %c8_53, %c0_54] : memref<1x18x32x128xbf16, #tpu.memory_space<vmem>>, vector<1x16x16x128xbf16>
    %51 = vector.shape_cast %50 : vector<1x16x16x128xbf16> to vector<256x128xbf16>
    %c0_55 = arith.constant 0 : index
    %c2_56 = arith.constant 2 : index
    %c9_57 = arith.constant 9 : index
    %c0_58 = arith.constant 0 : index
    %52 = vector.load %arg8[%c0_55, %c2_56, %c9_57, %c0_58] : memref<1x18x32x128xbf16, #tpu.memory_space<vmem>>, vector<1x16x16x128xbf16>
    %53 = vector.shape_cast %52 : vector<1x16x16x128xbf16> to vector<256x128xbf16>
    %54 = tpu.concatenate %37, %39, %41, %43, %45, %47, %49, %51, %53 in 1 : vector<256x128xbf16>, vector<256x128xbf16>, vector<256x128xbf16>, vector<256x128xbf16>, vector<256x128xbf16>, vector<256x128xbf16>, vector<256x128xbf16>, vector<256x128xbf16>, vector<256x128xbf16> -> vector<256x1152xbf16>
    %c0_59 = arith.constant 0 : index
    %c0_60 = arith.constant 0 : index
    %55 = vector.load %arg4[%c0_59, %c0_60] : memref<1152x128xbf16, #tpu.memory_space<vmem>>, vector<1152x128xbf16>
    %cst_61 = arith.constant dense<0.000000e+00> : vector<256x128xf32>
    %56 = tpu.matmul %54, %55, %cst_61 {dimension_numbers = #tpu.dot_dimension_numbers<[1], [0], [0], [1], [0, 0, 1, 1], [], []>} : vector<256x1152xbf16>, vector<1152x128xbf16>, vector<256x128xf32> -> vector<256x128xf32>
    %c0_62 = arith.constant 0 : index
    %c0_63 = arith.constant 0 : index
    %57 = vector.load %arg5[%c0_62, %c0_63] : memref<1x128xf32, #tpu.memory_space<vmem>>, vector<1x128xf32>
    %58 = vector.broadcast %57 : vector<1x128xf32> to vector<256x128xf32>
    %59 = arith.addf %56, %58 : vector<256x128xf32>
    %60 = vector.extract_strided_slice %0 {offsets = [0, 1, 1, 0], sizes = [1, 16, 16, 128], strides = [1, 1, 1, 1]} : vector<1x18x18x128xbf16> to vector<1x16x16x128xbf16>
    %61 = vector.shape_cast %60 : vector<1x16x16x128xbf16> to vector<256x128xbf16>
    %c0_64 = arith.constant 0 : index
    %c0_65 = arith.constant 0 : index
    %62 = vector.load %arg6[%c0_64, %c0_65] : memref<128x128xbf16, #tpu.memory_space<vmem>>, vector<128x128xbf16>
    %cst_66 = arith.constant dense<0.000000e+00> : vector<256x128xf32>
    %63 = tpu.matmul %61, %62, %cst_66 {dimension_numbers = #tpu.dot_dimension_numbers<[1], [0], [0], [1], [0, 0, 1, 1], [], []>} : vector<256x128xbf16>, vector<128x128xbf16>, vector<256x128xf32> -> vector<256x128xf32>
    %64 = arith.addf %59, %63 : vector<256x128xf32>
    %cst_67 = arith.constant 0.000000e+00 : f32
    %65 = vector.broadcast %cst_67 : f32 to vector<256x128xf32>
    %66 = arith.maximumf %64, %65 : vector<256x128xf32>
    %67 = vector.shape_cast %66 : vector<256x128xf32> to vector<1x16x16x128xf32>
    %c0_68 = arith.constant 0 : index
    %c0_69 = arith.constant 0 : index
    %c0_70 = arith.constant 0 : index
    %c0_71 = arith.constant 0 : index
    %68 = vector.load %arg7[%c0_68, %c0_69, %c0_70, %c0_71] : memref<1x16x16x128xf32, #tpu.memory_space<vmem>>, vector<1x16x16x128xf32>
    tpu.vector_store %arg7[%c0_68, %c0_69, %c0_70, %c0_71], %67 {strides = array<i32>} : memref<1x16x16x128xf32, #tpu.memory_space<vmem>>, vector<1x16x16x128xf32>,
    return
  }
  func.func @transform_0(%arg0: i32) -> (i32, i32, i32, i32) {
    %c0_i32 = arith.constant 0 : i32
    %c0_i32_0 = arith.constant 0 : i32
    %c0_i32_1 = arith.constant 0 : i32
    %c0_i32_2 = arith.constant 0 : i32
    return %arg0, %c0_i32, %c0_i32_0, %c0_i32_1 : i32, i32, i32, i32
  }
  func.func @transform_1(%arg0: i32) -> (i32, i32) {
    %c0_i32 = arith.constant 0 : i32
    %c0_i32_0 = arith.constant 0 : i32
    %c0_i32_1 = arith.constant 0 : i32
    return %c0_i32, %c0_i32_0 : i32, i32
  }
  func.func @transform_2(%arg0: i32) -> (i32, i32) {
    %c0_i32 = arith.constant 0 : i32
    %c0_i32_0 = arith.constant 0 : i32
    %c0_i32_1 = arith.constant 0 : i32
    return %c0_i32, %c0_i32_0 : i32, i32
  }
  func.func @transform_3(%arg0: i32) -> (i32, i32) {
    %c0_i32 = arith.constant 0 : i32
    %c0_i32_0 = arith.constant 0 : i32
    %c0_i32_1 = arith.constant 0 : i32
    return %c0_i32, %c0_i32_0 : i32, i32
  }
  func.func @transform_4(%arg0: i32) -> (i32, i32) {
    %c0_i32 = arith.constant 0 : i32
    %c0_i32_0 = arith.constant 0 : i32
    %c0_i32_1 = arith.constant 0 : i32
    return %c0_i32, %c0_i32_0 : i32, i32
  }
  func.func @transform_5(%arg0: i32) -> (i32, i32) {
    %c0_i32 = arith.constant 0 : i32
    %c0_i32_0 = arith.constant 0 : i32
    %c0_i32_1 = arith.constant 0 : i32
    return %c0_i32, %c0_i32_0 : i32, i32
  }
  func.func @transform_6(%arg0: i32) -> (i32, i32, i32, i32) {
    %c0_i32 = arith.constant 0 : i32
    %c0_i32_0 = arith.constant 0 : i32
    %c0_i32_1 = arith.constant 0 : i32
    %c0_i32_2 = arith.constant 0 : i32
    return %arg0, %c0_i32, %c0_i32_0, %c0_i32_1 : i32, i32, i32, i32
  }
}

</mosaic_0001>

<bundles_post_ra>
// kernel: residual_block_nobn.1
= control target key start
LH: loop header
LB: loop body
LE: loop exit
PB: predicated region body
PF: predicated region fallthrough
CT: control target
= control target key end

     0   :  { %s8362_s21 = smov 0   ;;  %s10970_s0 = inlined_call_operand.vmem [shape: bf16[2,18,18,128], index: 0, kind: input, shape index: {}]   ;;  %s10971_s1 = inlined_call_operand.vmem [shape: bf16[1152,128], index: 1, kind: input, shape index: {}]   ;;  %s10972_s2 = inlined_call_operand.vmem [shape: f32[1,128], index: 2, kind: input, shape index: {}]   ;;  %s10973_s3 = inlined_call_operand.vmem [shape: bf16[1152,128], index: 3, kind: input, shape index: {}]   ;;  %s10974_s4 = inlined_call_operand.vmem [shape: f32[1,128], index: 4, kind: input, shape index: {}]   ;;  %s10975_s5 = inlined_call_operand.vmem [shape: bf16[128,128], index: 5, kind: input, shape index: {}]   ;;  %s10976_s6 = inlined_call_operand.vmem [shape: f32[2,16,16,128], index: 6, kind: output, shape index: {}]  }
   0x1 LB: > { %s6674_s22 = sadd.s32 4294967295, %s8324_s21   ;;  %p6678_p0 = scmp.ge.s32.totalorder %s8324_s21, 1  ;;  %s8324_s21 = sphi %s8362_s21, %s16_s21  }
   0x2   : > { %p212_p1 = scmp.lt.s32.totalorder %s8324_s21, 3 }
   0x4   : > { %p213_p2 = pnand %p6678_p0, %p212_p1 }
   0x6   : > { %216 = sbr.rel (%p213_p2) target bundleno = 1194 (0x4aa), region = 44 }
   0xd   : > { %v8113_v0 = vld [vmem:[%s10971_s1 + $0x40] sm:$0xff]   ;;  %p242_p3 = scmp.lt.s32.totalorder %s6674_s22, 1  ;;  %v8115_v2 = vld [vmem:[%s10971_s1 + $0x48] sm:$0xff]   ;;  %v8117_v4 = vld [vmem:[%s10971_s1 + $0x50] sm:$0xff]   ;;  %vm742_vm0 = vcmask 1042432   ;;  %vm743_vm1 = vcmask 1046532  }
   0xe   : > { %v8114_v1 = vld [vmem:[%s10971_s1] sm:$0xff]   ;;  %6911 = vmatprep.subr.bf16.mxu0 %v8113_v0  ;;  %v8116_v3 = vld [vmem:[%s10971_s1 + $0x8] sm:$0xff]   ;;  %v8118_v5 = vld [vmem:[%s10971_s1 + $0x10] sm:$0xff]   ;;  %vm307_vm2 = vsmask.f32 3328  ;;  %vm3068_vm6 = vcmask 1043456  }
   0xf   : > { %6912 = vmatpush3.bf16.msra.mxu0 %v8114_v1  ;;  %s11077_s22 = smov (!%p242_p3, %s6674_s22), 1  ;;  %v8119_v6 = vld [vmem:[%s10971_s1 + $0x58] sm:$0xff]   ;;  %v8121_v8 = vld [vmem:[%s10971_s1 + $0x60] sm:$0xff]   ;;  %v8123_v10 = vld [vmem:[%s10971_s1 + $0x68] sm:$0xff]   ;;  %vm308_vm3 = vsmask.f32 7440 }
  0x10   : > { %6913 = vmatprep.subr.bf16.mxu0 %v8115_v2  ;;  %s8103_s13 = smul.u32 216, %s11077_s22  ;;  %v8120_v7 = vld [vmem:[%s10971_s1 + $0x18] sm:$0xff]   ;;  %v8122_v9 = vld [vmem:[%s10971_s1 + $0x20] sm:$0xff]   ;;  %v8124_v14 = vld [vmem:[%s10971_s1 + $0x28] sm:$0xff]   ;;  %vm2731_vm7 = vsmask.f32 4352 }
  0x11   : > { %v8125_v17 = vld [vmem:[%s10971_s1 + $0x70] sm:$0xff]   ;;  %vm8430_vm4 = vmor %vm742_vm0, %vm743_vm1  ;;  %v8130_v30 = vld [vmem:[%s10971_s1 + $0xc0] sm:$0xff]   ;;  %s6910_s14 = sshll.u32 %s11077_s22, 8 }
  0x12   : > { %s8403_s20 = scalar_lea.vmem %s10970_s0, %s8103_s13  ;;  %vm8436_vm5 = vmor %vm307_vm2, %vm308_vm3  ;;  %v8126_v31 = vld [vmem:[%s10971_s1 + $0x30] sm:$0xff]   ;;  %v8450_v34 = vld [vmem:[%s10971_s1 + $0x80] sm:$0xff]   ;;  %8023 = vmatprep.subr.bf16.mxu1 %v8130_v30  ;;  %s10902_s17 = scalar_lea.vmem %s10976_s6, %s6910_s14 }
  0x13   : > { %6914 = vmatpush3.bf16.msra.mxu0 %v8116_v3  ;;  %v8412_v11 = vld [vmem:[%s8403_s20] sm:$0xf]  ;;  %v8415_v12 = vld [vmem:[%s8403_s20 + $0x4] sm:$0xf]  ;;  %v255_v13 = vld [vmem:[%s8403_s20 + $0x8] sm:$0x1]  ;;  %8031 = vmatpush3.bf16.msra.mxu1 %v8450_v34 }
  0x14   : > { %6915 = vmatprep.subr.bf16.mxu0 %v8117_v4  ;;  %v311_v15 = vshrl.u32 %v8412_v11, 16  ;;  %v314_v16 = vshll.u32 %v8412_v11, 16  ;;  %v320_v18 = vshll.u32 %v8415_v12, 16  ;;  %v324_v19 = vshrl.u32 %v8415_v12, 16  ;;  %v8127_v35 = vld [vmem:[%s10971_s1 + $0x78] sm:$0xff]   ;;  %v8458_v38 = vld [vmem:[%s10971_s1 + $0xc8] sm:$0xff]  }
  0x15   : > { %v330_v20 = vshll.u32 %v255_v13, 16  ;;  %v747_v24 = vrot.slane %v8415_v12, 5  ;;  %v750_v25 = vrot.slane %v255_v13, 5  ;;  %v6682_v29 = vrot.slane %v8412_v11, 9  ;;  %v8461_v39 = vld [vmem:[%s8403_s20 + $0xc] sm:$0xf]  ;;  %8024 = vmatprep.subr.bf16.mxu1 %v8458_v38 }
  0x16   : > { %v313_v21 = vrot.slane %v311_v15, 4  ;;  %v316_v22 = vrot.slane %v314_v16, 5  ;;  %v322_v27 = vrot.slane %v320_v18, 5  ;;  %v326_v28 = vrot.slane %v324_v19, 4  ;;  %v8469_v42 = vld [vmem:[%s8403_s20 + $0x10] sm:$0xf] }
  0x17   : > { %6916 = vmatpush3.bf16.msra.mxu0 %v8118_v5  ;;  %v749_v33 = vrot.slane %v747_v24, 4  ;;  %v332_v37 = vrot.slane %v330_v20, 5  ;;  %v258_v43 = vld [vmem:[%s8403_s20 + $0x14] sm:$0x1]  ;;  %v335_v44 = vshrl.u32 %v8461_v39, 16  ;;  %v338_v46 = vshll.u32 %v8461_v39, 16 }
  0x18   : > { %6917 = vmatprep.subr.bf16.mxu0 %v8119_v6  ;;  %v317_v32 = vor.u32 %v316_v22, %v313_v21  ;;  %v327_v36 = vor.u32 %v326_v28, %v322_v27  ;;  %v344_v47 = vshll.u32 %v8469_v42, 16  ;;  %v348_v48 = vshrl.u32 %v8469_v42, 16  ;;  %v8128_v49 = vld [vmem:[%s10971_s1 + $0x38] sm:$0xff]   ;;  %v8485_v53 = vld [vmem:[%s10971_s1 + $0x88] sm:$0xff]   ;;  %v8490_v54 = vld [vmem:[%s10971_s1 + $0xd0] sm:$0xff]  }
  0x19   : > { %v8465_v41 = vsel %vm8430_vm4, %v749_v33, %v750_v25  ;;  %v337_v51 = vrot.slane %v335_v44, 4  ;;  %v354_v52 = vshll.u32 %v258_v43, 16  ;;  %v340_v56 = vrot.slane %v338_v46, 5  ;;  %v8497_v59 = vld [vmem:[%s10971_s1 + $0x90] sm:$0xff]   ;;  %8032 = vmatpush3.bf16.msra.mxu1 %v8485_v53  ;;  %v8503_v62 = vld [vmem:[%s10971_s1 + $0xd8] sm:$0xff]   ;;  %v8541_v22 = vld [vmem:[%s10971_s1 + $0xe0] sm:$0xff]  }
  0x1a   : > { %v318_v40 = vrot.slane %v317_v32, 4  ;;  %v328_v45 = vrot.slane %v327_v36, 4  ;;  %v346_v57 = vrot.slane %v344_v47, 5  ;;  %v350_v58 = vrot.slane %v348_v48, 4  ;;  %8025 = vmatprep.subr.bf16.mxu1 %v8490_v54  ;;  %v8515_v4 = vld [vmem:[%s8403_s20 + $0x18] sm:$0xf] }
  0x1b   : > { %6918 = vmatpush3.bf16.msra.mxu0 %v8120_v7  ;;  %v356_v61 = vrot.slane %v354_v52, 5  ;;  %v8507_v63 = vsel %vm8430_vm4, %v6682_v29, %v747_v24  ;;  %v341_v0 = vor.u32 %v340_v56, %v337_v51  ;;  %v6700_v3 = vcombine.low %v8412_v11, %v8415_v12  ;;  %v8518_v5 = vld [vmem:[%s8403_s20 + $0x1c] sm:$0xf]  ;;  %v261_v6 = vld [vmem:[%s8403_s20 + $0x20] sm:$0x1]  ;;  %v8553_v29 = vld [vmem:[%s10971_s1 + $0xe8] sm:$0xff]  }
  0x1c   : > { %6919 = vmatprep.subr.bf16.mxu0 %v8121_v8  ;;  %v323_v50 = vsel %vm8436_vm5, %v318_v40, %v322_v27  ;;  %v333_v55 = vsel %vm8436_vm5, %v328_v45, %v332_v37  ;;  %v351_v1 = vor.u32 %v350_v58, %v346_v57  ;;  %v368_v13 = vshll.u32 %v8518_v5, 16  ;;  %v8529_v11 = vld [vmem:[%s10971_s1 + $0x98] sm:$0xff]   ;;  %v8546_v25 = vld [vmem:[%s10971_s1 + $0xa0] sm:$0xff]   ;;  %v8561_v32 = vld [vmem:[%s8403_s20 + $0x28] sm:$0xf] }
  0x1d   : > { %v6716_v60 = vcombine.low %v323_v50, %v333_v55  ;;  %v342_v7 = vrot.slane %v341_v0, 4  ;;  %8033 = vmatpush3.bf16.msra.mxu1 %v8497_v59  ;;  %v378_v15 = vshll.u32 %v261_v6, 16  ;;  %v264_v33 = vld [vmem:[%s8403_s20 + $0x2c] sm:$0x1]  ;;  %v392_v37 = vshll.u32 %v8561_v32, 16  ;;  %v8589_v52 = vld [vmem:[%s10971_s1 + $0xf0] sm:$0xff]  }
  0x1e   : > { %v352_v8 = vrot.slane %v351_v1, 4  ;;  %8026 = vmatprep.subr.bf16.mxu1 %v8503_v62  ;;  %v370_v20 = vrot.slane %v368_v13, 5  ;;  %v396_v40 = vshrl.u32 %v8561_v32, 16  ;;  %v8571_v43 = vcombine.low %v8461_v39, %v8469_v42  ;;  %v8581_v39 = vld [vmem:[%s10971_s1 + $0xa8] sm:$0xff]   ;;  %v8597_v56 = vld [vmem:[%s10971_s1 + $0xb0] sm:$0xff]   ;;  %v8620_v6 = vld [vmem:[%s10971_s1 + $0xf8] sm:$0xff]  }
  0x1f   : > { %6920 = vmatpush3.bf16.msra.mxu0 %v8122_v9  ;;  %1756 = vmatprep.mubr.bf16.mxu0 %v6716_v60  ;;  %v359_v9 = vshrl.u32 %v8515_v4, 16  ;;  %v347_v12 = vsel %vm8436_vm5, %v342_v7, %v346_v57  ;;  %v380_v28 = vrot.slane %v378_v15, 5  ;;  %v402_v45 = vshll.u32 %v264_v33, 16  ;;  %v8600_v57 = vld [vmem:[%s8403_s20 + $0x30] sm:$0xf] }
  0x20   : > { %6921 = vmatprep.subr.bf16.mxu0 %v8123_v10  ;;  %v362_v10 = vshll.u32 %v8515_v4, 16  ;;  %v357_v16 = vsel %vm8436_vm5, %v352_v8, %v356_v61  ;;  %v394_v48 = vrot.slane %v392_v37, 5  ;;  %v8603_v58 = vld [vmem:[%s8403_s20 + $0x34] sm:$0xf]  ;;  %v8606_v60 = vld [vmem:[%s8403_s20 + $0x38] sm:$0x1] }
  0x21   : > { %v8536_v19 = vcombine.low %v347_v12, %v357_v16  ;;  %8034 = vmatpush3.bf16.msra.mxu1 %v8529_v11  ;;  %v404_v51 = vrot.slane %v402_v45, 5  ;;  %v407_v0 = vshrl.u32 %v8600_v57, 16  ;;  %v410_v1 = vshll.u32 %v8600_v57, 16  ;;  %v8632_v13 = vld [vmem:[%s8403_s20 + $0x3c] sm:$0xf] }
  0x22   : > { %v364_v18 = vrot.slane %v362_v10, 5  ;;  %8027 = vmatprep.subr.bf16.mxu1 %v8541_v22  ;;  %v416_v7 = vshll.u32 %v8603_v58, 16  ;;  %v420_v8 = vshrl.u32 %v8603_v58, 16  ;;  %v6686_v33 = vrot.slane %v8600_v57, 9  ;;  %v9042_v2 = vld [vmem:[%s8403_s20 + $0xb4] sm:$0xf] }
  0x23   : > { %6922 = vmatpush3.bf16.msra.mxu0 %v8124_v14  ;;  %v372_v14 = vshrl.u32 %v8518_v5, 16  ;;  %11016 = vst [vmem:[#allocation3_spill] sm:$0xff] %v8536_v19  ;;  %v412_v10 = vrot.slane %v410_v1, 5  ;;  %v775_v45 = vrot.slane %v8603_v58, 5 }
  0x24   : > { %6923 = vmatprep.subr.bf16.mxu0 %v8125_v17  ;;  %v361_v17 = vrot.slane %v359_v9, 4  ;;  %v426_v9 = vshll.u32 %v8606_v60, 16  ;;  %v418_v12 = vrot.slane %v416_v7, 5 }
  0x25   : > { %v374_v21 = vrot.slane %v372_v14, 4  ;;  %8035 = vmatpush3.bf16.msra.mxu1 %v8546_v25  ;;  %v8635_v14 = vld [vmem:[%s8403_s20 + $0x40] sm:$0xf] }
  0x26   : > { %v365_v24 = vor.u32 %v364_v18, %v361_v17  ;;  %8028 = vmatprep.subr.bf16.mxu1 %v8553_v29  ;;  %v428_v16 = vrot.slane %v426_v9, 5  ;;  %v8642_v18 = vld [vmem:[%s10971_s1 + $0xb8] sm:$0xff]  }
  0x27   : > { %6924 = vmatpush3.bf16.msra.mxu0 %v8126_v31  ;;  %v375_v27 = vor.u32 %v374_v21, %v370_v20  ;;  %v434_v21 = vshll.u32 %v8632_v13, 16 }
  0x28   : > { %6925 = vmatprep.subr.bf16.mxu0 %v8127_v35  ;;  %v366_v31 = vrot.slane %v365_v24, 4  ;;  %v440_v24 = vshll.u32 %v8635_v14, 16 }
  0x29   : > { %v376_v35 = vrot.slane %v375_v27, 4  ;;  %8036 = vmatpush3.bf16.msra.mxu1 %v8581_v39  ;;  %v436_v37 = vrot.slane %v434_v21, 5  ;;  %v8165_v21 = vld [vmem:[%s10971_s1 + $0x180] sm:$0xff]  }
  0x2a   : > { %8029 = vmatprep.subr.bf16.mxu1 %v8589_v52 }
  0x2b   : > { %6926 = vmatpush3.bf16.msra.mxu0 %v8128_v49  ;;  %v381_v46 = vsel %vm8436_vm5, %v376_v35, %v380_v28  ;;  %v398_v49 = vrot.slane %v396_v40, 4  ;;  %v444_v28 = vshrl.u32 %v8635_v14, 16  ;;  %v8659_v35 = vld [vmem:[%s8403_s20 + $0x48] sm:$0xf]  ;;  %v8663_v40 = vrot.slane %v440_v24, 5 }
  0x2c   : > { %7023 = vmatprep.subr.bf16.mxu0 %v8130_v30  ;;  %v8556_v30 = vld [vmem:[%s8403_s20 + $0x24] sm:$0xf] }
  0x2d   : > { %v386_v36 = vshll.u32 %v8556_v30, 16  ;;  %v399_v55 = vor.u32 %v398_v49, %v394_v48  ;;  %8037 = vmatpush3.bf16.msra.mxu1 %v8597_v56  ;;  %v8674_v49 = vld [vmem:[%s8403_s20 + $0x4c] sm:$0xf] }
  0x2e   : > { %1757 = vmatmul.mubr.bf16.vlgmr.msra.gmra.mrb[0].mxu0 %v6700_v3  ;;  %v8614_v3 = vcombine.low %v8515_v4, %v8518_v5  ;;  %v409_v5 = vrot.slane %v407_v0, 4  ;;  %8030 = vmatprep.subr.bf16.mxu1 %v8620_v6 }
  0x2f   : > { %7024 = vmatpush3.bf16.msra.mxu0 %v8450_v34  ;;  %1764 = vmatprep.mubr.bf16.mxu0 %v8536_v19  ;;  %v383_v34 = vshrl.u32 %v8556_v30, 16  ;;  %v388_v47 = vrot.slane %v386_v36, 5  ;;  %v400_v61 = vrot.slane %v399_v55, 4  ;;  %v776_v55 = vsel %vm8430_vm4, %v6686_v33, %v775_v45 }
  0x30   : > { %7025 = vmatprep.subr.bf16.mxu0 %v8458_v38  ;;  %v371_v38 = vsel %vm8436_vm5, %v366_v31, %v370_v20  ;;  %v413_v17 = vor.u32 %v412_v10, %v409_v5  ;;  %v431_v20 = vshrl.u32 %v8632_v13, 16  ;;  %v8652_v31 = vcombine.low %v8632_v13, %v8635_v14  ;;  %v8706_v10 = vld [vmem:[%s8403_s20 + $0x50] sm:$0x1] }
  0x31   : > { %v385_v44 = vrot.slane %v383_v34, 4  ;;  %v8583_v50 = vcombine.low %v371_v38, %v381_v46  ;;  %v405_v4 = vsel %vm8436_vm5, %v400_v61, %v404_v51  ;;  %v8656_v34 = vld [vmem:[%s8403_s20 + $0x44] sm:$0x1]  ;;  %v778_v46 = vrot.slane %v8606_v60, 5  ;;  %8038 = vmatpush3.bf16.msra.mxu1 %v8642_v18 }
  0x32   : > { %v433_v36 = vrot.slane %v431_v20, 4  ;;  %1949 = vmatprep.mubr.bf16.mxu1 %v8652_v31  ;;  %v455_v51 = vshrl.u32 %v8659_v35, 16  ;;  %v777_v60 = vrot.slane %v775_v45, 4  ;;  %v8164_v61 = vld [vmem:[%s10971_s1 + $0x1c0] sm:$0xff]   ;;  %v8716_v20 = vld [vmem:[%s8403_s20 + $0x58] sm:$0xf] }
  0x33   : > { %7026 = vmatpush3.bf16.msra.mxu0 %v8485_v53  ;;  %11017 = vst [vmem:[#allocation4_spill] sm:$0xff] %v8583_v50  ;;  %v389_v53 = vor.u32 %v388_v47, %v385_v44  ;;  %v446_v44 = vrot.slane %v444_v28, 4  ;;  %7247 = vmatprep.subr.bf16.mxu1 %v8164_v61  ;;  %v785_v28 = vrot.slane %v8656_v34, 5  ;;  %v8172_v61 = vld [vmem:[%s10971_s1 + $0x1d0] sm:$0xff]  }
  0x34   : > { %7027 = vmatprep.subr.bf16.mxu0 %v8490_v54  ;;  %v437_v47 = vor.u32 %v436_v37, %v433_v36  ;;  %v457_v7 = vrot.slane %v455_v51, 4  ;;  %v474_v37 = vshll.u32 %v8706_v10, 16  ;;  %v8766_v51 = vld [vmem:[%s8403_s20 + $0x60] sm:$0xf] }
  0x35   : > { %v390_v54 = vrot.slane %v389_v53, 4 }
  0x36   : > { %1765 = vmatmul.mubr.bf16.gmra.mrb[4].mxu0 %v8571_v43  ;;  %v438_v0 = vrot.slane %v437_v47, 4  ;;  %v8169_v47 = vld [vmem:[%s10971_s1 + $0x188] sm:$0xff]  }
  0x37   : > { %1772 = vmatprep.mubr.bf16.mxu0 %v8583_v50  ;;  %7028 = vmatpush3.bf16.msra.mxu0 %v8497_v59  ;;  %v395_v59 = vsel %vm8436_vm5, %v390_v54, %v394_v48  ;;  %v450_v48 = vshll.u32 %v8656_v34, 16  ;;  %v447_v54 = vor.u32 %v446_v44, %v8663_v40 }
  0x38   : > { %7029 = vmatprep.subr.bf16.mxu0 %v8503_v62  ;;  %v8637_v15 = vcombine.low %v395_v59, %v405_v4  ;;  %v422_v62 = vrot.slane %v420_v8, 4  ;;  %v779_v8 = vsel %vm8430_vm4, %v777_v60, %v778_v46  ;;  %v458_v59 = vshll.u32 %v8659_v35, 16 }
  0x39   : > { %v452_v1 = vrot.slane %v450_v48, 5  ;;  %v448_v9 = vrot.slane %v447_v54, 4  ;;  %v8698_v5 = vcombine.low %v776_v55, %v779_v8  ;;  %v443_v24 = vsel %vm8436_vm5, %v438_v0, %v8663_v40 }
  0x3a   : > { %11018 = vst [vmem:[#allocation5_spill] sm:$0xff] %v8637_v15  ;;  %v423_v27 = vor.u32 %v422_v62, %v418_v12  ;;  %v460_v62 = vrot.slane %v458_v59, 5  ;;  %v488_v40 = vshll.u32 %v8716_v20, 16  ;;  %v492_v48 = vshrl.u32 %v8716_v20, 16 }
  0x3b   : > { %7030 = vmatpush3.bf16.msra.mxu0 %v8529_v11  ;;  %v414_v11 = vrot.slane %v413_v17, 4  ;;  %11020 = vst [vmem:[#allocation7_spill] sm:$0xff] %v8698_v5  ;;  %v6687_v17 = vrot.slane %v8632_v13, 9  ;;  %1950 = vmatmul.mubr.bf16.vlgmr.msra.gmra.mrb[0].mxu1 %v8698_v5  ;;  %v8168_v13 = vld [vmem:[%s10971_s1 + $0x1c8] sm:$0xff]   ;;  %v6688_v54 = vrot.slane %v8659_v35, 9  ;;  %v476_v0 = vrot.slane %v474_v37, 5 }
  0x3c   : > { %7031 = vmatprep.subr.bf16.mxu0 %v8541_v22  ;;  %v424_v38 = vrot.slane %v423_v27, 4  ;;  %v782_v27 = vrot.slane %v8635_v14, 5  ;;  %v461_v33 = vor.u32 %v460_v62, %v457_v7  ;;  %7248 = vmatpush3.bf16.msra.mxu1 %v8165_v21  ;;  %v789_v7 = vrot.slane %v8674_v49, 5  ;;  %v8173_v62 = vld [vmem:[%s10971_s1 + $0x190] sm:$0xff]  }
  0x3d   : > { %v419_v22 = vsel %vm8436_vm5, %v414_v11, %v418_v12  ;;  %v8709_v12 = vld [vmem:[%s8403_s20 + $0x54] sm:$0xf]  ;;  %7249 = vmatprep.subr.bf16.mxu1 %v8168_v13  ;;  %v792_v8 = vrot.slane %v8706_v10, 5 }
  0x3e   : > { %1773 = vmatmul.mubr.bf16.gmra.mrb[8].mxu0 %v8614_v3  ;;  %v429_v53 = vsel %vm8436_vm5, %v424_v38, %v428_v16  ;;  %v479_v11 = vshrl.u32 %v8709_v12, 16  ;;  %v482_v36 = vshll.u32 %v8709_v12, 16  ;;  %v783_v14 = vsel %vm8430_vm4, %v6687_v17, %v782_v27 }
  0x3f   : > { %1780 = vmatprep.mubr.bf16.mxu0 %v8637_v15  ;;  %7032 = vmatpush3.bf16.msra.mxu0 %v8546_v25  ;;  %v8690_v25 = vcombine.low %v8556_v30, %v8561_v32  ;;  %v8696_v4 = vcombine.low %v419_v22, %v429_v53  ;;  %v468_v30 = vshrl.u32 %v8674_v49, 16  ;;  %v8703_v32 = vcombine.low %v8659_v35, %v8674_v49  ;;  %v8162_v22 = vld [vmem:[%s10971_s1 + $0x140] sm:$0xff]  }
  0x40   : > { %7033 = vmatprep.subr.bf16.mxu0 %v8553_v29  ;;  %v464_v29 = vshll.u32 %v8674_v49, 16  ;;  %v784_v34 = vrot.slane %v782_v27, 4  ;;  %v8745_v38 = vcombine.low %v8600_v57, %v8603_v58  ;;  %v481_v45 = vrot.slane %v479_v11, 4  ;;  %7250 = vmatpush3.bf16.msra.mxu1 %v8169_v47 }
  0x41   : > { %11019 = vst [vmem:[#allocation6_spill] sm:$0xff] %v8696_v4  ;;  %1957 = vmatprep.mubr.bf16.mxu1 %v8703_v32  ;;  %v484_v46 = vrot.slane %v482_v36, 5  ;;  %v8759_v58 = vrot.slane %v488_v40, 5  ;;  %v462_v55 = vrot.slane %v461_v33, 4  ;;  %v8772_v60 = vcombine.low %v8709_v12, %v8716_v20  ;;  %7251 = vmatprep.subr.bf16.mxu1 %v8172_v61 }
  0x42   : > { %v8712_v16 = vrot.slane %v464_v29, 5  ;;  %v786_v57 = vsel %vm8430_vm4, %v784_v34, %v785_v28  ;;  %v503_v35 = vshrl.u32 %v8766_v51, 16  ;;  %v791_v49 = vrot.slane %v789_v7, 4  ;;  %v8810_v34 = vld [vmem:[%s8403_s20 + $0x6c] sm:$0xf] }
  0x43   : > { %7034 = vmatpush3.bf16.msra.mxu0 %v8581_v39  ;;  %v470_v39 = vrot.slane %v468_v30, 4  ;;  %v8768_v53 = vcombine.low %v783_v14, %v786_v57  ;;  %v485_v29 = vor.u32 %v484_v46, %v481_v45  ;;  %v790_v17 = vsel %vm8430_vm4, %v6688_v54, %v789_v7  ;;  %v8818_v45 = vld [vmem:[%s8403_s20 + $0x70] sm:$0xf]  ;;  %v8176_v46 = vld [vmem:[%s10971_s1 + $0x1d8] sm:$0xff]  }
  0x44   : > { %7035 = vmatprep.subr.bf16.mxu0 %v8589_v52  ;;  %v453_v52 = vsel %vm8436_vm5, %v448_v9, %v452_v1  ;;  %v494_v1 = vrot.slane %v492_v48, 4  ;;  %v8781_v9 = vld [vmem:[%s8403_s20 + $0x64] sm:$0xf]  ;;  %v505_v21 = vrot.slane %v503_v35, 4  ;;  %v793_v27 = vsel %vm8430_vm4, %v791_v49, %v792_v8  ;;  %7252 = vmatpush3.bf16.msra.mxu1 %v8173_v62 }
  0x45   : > { %v471_v44 = vor.u32 %v470_v39, %v8712_v16  ;;  %11022 = vst [vmem:[#allocation9_spill] sm:$0xff] %v8768_v53  ;;  %1958 = vmatmul.mubr.bf16.gmra.mrb[4].mxu1 %v8768_v53  ;;  %v467_v39 = vsel %vm8436_vm5, %v462_v55, %v8712_v16  ;;  %v516_v13 = vshrl.u32 %v8781_v9, 16  ;;  %v486_v11 = vrot.slane %v485_v29, 4  ;;  %7253 = vmatprep.subr.bf16.mxu1 %v8176_v46  ;;  %v8177_v29 = vld [vmem:[%s10971_s1 + $0x198] sm:$0xff]   ;;  %v294_v53 = vld [vmem:[%s8403_s20 + $0xa4] sm:$0x1] }
  0x46   : > { %1781 = vmatmul.mubr.bf16.gmra.mrb[12].mxu0 %v8690_v25  ;;  %v495_v10 = vor.u32 %v494_v1, %v8759_v58  ;;  %1965 = vmatprep.mubr.bf16.mxu1 %v8772_v60  ;;  %v8812_v37 = vcombine.low %v790_v17, %v793_v27  ;;  %v6689_v47 = vrot.slane %v8709_v12, 9  ;;  %v530_v1 = vshll.u32 %v8810_v34, 16 }
  0x47   : > { %1788 = vmatprep.mubr.bf16.mxu0 %v8696_v4  ;;  %7036 = vmatpush3.bf16.msra.mxu0 %v8597_v56  ;;  %v8755_v56 = vcombine.low %v443_v24, %v453_v52  ;;  %v472_v59 = vrot.slane %v471_v44, 4  ;;  %v512_v24 = vshll.u32 %v8781_v9, 16  ;;  %v8805_v52 = vld [vmem:[%s8403_s20 + $0x68] sm:$0x1]  ;;  %v518_v40 = vrot.slane %v516_v13, 4 }
  0x48   : > { %7037 = vmatprep.subr.bf16.mxu0 %v8620_v6  ;;  %v8763_v6 = vld [vmem:[%s8403_s20 + $0x5c] sm:$0x1]  ;;  %v496_v36 = vrot.slane %v495_v10, 4  ;;  %11023 = vst [vmem:[#allocation10_spill] sm:$0xff] %v8812_v37  ;;  %v796_v44 = vrot.slane %v8716_v20, 5  ;;  %v527_v20 = vshrl.u32 %v8810_v34, 16  ;;  %v491_v61 = vsel %vm8436_vm5, %v486_v11, %v8759_v58  ;;  %7254 = vmatpush3.bf16.msra.mxu1 %v8177_v29 }
  0x49   : > { %11021 = vst [vmem:[#allocation8_spill] sm:$0xff] %v8755_v56  ;;  %v498_v30 = vshll.u32 %v8763_v6, 16  ;;  %v477_v33 = vsel %vm8436_vm5, %v472_v59, %v476_v0  ;;  %v8814_v16 = vrot.slane %v512_v24, 5  ;;  %v799_v57 = vrot.slane %v8763_v6, 5  ;;  %v8839_v6 = vld [vmem:[%s8403_s20 + $0x78] sm:$0xf] }
  0x4a   : > { %v8829_v55 = vcombine.low %v467_v39, %v477_v33  ;;  %v798_v54 = vrot.slane %v796_v44, 4  ;;  %v522_v0 = vshll.u32 %v8805_v52, 16  ;;  %v536_v12 = vshll.u32 %v8818_v45, 16  ;;  %v8858_v10 = vld [vmem:[%s8403_s20 + $0x74] sm:$0x1] }
  0x4b   : > { %7038 = vmatpush3.bf16.msra.mxu0 %v8642_v18  ;;  %v506_v18 = vshll.u32 %v8766_v51, 16  ;;  %v500_v14 = vrot.slane %v498_v30, 5  ;;  %v519_v59 = vor.u32 %v518_v40, %v8814_v16  ;;  %v540_v58 = vshrl.u32 %v8818_v45, 16 }
  0x4c   : > { %7135 = vmatprep.subr.bf16.mxu0 %v8162_v22  ;;  %v8825_v22 = vcombine.low %v8766_v51, %v8781_v9  ;;  %11024 = vst [vmem:[#allocation11_spill] sm:$0xff] %v8829_v55  ;;  %v797_v30 = vsel %vm8430_vm4, %v6689_v47, %v796_v44  ;;  %v800_v35 = vsel %vm8430_vm4, %v798_v54, %v799_v57  ;;  %v529_v62 = vrot.slane %v527_v20, 4 }
  0x4d   : > { %v508_v28 = vrot.slane %v506_v18, 5  ;;  %1966 = vmatmul.mubr.bf16.gmra.mrb[8].mxu1 %v8812_v37  ;;  %v501_v7 = vsel %vm8436_vm5, %v496_v36, %v500_v14  ;;  %v532_v49 = vrot.slane %v530_v1, 5  ;;  %v8861_v18 = vld [vmem:[%s8403_s20 + $0x7c] sm:$0xf]  ;;  %v8864_v17 = vrot.slane %v536_v12, 5 }
  0x4e   : > { %1789 = vmatmul.mubr.bf16.gmra.mrb[16].mxu0 %v8745_v38  ;;  %1973 = vmatprep.mubr.bf16.mxu1 %v8825_v22  ;;  %v8866_v24 = vcombine.low %v491_v61, %v501_v7  ;;  %v524_v39 = vrot.slane %v522_v0, 5  ;;  %v803_v27 = vrot.slane %v8781_v9, 5  ;;  %v520_v13 = vrot.slane %v519_v59, 4  ;;  %v8885_v61 = vld [vmem:[%s8403_s20 + $0x80] sm:$0x1] }
  0x4f   : > { %1796 = vmatprep.mubr.bf16.mxu0 %v8755_v56  ;;  %v509_v48 = vor.u32 %v508_v28, %v505_v21  ;;  %v542_v21 = vrot.slane %v540_v58, 4  ;;  %v8869_v28 = vcombine.low %v797_v30, %v800_v35  ;;  %v551_v33 = vshrl.u32 %v8839_v6, 16  ;;  %v8898_v12 = vld [vmem:[%s8403_s20 + $0x84] sm:$0xf] }
  0x50   : > { %11025 = vst [vmem:[#allocation12_spill] sm:$0xff] %v8866_v24  ;;  %v554_v11 = vshll.u32 %v8839_v6, 16  ;;  %v8875_v36 = vcombine.low %v8810_v34, %v8818_v45  ;;  %v6690_v14 = vrot.slane %v8766_v51, 9  ;;  %v805_v40 = vrot.slane %v803_v27, 4  ;;  %v8180_v51 = vld [vmem:[%s10971_s1 + $0x1e0] sm:$0xff]  }
  0x51   : > { %v8844_v8 = vrot.slane %v509_v48, 4  ;;  %11026 = vst [vmem:[#allocation13_spill] sm:$0xff] %v8869_v28  ;;  %v806_v44 = vrot.slane %v8805_v52, 5  ;;  %v533_v46 = vor.u32 %v532_v49, %v529_v62  ;;  %v543_v9 = vor.u32 %v542_v21, %v8864_v17  ;;  %v8181_v7 = vld [vmem:[%s10971_s1 + $0x1a0] sm:$0xff]   ;;  %7255 = vmatprep.subr.bf16.mxu1 %v8180_v51  ;;  %v8952_v51 = vld [vmem:[%s8403_s20 + $0x8c] sm:$0x1] }
  0x52   : > { %11027 = vst [vmem:[#allocation14_spill] sm:$0xff] %v8875_v36  ;;  %v546_v47 = vshll.u32 %v8858_v10, 16  ;;  %v560_v57 = vshll.u32 %v8861_v18, 16  ;;  %v553_v48 = vrot.slane %v551_v33, 4  ;;  %v564_v54 = vshrl.u32 %v8861_v18, 16  ;;  %7256 = vmatpush3.bf16.msra.mxu1 %v8181_v7 }
  0x53   : > { %v556_v20 = vrot.slane %v554_v11, 5  ;;  %v804_v52 = vsel %vm8430_vm4, %v6690_v14, %v803_v27  ;;  %v807_v0 = vsel %vm8430_vm4, %v805_v40, %v806_v44  ;;  %v810_v1 = vrot.slane %v8818_v45, 5  ;;  %v8920_v11 = vld [vmem:[%s8403_s20 + $0x88] sm:$0xf]  ;;  %v8926_v14 = vld [vmem:[%s8403_s20 + $0x90] sm:$0xf] }
  0x54   : > { %v534_v59 = vrot.slane %v533_v46, 4  ;;  %v544_v58 = vrot.slane %v543_v9, 4  ;;  %v548_v29 = vrot.slane %v546_v47, 5  ;;  %v515_v30 = vsel %vm8436_vm5, %v8844_v8, %v8814_v16  ;;  %v8185_v47 = vld [vmem:[%s10971_s1 + $0x1a8] sm:$0xff]  }
  0x55   : > { %1974 = vmatmul.mubr.bf16.gmra.mrb[12].mxu1 %v8869_v28  ;;  %v525_v45 = vsel %vm8436_vm5, %v520_v13, %v524_v39  ;;  %v8910_v35 = vrot.slane %v560_v57, 5  ;;  %v566_v62 = vrot.slane %v564_v54, 4  ;;  %v8912_v49 = vcombine.low %v804_v52, %v807_v0 }
  0x56   : > { %1797 = vmatmul.mubr.bf16.gmra.mrb[20].mxu0 %v8652_v31  ;;  %1981 = vmatprep.mubr.bf16.mxu1 %v8875_v36  ;;  %v8916_v21 = vcombine.low %v8839_v6, %v8861_v18  ;;  %v6691_v27 = vrot.slane %v8810_v34, 9  ;;  %v557_v33 = vor.u32 %v556_v20, %v553_v48  ;;  %v812_v16 = vrot.slane %v810_v1, 4  ;;  %v8184_v34 = vld [vmem:[%s10971_s1 + $0x1e8] sm:$0xff]  }
  0x57   : > { %1804 = vmatprep.mubr.bf16.mxu0 %v8829_v55  ;;  %11028 = vst [vmem:[#allocation15_spill] sm:$0xff] %v8912_v49  ;;  %v813_v8 = vrot.slane %v8858_v10, 5  ;;  %v570_v39 = vshll.u32 %v8885_v61, 16  ;;  %v575_v13 = vshrl.u32 %v8898_v12, 16  ;;  %v8928_v40 = vcombine.low %v515_v30, %v525_v45  ;;  %v8937_v10 = vld [vmem:[%s8403_s20 + $0x94] sm:$0xf]  ;;  %7257 = vmatprep.subr.bf16.mxu1 %v8184_v34 }
  0x58   : > { %v578_v44 = vshll.u32 %v8898_v12, 16  ;;  %v567_v46 = vor.u32 %v566_v62, %v8910_v35  ;;  %v584_v9 = vshll.u32 %v8920_v11, 16  ;;  %v539_v57 = vsel %vm8436_vm5, %v534_v59, %v8864_v17  ;;  %7258 = vmatpush3.bf16.msra.mxu1 %v8185_v47  ;;  %v8188_v34 = vld [vmem:[%s10971_s1 + $0x1f0] sm:$0xff]  }
  0x59   : > { %11029 = vst [vmem:[#allocation16_spill] sm:$0xff] %v8928_v40  ;;  %v549_v48 = vsel %vm8436_vm5, %v544_v58, %v548_v29  ;;  %v8948_v54 = vrot.slane %v557_v33, 4  ;;  %v588_v20 = vshrl.u32 %v8920_v11, 16  ;;  %v811_v52 = vsel %vm8430_vm4, %v6691_v27, %v810_v1  ;;  %7259 = vmatprep.subr.bf16.mxu1 %v8188_v34 }
  0x5a   : > { %v814_v17 = vsel %vm8430_vm4, %v812_v16, %v813_v8  ;;  %v572_v0 = vrot.slane %v570_v39, 5  ;;  %v817_v7 = vrot.slane %v8861_v18, 5  ;;  %v577_v59 = vrot.slane %v575_v13, 4 }
  0x5b   : > { %v580_v58 = vrot.slane %v578_v44, 5  ;;  %v599_v29 = vshrl.u32 %v8926_v14, 16  ;;  %v602_v30 = vshll.u32 %v8926_v14, 16  ;;  %v568_v45 = vrot.slane %v567_v46, 4 }
  0x5c   : > { %v8964_v62 = vrot.slane %v584_v9, 5  ;;  %v608_v1 = vshll.u32 %v8937_v10, 16  ;;  %v612_v27 = vshrl.u32 %v8937_v10, 16  ;;  %v8968_v33 = vcombine.low %v811_v52, %v814_v17  ;;  %v8987_v17 = vld [vmem:[%s8403_s20 + $0x98] sm:$0x1] }
  0x5d   : > { %1982 = vmatmul.mubr.bf16.gmra.mrb[16].mxu1 %v8912_v49  ;;  %v590_v16 = vrot.slane %v588_v20, 4  ;;  %v6692_v18 = vrot.slane %v8839_v6, 9  ;;  %v8973_v8 = vcombine.low %v8898_v12, %v8920_v11  ;;  %v819_v39 = vrot.slane %v817_v7, 4 }
  0x5e   : > { %1805 = vmatmul.mubr.bf16.gmra.mrb[24].mxu0 %v8703_v32  ;;  %1989 = vmatprep.mubr.bf16.mxu1 %v8916_v21  ;;  %11030 = vst [vmem:[#allocation17_spill] sm:$0xff] %v8968_v33  ;;  %v820_v13 = vrot.slane %v8885_v61, 5  ;;  %v594_v44 = vshll.u32 %v8952_v51, 16  ;;  %v8980_v46 = vcombine.low %v539_v57, %v549_v48  ;;  %v581_v9 = vor.u32 %v580_v58, %v577_v59  ;;  %v8997_v58 = vld [vmem:[%s8403_s20 + $0x9c] sm:$0xf] }
  0x5f   : > { %1812 = vmatprep.mubr.bf16.mxu0 %v8866_v24  ;;  %v601_v47 = vrot.slane %v599_v29, 4  ;;  %v604_v20 = vrot.slane %v602_v30, 5  ;;  %v8982_v6 = vrot.slane %v608_v1, 5  ;;  %v614_v52 = vrot.slane %v612_v27, 4  ;;  %v8189_v29 = vld [vmem:[%s10971_s1 + $0x1b0] sm:$0xff]  }
  0x60   : > { %11031 = vst [vmem:[#allocation18_spill] sm:$0xff] %v8980_v46  ;;  %v591_v61 = vor.u32 %v590_v16, %v8964_v62  ;;  %v818_v57 = vsel %vm8430_vm4, %v6692_v18, %v817_v7  ;;  %v821_v48 = vsel %vm8430_vm4, %v819_v39, %v820_v13  ;;  %v824_v59 = vrot.slane %v8920_v11, 5  ;;  %v9008_v27 = vld [vmem:[%s8403_s20 + $0xa0] sm:$0xf]  ;;  %7260 = vmatpush3.bf16.msra.mxu1 %v8189_v29 }
  0x61   : > { %v563_v30 = vsel %vm8436_vm5, %v8948_v54, %v8910_v35  ;;  %v582_v1 = vrot.slane %v581_v9, 4  ;;  %v605_v7 = vor.u32 %v604_v20, %v601_v47  ;;  %v573_v11 = vsel %vm8436_vm5, %v568_v45, %v572_v0  ;;  %v9025_v47 = vld [vmem:[%s8403_s20 + $0xa8] sm:$0xf] }
  0x62   : > { %v596_v16 = vrot.slane %v594_v44, 5  ;;  %v615_v18 = vor.u32 %v614_v52, %v8982_v6  ;;  %v618_v39 = vshll.u32 %v8987_v17, 16  ;;  %v9014_v13 = vcombine.low %v818_v57, %v821_v48  ;;  %v9050_v57 = vld [vmem:[%s8403_s20 + $0xb8] sm:$0xf] }
  0x63   : > { %v592_v34 = vrot.slane %v591_v61, 4  ;;  %v9018_v35 = vcombine.low %v8926_v14, %v8937_v10  ;;  %v623_v54 = vshrl.u32 %v8997_v58, 16  ;;  %v6693_v9 = vrot.slane %v8898_v12, 9  ;;  %v9032_v61 = vld [vmem:[%s8403_s20 + $0xac] sm:$0xf] }
  0x64   : > { %11032 = vst [vmem:[#allocation19_spill] sm:$0xff] %v9014_v13  ;;  %v826_v0 = vrot.slane %v824_v59, 4  ;;  %v827_v45 = vrot.slane %v8952_v51, 5  ;;  %v626_v44 = vshll.u32 %v8997_v58, 16  ;;  %v9027_v20 = vcombine.low %v563_v30, %v573_v11 }
  0x65   : > { %1990 = vmatmul.mubr.bf16.gmra.mrb[20].mxu1 %v8968_v33  ;;  %v9029_v52 = vrot.slane %v605_v7, 4  ;;  %v9035_v48 = vrot.slane %v615_v18, 4  ;;  %v9037_v29 = vrot.slane %v618_v39, 5  ;;  %v632_v12 = vshll.u32 %v9008_v27, 16 }
  0x66   : > { %1813 = vmatmul.mubr.bf16.gmra.mrb[28].mxu0 %v8772_v60  ;;  %1997 = vmatprep.mubr.bf16.mxu1 %v8973_v8  ;;  %11033 = vst [vmem:[#allocation20_spill] sm:$0xff] %v9027_v20  ;;  %v831_v51 = vrot.slane %v8937_v10, 5  ;;  %v587_v30 = vsel %vm8436_vm5, %v582_v1, %v8964_v62  ;;  %v625_v7 = vrot.slane %v623_v54, 4  ;;  %v636_v11 = vshrl.u32 %v9008_v27, 16  ;;  %v8192_v62 = vld [vmem:[%s10971_s1 + $0x1f8] sm:$0xff]  }
  0x67   : > { %1820 = vmatprep.mubr.bf16.mxu0 %v8928_v40  ;;  %v597_v18 = vsel %vm8436_vm5, %v592_v34, %v596_v16  ;;  %v825_v10 = vsel %vm8430_vm4, %v6693_v9, %v824_v59  ;;  %v828_v39 = vsel %vm8430_vm4, %v826_v0, %v827_v45  ;;  %v6694_v1 = vrot.slane %v8926_v14, 9  ;;  %v8193_v59 = vld [vmem:[%s10971_s1 + $0x1b8] sm:$0xff]   ;;  %7261 = vmatprep.subr.bf16.mxu1 %v8192_v62 }
  0x68   : > { %v647_v54 = vshrl.u32 %v9025_v47, 16  ;;  %v650_v16 = vshll.u32 %v9025_v47, 16  ;;  %v833_v34 = vrot.slane %v831_v51, 4  ;;  %v834_v9 = vrot.slane %v8987_v17, 5  ;;  %7262 = vmatpush3.bf16.msra.mxu1 %v8193_v59 }
  0x69   : > { %v656_v0 = vshll.u32 %v9032_v61, 16  ;;  %v660_v45 = vshrl.u32 %v9032_v61, 16  ;;  %v9075_v14 = vcombine.low %v825_v10, %v828_v39  ;;  %v671_v33 = vshrl.u32 %v9042_v2, 16  ;;  %v9088_v39 = vld [vmem:[%s8403_s20 + $0xb0] sm:$0x1] }
  0x6a   : > { %v674_v49 = vshll.u32 %v9042_v2, 16  ;;  %v9079_v28 = vrot.slane %v632_v12, 5  ;;  %v638_v37 = vrot.slane %v636_v11, 4  ;;  %v9083_v17 = vcombine.low %v8997_v58, %v9008_v27 }
  0x6b   : > { %11035 = vst [vmem:[#allocation22_spill] sm:$0xff] %v9075_v14  ;;  %v680_v62 = vshll.u32 %v9050_v57, 16  ;;  %v652_v10 = vrot.slane %v650_v16, 5  ;;  %v684_v5 = vshrl.u32 %v9050_v57, 16  ;;  %v832_v12 = vsel %vm8430_vm4, %v6694_v1, %v831_v51 }
  0x6c   : > { %v9093_v59 = vrot.slane %v656_v0, 5  ;;  %v662_v11 = vrot.slane %v660_v45, 4  ;;  %v611_v51 = vsel %vm8436_vm5, %v9029_v52, %v8982_v6  ;;  %v666_v52 = vshll.u32 %v9088_v39, 16 }
  0x6d   : > { %1998 = vmatmul.mubr.bf16.gmra.mrb[24].mxu1 %v9014_v13  ;;  %v628_v13 = vrot.slane %v626_v44, 5  ;;  %v9073_v44 = vcombine.low %v587_v30, %v597_v18  ;;  %v649_v18 = vrot.slane %v647_v54, 4  ;;  %v9100_v54 = vld [vmem:[%s8403_s20 + $0xbc] sm:$0x1]  ;;  %v9108_v1 = vrot.slane %v680_v62, 5 }
  0x6e   : > { %1821 = vmatmul.mubr.bf16.gmra.mrb[32].mxu0 %v8825_v22  ;;  %2005 = vmatprep.mubr.bf16.mxu1 %v9018_v35  ;;  %v686_v16 = vrot.slane %v684_v5, 4  ;;  %v663_v6 = vor.u32 %v662_v11, %v9093_v59  ;;  %v6695_v5 = vrot.slane %v8997_v58, 9  ;;  %v841_v45 = vrot.slane %v294_v53, 5 }
  0x6f   : > { %1828 = vmatprep.mubr.bf16.mxu0 %v8980_v46  ;;  %11034 = vst [vmem:[#allocation21_spill] sm:$0xff] %v9073_v44  ;;  %v629_v30 = vor.u32 %v628_v13, %v625_v7  ;;  %v673_v13 = vrot.slane %v671_v33, 4  ;;  %v676_v7 = vrot.slane %v674_v49, 5  ;;  %v621_v49 = vsel %vm8436_vm5, %v9035_v48, %v9037_v29 }
  0x70   : > { %v653_v0 = vor.u32 %v652_v10, %v649_v18  ;;  %v845_v62 = vrot.slane %v9032_v61, 5  ;;  %v9124_v48 = vcombine.low %v9025_v47, %v9032_v61  ;;  %v664_v11 = vrot.slane %v663_v6, 4  ;;  %v8283_v6 = vld [vmem:[%s8403_s20 + $0xc] sm:$0xf] }
  0x71   : > { %v630_v33 = vrot.slane %v629_v30, 4  ;;  %v9128_v30 = vcombine.low %v611_v51, %v621_v49  ;;  %v668_v58 = vrot.slane %v666_v52, 5  ;;  %v6683_v52 = vrot.slane %v8283_v6, 9 }
  0x72   : > { %v847_v61 = vrot.slane %v845_v62, 4 }
  0x73   : > { %11036 = vst [vmem:[#allocation23_spill] sm:$0xff] %v9128_v30 }
  0x75   : > { %2006 = vmatmul.mubr.bf16.gmra.mrb[28].mxu1 %v9075_v14  ;;  %v677_v14 = vor.u32 %v676_v7, %v673_v13  ;;  %v6696_v13 = vrot.slane %v9025_v47, 9  ;;  %v848_v7 = vrot.slane %v9088_v39, 5  ;;  %v6697_v47 = vrot.slane %v9042_v2, 9 }
  0x76   : > { %1829 = vmatmul.mubr.bf16.gmra.mrb[36].mxu0 %v8875_v36  ;;  %v838_v36 = vrot.slane %v9008_v27, 5  ;;  %2013 = vmatprep.mubr.bf16.mxu1 %v9083_v17  ;;  %v639_v27 = vor.u32 %v638_v37, %v9079_v28  ;;  %v687_v37 = vor.u32 %v686_v16, %v9108_v1  ;;  %v635_v39 = vsel %vm8436_vm5, %v630_v33, %v9079_v28  ;;  %v9162_v28 = vld [vmem:[%s8403_s20 + $0xc4] sm:$0xf] }
  0x77   : > { %1836 = vmatprep.mubr.bf16.mxu0 %v9027_v20  ;;  %v835_v20 = vsel %vm8430_vm4, %v833_v34, %v834_v9  ;;  %v642_v34 = vshll.u32 %v294_v53, 16  ;;  %v852_v53 = vrot.slane %v9050_v57, 5  ;;  %v678_v16 = vrot.slane %v677_v14, 4 }
  0x78   : > { %v9116_v9 = vcombine.low %v832_v12, %v835_v20  ;;  %v840_v29 = vrot.slane %v838_v36, 4  ;;  %v690_v20 = vshll.u32 %v9100_v54, 16  ;;  %v640_v18 = vrot.slane %v639_v27, 4 }
  0x79   : > { %v644_v10 = vrot.slane %v642_v34, 5  ;;  %v654_v12 = vrot.slane %v653_v0, 4  ;;  %v839_v51 = vsel %vm8430_vm4, %v6695_v5, %v838_v36  ;;  %v688_v27 = vrot.slane %v687_v37, 4 }
  0x7a   : > { %v842_v49 = vsel %vm8430_vm4, %v840_v29, %v841_v45  ;;  %v692_v34 = vrot.slane %v690_v20, 5  ;;  %v855_v14 = vrot.slane %v9100_v54, 5  ;;  %v854_v0 = vrot.slane %v852_v53, 4  ;;  %v9159_v54 = vld [vmem:[%s8403_s20 + $0xc0] sm:$0xf] }
  0x7b   : > { %v645_v36 = vsel %vm8436_vm5, %v640_v18, %v644_v10  ;;  %v9149_v5 = vcombine.low %v839_v51, %v842_v49  ;;  %v9153_v45 = vcombine.low %v9042_v2, %v9050_v57  ;;  %v846_v33 = vsel %vm8430_vm4, %v6696_v13, %v845_v62  ;;  %v8284_v20 = vld [vmem:[%s8403_s20 + $0x14] sm:$0x1] }
  0x7c   : > { %v9155_v29 = vcombine.low %v635_v39, %v645_v36  ;;  %v849_v37 = vsel %vm8430_vm4, %v847_v61, %v848_v7  ;;  %v11038_v2 = vrot.slane %v8469_v42, 5  ;;  %v757_v18 = vrot.slane %v8284_v20, 5  ;;  %v8174_v42 = vld [vmem:[%s10971_s1 + $0x158] sm:$0xff]   ;;  %v8288_v20 = vld [vmem:[%s8403_s20 + $0x28] sm:$0xf] }
  0x7d   : > { %2014 = vmatmul.mubr.bf16.gmra.mrb[32].mxu1 %v9116_v9  ;;  %v659_v10 = vsel %vm8436_vm5, %v654_v12, %v9093_v59  ;;  %v669_v51 = vsel %vm8436_vm5, %v664_v11, %v668_v58  ;;  %v9179_v49 = vcombine.low %v846_v33, %v849_v37  ;;  %v9183_v62 = vcombine.low %v9159_v54, %v9162_v28  ;;  %v8171_v37 = vld [vmem:[%s10971_s1 + $0x110] sm:$0xff]  }
  0x7e   : > { %1837 = vmatmul.mubr.bf16.gmra.mrb[40].mxu0 %v8916_v21  ;;  %2021 = vmatprep.mubr.bf16.mxu1 %v9124_v48  ;;  %11037 = vst [vmem:[#allocation24_spill] sm:$0xff] %v9155_v29  ;;  %v756_v57 = vrot.slane %v11038_v2, 4  ;;  %v9185_v13 = vcombine.low %v659_v10, %v669_v51  ;;  %v853_v59 = vsel %vm8430_vm4, %v6697_v47, %v852_v53  ;;  %v8285_v53 = vld [vmem:[%s8403_s20 + $0x18] sm:$0xf]  ;;  %v11042_v36 = vmov %v11038_v2  ;;  %v8178_v10 = vld [vmem:[%s10971_s1 + $0x160] sm:$0xff]  }
  0x7f   : > { %1844 = vmatprep.mubr.bf16.mxu0 %v9073_v44  ;;  %v856_v12 = vsel %vm8430_vm4, %v854_v0, %v855_v14  ;;  %v683_v11 = vsel %vm8436_vm5, %v678_v16, %v9108_v1  ;;  %v693_v58 = vsel %vm8436_vm5, %v688_v27, %v692_v34  ;;  %v6684_v47 = vrot.slane %v8285_v53, 9  ;;  %v8286_v14 = vld [vmem:[%s8403_s20 + $0x1c] sm:$0xf]  ;;  %v8163_v1 = vld [vmem:[%s10971_s1 + $0x100] sm:$0xff]   ;;  %v8166_v16 = vld [vmem:[%s10971_s1 + $0x148] sm:$0xff]  }
  0x80   : > { %11039 = vst [vmem:[#allocation25_spill] sm:$0xff] %v9185_v13  ;;  %v9200_v61 = vcombine.low %v853_v59, %v856_v12  ;;  %v9202_v7 = vcombine.low %v683_v11, %v693_v58  ;;  %v761_v39 = vrot.slane %v8286_v14, 5  ;;  %v8167_v27 = vld [vmem:[%s10971_s1 + $0x108] sm:$0xff]   ;;  %v11041_v34 = vcombine.low %v8507_v63, %v8465_v41  ;;  %v8287_v41 = vld [vmem:[%s8403_s20 + $0x20] sm:$0x1] }
  0x81   : > { %v755_v0 = vsel %vm8430_vm4, %v6683_v52, %v11042_v36  ;;  %v758_v6 = vsel %vm8430_vm4, %v756_v57, %v757_v18  ;;  %v764_v63 = vrot.slane %v8287_v41, 5  ;;  %v768_v18 = vrot.slane %v8288_v20, 5  ;;  %v8289_v59 = vld [vmem:[%s8403_s20 + $0x24] sm:$0xf]  ;;  %v8290_v58 = vld [vmem:[%s8403_s20 + $0x2c] sm:$0x1] }
  0x82   : > { %11040 = vst [vmem:[#allocation26_spill] sm:$0xff] %v9202_v7  ;;  %v763_v33 = vrot.slane %v761_v39, 4  ;;  %v6733_v2 = vcombine.low %v755_v0, %v758_v6  ;;  %v762_v52 = vsel %vm8430_vm4, %v6684_v47, %v761_v39  ;;  %v6685_v12 = vrot.slane %v8289_v59, 9  ;;  %v8182_v47 = vld [vmem:[%s10971_s1 + $0x168] sm:$0xff]   ;;  %v8196_v36 = vld [vmem:[%s10971_s1 + $0x210] sm:$0xff]   ;;  %v8197_v0 = vld [vmem:[%s10971_s1 + $0x218] sm:$0xff]  }
  0x83   : > { %v770_v11 = vrot.slane %v768_v18, 4  ;;  %v771_v53 = vrot.slane %v8290_v58, 5  ;;  %v8183_v14 = vld [vmem:[%s10971_s1 + $0x128] sm:$0xff]   ;;  %v11045_v41 = vld [vmem:[#allocation7_spill] sm:$0xff] }
  0x84   : > { %v765_v57 = vsel %vm8430_vm4, %v763_v33, %v764_v63  ;;  %v769_v39 = vsel %vm8430_vm4, %v6685_v12, %v768_v18  ;;  %v8199_v6 = vld [vmem:[%s10971_s1 + $0x228] sm:$0xff]   ;;  %v11043_v33 = vld [vmem:[#allocation14_spill] sm:$0xff]  ;;  %v8200_v63 = vld [vmem:[%s10971_s1 + $0x230] sm:$0xff]  }
  0x85   : > { %2022 = vmatmul.mubr.bf16.gmra.mrb[36].mxu1 %v9149_v5  ;;  %v9259_v51 = vcombine.low %v762_v52, %v765_v57  ;;  %v871_v52 = vshrl.u32 %v9162_v28, 16  ;;  %v11048_v57 = vld [vmem:[#allocation13_spill] sm:$0xff]  ;;  %v9350_v59 = vld [vmem:[%s8403_s20 + $0xc8] sm:$0x1] }
  0x86   : > { %1845 = vmatmul.mubr.bf16.gmra.mrb[44].mxu0 %v8973_v8  ;;  %2029 = vmatprep.mubr.bf16.mxu1 %v9153_v45  ;;  %v9356_v12 = vld [vmem:[%s8403_s20 + $0xd0] sm:$0xf] }
  0x87   : > { %1852 = vmatprep.mubr.bf16.mxu0 %v9128_v30 }
  0x8d   : > { %2030 = vmatmul.mubr.bf16.gmra.mrb[40].mxu1 %v9179_v49 }
  0x8e   : > { %1853 = vmatmul.mubr.bf16.gmra.mrb[48].mxu0 %v9018_v35  ;;  %2037 = vmatprep.mubr.bf16.mxu1 %v9183_v62 }
  0x8f   : > { %1860 = vmatprep.mubr.bf16.mxu0 %v9155_v29 }
  0x95   : > { %2038 = vmatmul.mubr.bf16.gmra.mrb[44].mxu1 %v9200_v61 }
  0x96   : > { %1861 = vmatmul.mubr.bf16.gmra.mrb[52].mxu0 %v9083_v17  ;;  %2239 = vmatprep.mubr.bf16.mxu1 %v8583_v50 }
  0x97   : > { %1868 = vmatprep.mubr.bf16.mxu0 %v9185_v13 }
  0x9d   : > { %2240 = vmatmul.mubr.bf16.vlgmr.msra.gmra.mrb[48].mxu1 %v8614_v3 }
  0x9e   : > { %1869 = vmatmul.mubr.bf16.gmra.mrb[56].mxu0 %v9124_v48  ;;  %2247 = vmatprep.mubr.bf16.mxu1 %v8637_v15 }
  0x9f   : > { %1876 = vmatprep.mubr.bf16.mxu0 %v9202_v7 }
  0xa5   : > { %2248 = vmatmul.mubr.bf16.gmra.mrb[52].mxu1 %v8690_v25 }
  0xa6   : > { %1877 = vmatmul.mubr.bf16.gmra.mrb[60].mxu0 %v9153_v45  ;;  %2255 = vmatprep.mubr.bf16.mxu1 %v8696_v4 }
  0xa7   : > { %1917 = vmatprep.mubr.bf16.mxu0 %v8571_v43  ;;  %v8170_v43 = vld [vmem:[%s10971_s1 + $0x150] sm:$0xff]  }
  0xad   : > { %2256 = vmatmul.mubr.bf16.gmra.mrb[56].mxu1 %v8745_v38 }
  0xae   : > { %1918 = vmatmul.mubr.bf16.vlgmr.msra.gmra.mrb[64].mxu0 %v11041_v34  ;;  %2263 = vmatprep.mubr.bf16.mxu1 %v8755_v56  ;;  %v8191_v34 = vld [vmem:[%s10971_s1 + $0x138] sm:$0xff]  }
  0xaf   : > { %7136 = vmatpush3.bf16.msra.mxu0 %v8163_v1  ;;  %1925 = vmatprep.mubr.bf16.mxu0 %v8614_v3  ;;  %v8175_v3 = vld [vmem:[%s10971_s1 + $0x118] sm:$0xff]   ;;  %v772_v1 = vsel %vm8430_vm4, %v770_v11, %v771_v53  ;;  %v877_v53 = vshll.u32 %v9350_v59, 16 }
  0xb0   : > { %7137 = vmatprep.subr.bf16.mxu0 %v8166_v16  ;;  %v9283_v16 = vcombine.low %v769_v39, %v772_v1  ;;  %v901_v1 = vshll.u32 %v9356_v12, 16 }
  0xb3   : > { %7138 = vmatpush3.bf16.msra.mxu0 %v8167_v27  ;;  %v8187_v27 = vld [vmem:[%s10971_s1 + $0x130] sm:$0xff]  }
  0xb4   : > { %7139 = vmatprep.subr.bf16.mxu0 %v8170_v43  ;;  %v8194_v43 = vld [vmem:[%s10971_s1 + $0x200] sm:$0xff]  }
  0xb5   : > { %2264 = vmatmul.mubr.bf16.gmra.mrb[60].mxu1 %v8652_v31  ;;  %v8186_v31 = vld [vmem:[%s10971_s1 + $0x170] sm:$0xff]  }
  0xb6   : > { %1926 = vmatmul.mubr.bf16.gmra.mrb[68].mxu0 %v6733_v2  ;;  %2271 = vmatprep.mubr.bf16.mxu1 %v8829_v55 }
  0xb7   : > { %7140 = vmatpush3.bf16.msra.mxu0 %v8171_v37  ;;  %1933 = vmatprep.mubr.bf16.mxu0 %v8690_v25  ;;  %v8179_v25 = vld [vmem:[%s10971_s1 + $0x120] sm:$0xff]   ;;  %v8201_v37 = vld [vmem:[%s10971_s1 + $0x238] sm:$0xff]  }
  0xb8   : > { %7141 = vmatprep.subr.bf16.mxu0 %v8174_v42  ;;  %v11047_v42 = vld [vmem:[#allocation10_spill] sm:$0xff] }
  0xbb   : > { %7142 = vmatpush3.bf16.msra.mxu0 %v8175_v3  ;;  %v861_v3 = vshll.u32 %v9159_v54, 16 }
  0xbc   : > { %7143 = vmatprep.subr.bf16.mxu0 %v8178_v10 }
  0xbd   : > { %2272 = vmatmul.mubr.bf16.gmra.mrb[64].mxu1 %v8703_v32  ;;  %v8195_v32 = vld [vmem:[%s10971_s1 + $0x208] sm:$0xff]   ;;  %v863_v18 = vrot.slane %v861_v3, 5 }
  0xbe   : > { %1934 = vmatmul.mubr.bf16.gmra.mrb[72].mxu0 %v9259_v51  ;;  %2279 = vmatprep.mubr.bf16.mxu1 %v8866_v24 }
  0xbf   : > { %7144 = vmatpush3.bf16.msra.mxu0 %v8179_v25  ;;  %1941 = vmatprep.mubr.bf16.mxu0 %v8745_v38  ;;  %v8190_v38 = vld [vmem:[%s10971_s1 + $0x178] sm:$0xff]   ;;  %v873_v25 = vrot.slane %v871_v52, 4  ;;  %v11050_v52 = vld [vmem:[#allocation17_spill] sm:$0xff] }
  0xc0   : > { %7145 = vmatprep.subr.bf16.mxu0 %v8182_v47 }
  0xc3   : > { %7146 = vmatpush3.bf16.msra.mxu0 %v8183_v14  ;;  %v11049_v14 = vld [vmem:[#allocation15_spill] sm:$0xff] }
  0xc4   : > { %7147 = vmatprep.subr.bf16.mxu0 %v8186_v31  ;;  %v905_v31 = vshrl.u32 %v9356_v12, 16 }
  0xc5   : > { %2280 = vmatmul.mubr.bf16.gmra.mrb[68].mxu1 %v8772_v60  ;;  %v8198_v60 = vld [vmem:[%s10971_s1 + $0x220] sm:$0xff]  }
  0xc6   : > { %1942 = vmatmul.mubr.bf16.gmra.mrb[76].mxu0 %v9283_v16  ;;  %2287 = vmatprep.mubr.bf16.mxu1 %v8928_v40 }
  0xc7   : > { %7148 = vmatpush3.bf16.msra.mxu0 %v8187_v27  ;;  %2078 = vmatprep.mubr.bf16.mxu0 %v6733_v2  ;;  %v11046_v2 = vld [vmem:[#allocation9_spill] sm:$0xff] }
  0xc8   : > { %7149 = vmatprep.subr.bf16.mxu0 %v8190_v38 }
  0xcb   : > { %7150 = vmatpush3.bf16.msra.mxu0 %v8191_v34 }
  0xcc   : > { %7879 = vmatprep.subr.bf16.mxu0 %v8194_v43 }
  0xcd   : > { %2288 = vmatmul.mubr.bf16.gmra.mrb[72].mxu1 %v8825_v22  ;;  %v11044_v22 = vld [vmem:[#allocation20_spill] sm:$0xff] }
  0xce   : > { %2079 = vmatmul.mubr.bf16.vlgmr.msra.gmra.mrb[80].mxu0 %v8536_v19  ;;  %2295 = vmatprep.mubr.bf16.mxu1 %v8980_v46 }
  0xcf   : > { %7880 = vmatpush3.bf16.msra.mxu0 %v8194_v43  ;;  %2086 = vmatprep.mubr.bf16.mxu0 %v9259_v51  ;;  %v879_v43 = vrot.slane %v877_v53, 5 }
  0xd0   : > { %7881 = vmatprep.subr.bf16.mxu0 %v8195_v32 }
  0xd3   : > { %7882 = vmatpush3.bf16.msra.mxu0 %v8195_v32 }
  0xd4   : > { %7883 = vmatprep.subr.bf16.mxu0 %v8196_v36 }
  0xd5   : > { %2296 = vmatmul.mubr.bf16.gmra.mrb[76].mxu1 %v11043_v33  ;;  %v907_v33 = vrot.slane %v905_v31, 4 }
  0xd6   : > { %2087 = vmatmul.mubr.bf16.gmra.mrb[84].mxu0 %v8583_v50  ;;  %2303 = vmatprep.mubr.bf16.mxu1 %v11044_v22 }
  0xd7   : > { %2094 = vmatprep.mubr.bf16.mxu0 %v9283_v16  ;;  %7884 = vmatpush3.bf16.msra.mxu0 %v8196_v36 }
  0xd8   : > { %7885 = vmatprep.subr.bf16.mxu0 %v8197_v0 }
  0xdb   : > { %7886 = vmatpush3.bf16.msra.mxu0 %v8197_v0 }
  0xdc   : > { %7887 = vmatprep.subr.bf16.mxu0 %v8198_v60 }
  0xdd   : > { %2304 = vmatmul.mubr.bf16.gmra.mrb[80].mxu1 %v8916_v21  ;;  %v858_v21 = vshrl.u32 %v9159_v54, 16 }
  0xde   : > { %2095 = vmatmul.mubr.bf16.gmra.mrb[88].mxu0 %v8637_v15  ;;  %2311 = vmatprep.mubr.bf16.mxu1 %v9073_v44 }
  0xdf   : > { %2102 = vmatprep.mubr.bf16.mxu0 %v11045_v41  ;;  %7888 = vmatpush3.bf16.msra.mxu0 %v8198_v60  ;;  %v860_v20 = vrot.slane %v858_v21, 4 }
  0xe0   : > { %7889 = vmatprep.subr.bf16.mxu0 %v8199_v6 }
  0xe1   : > { %v864_v11 = vor.u32 %v863_v18, %v860_v20 }
  0xe3   : > { %7890 = vmatpush3.bf16.msra.mxu0 %v8199_v6  ;;  %v865_v38 = vrot.slane %v864_v11, 4  ;;  %v903_v6 = vrot.slane %v901_v1, 5 }
  0xe4   : > { %7891 = vmatprep.subr.bf16.mxu0 %v8200_v63 }
  0xe5   : > { %2312 = vmatmul.mubr.bf16.gmra.mrb[84].mxu1 %v8973_v8  ;;  %v867_v8 = vshll.u32 %v9162_v28, 16  ;;  %v908_v18 = vor.u32 %v907_v33, %v903_v6 }
  0xe6   : > { %2103 = vmatmul.mubr.bf16.gmra.mrb[92].mxu0 %v8696_v4  ;;  %2319 = vmatprep.mubr.bf16.mxu1 %v9128_v30  ;;  %v8221_v4 = vld [vmem:[%s10973_s3 + $0x78] sm:$0xff]  }
  0xe7   : > { %2110 = vmatprep.mubr.bf16.mxu0 %v11046_v2  ;;  %7892 = vmatpush3.bf16.msra.mxu0 %v8200_v63  ;;  %v869_v10 = vrot.slane %v867_v8, 5  ;;  %v909_v1 = vrot.slane %v908_v18, 4 }
  0xe8   : > { %7893 = vmatprep.subr.bf16.mxu0 %v8201_v37 }
  0xe9   : > { %v874_v58 = vor.u32 %v873_v25, %v869_v10  ;;  %v870_v3 = vsel %vm8436_vm5, %v865_v38, %v869_v10 }
  0xeb   : > { %7894 = vmatpush3.bf16.msra.mxu0 %v8201_v37  ;;  %v875_v34 = vrot.slane %v874_v58, 4  ;;  %v9370_v37 = vld [vmem:[%s8403_s20 + $0xd4] sm:$0x1] }
  0xec   : > { %v911_v25 = vshll.u32 %v9370_v37, 16 }
  0xed   : > { %2320 = vmatmul.mubr.bf16.gmra.mrb[88].mxu1 %v9018_v35  ;;  %v9353_v35 = vld [vmem:[%s8403_s20 + $0xcc] sm:$0xf]  ;;  %v880_v8 = vsel %vm8436_vm5, %v875_v34, %v879_v43 }
  0xee   : > { %2111 = vmatmul.mubr.bf16.gmra.mrb[96].mxu0 %v8755_v56  ;;  %2327 = vmatprep.mubr.bf16.mxu1 %v9155_v29  ;;  %v892_v47 = vshrl.u32 %v9353_v35, 16  ;;  %v895_v39 = vshll.u32 %v9353_v35, 16  ;;  %v9383_v53 = vcombine.low %v870_v3, %v880_v8  ;;  %v913_v31 = vrot.slane %v911_v25, 5  ;;  %v11053_v3 = vld [vmem:[#allocation22_spill] sm:$0xff] }
  0xef   : > { %2118 = vmatprep.mubr.bf16.mxu0 %v11047_v42 }
  0xf0   : > { %v894_v32 = vrot.slane %v892_v47, 4  ;;  %v897_v60 = vrot.slane %v895_v39, 5  ;;  %11051 = vst [vmem:[#allocation14_spill] sm:$0xff] %v9383_v53  ;;  %v914_v34 = vsel %vm8436_vm5, %v909_v1, %v913_v31 }
  0xf2   : > { %v898_v20 = vor.u32 %v897_v60, %v894_v32 }
  0xf4   : > { %v899_v39 = vrot.slane %v898_v20, 4  ;;  %v6751_v20 = vcombine.low %v9353_v35, %v9356_v12 }
  0xf5   : > { %2328 = vmatmul.mubr.bf16.gmra.mrb[92].mxu1 %v9083_v17 }
  0xf6   : > { %2119 = vmatmul.mubr.bf16.gmra.mrb[100].mxu0 %v8829_v55  ;;  %2335 = vmatprep.mubr.bf16.mxu1 %v9185_v13  ;;  %v904_v38 = vsel %vm8436_vm5, %v899_v39, %v903_v6 }
  0xf7   : > { %2126 = vmatprep.mubr.bf16.mxu0 %v11048_v57 }
  0xfd   : > { %2336 = vmatmul.mubr.bf16.gmra.mrb[96].mxu1 %v9124_v48 }
  0xfe   : > { %2127 = vmatmul.mubr.bf16.gmra.mrb[104].mxu0 %v8866_v24  ;;  %2343 = vmatprep.mubr.bf16.mxu1 %v9202_v7 }
  0xff   : > { %2134 = vmatprep.mubr.bf16.mxu0 %v11049_v14 }
 0x101   : > { %v6927_v17 = vpop.f32.mrb[0].mxu0 }
 0x102   : > { %v6928_v27 = vpop.f32.mrb[1].mxu0 }
 0x103   : > { %v9367_v36 = vadd.f32 %v6928_v27, %v6927_v17  ;;  %v6930_v0 = vpop.f32.mrb[2].mxu0  ;;  %v11052_v27 = vld [vmem:[#allocation19_spill] sm:$0xff] }
 0x104   : > { %v6931_v63 = vpop.f32.mrb[3].mxu0 }
 0x105   : > { %v9372_v21 = vadd.f32 %v6931_v63, %v6930_v0  ;;  %2344 = vmatmul.mubr.bf16.gmra.mrb[100].mxu1 %v9153_v45  ;;  %v6752_v0 = vcombine.low %v904_v38, %v914_v34 }
 0x106   : > { %2135 = vmatmul.mubr.bf16.gmra.mrb[108].mxu0 %v8928_v40  ;;  %2351 = vmatprep.mubr.bf16.mxu1 %v9383_v53 }
 0x107   : > { %2142 = vmatprep.mubr.bf16.mxu0 %v11050_v52 }
 0x109   : > { %v6933_v11 = vpop.f32.mrb[4].mxu0 }
 0x10a   : > { %v6934_v58 = vpop.f32.mrb[5].mxu0 }
 0x10b   : > { %v9385_v48 = vadd.f32 %v6934_v58, %v6933_v11  ;;  %v6936_v47 = vpop.f32.mrb[6].mxu0 }
 0x10c   : > { %v6937_v10 = vpop.f32.mrb[7].mxu0 }
 0x10d   : > { %v9387_v17 = vadd.f32 %v6937_v10, %v6936_v47  ;;  %2352 = vmatmul.mubr.bf16.gmra.mrb[104].mxu1 %v9183_v62 }
 0x10e   : > { %2143 = vmatmul.mubr.bf16.gmra.mrb[112].mxu0 %v8980_v46  ;;  %2359 = vmatprep.mubr.bf16.mxu1 %v6752_v0  ;;  %v7063_v6 = vpop.f32.mrb[0].mxu1 }
 0x10f   : > { %2150 = vmatprep.mubr.bf16.mxu0 %v11052_v27  ;;  %v7064_v26 = vpop.f32.mrb[1].mxu1 }
 0x110   : > { %v7065_v25 = vadd.f32 %v7064_v26, %v7063_v6  ;;  %v7066_v11 = vpop.f32.mrb[2].mxu1 }
 0x111   : > { %v6939_v43 = vpop.f32.mrb[8].mxu0  ;;  %v7067_v39 = vpop.f32.mrb[3].mxu1 }
 0x112   : > { %v6940_v32 = vpop.f32.mrb[9].mxu0  ;;  %v7068_v62 = vadd.f32 %v7067_v39, %v7066_v11 }
 0x113   : > { %v9397_v60 = vadd.f32 %v6940_v32, %v6939_v43  ;;  %v6942_v33 = vpop.f32.mrb[10].mxu0 }
 0x114   : > { %v6943_v63 = vpop.f32.mrb[11].mxu0 }
 0x115   : > { %v9399_v45 = vadd.f32 %v6943_v63, %v6942_v33  ;;  %2360 = vmatmul.mubr.bf16.gmra.mrb[108].mxu1 %v6751_v20 }
 0x116   : > { %2151 = vmatmul.mubr.bf16.gmra.mrb[116].mxu0 %v11044_v22 }
 0x117   : > { %2158 = vmatprep.mubr.bf16.mxu0 %v11053_v3 }
 0x118   : > { %v7069_v10 = vpop.f32.mrb[4].mxu1 }
 0x119   : > { %v6945_v8 = vpop.f32.mrb[12].mxu0  ;;  %v7070_v34 = vpop.f32.mrb[5].mxu1 }
 0x11a   : > { %v6946_v18 = vpop.f32.mrb[13].mxu0  ;;  %v7071_v32 = vadd.f32 %v7070_v34, %v7069_v10  ;;  %v7072_v0 = vpop.f32.mrb[6].mxu1 }
 0x11b   : > { %v9406_v58 = vadd.f32 %v6946_v18, %v6945_v8  ;;  %v6948_v47 = vpop.f32.mrb[14].mxu0  ;;  %v7073_v6 = vpop.f32.mrb[7].mxu1  ;;  %v9415_v8 = vld [vmem:[%s10972_s2] ss:$0 sm:$0xff] }
 0x11c   : > { %v6949_v1 = vpop.f32.mrb[15].mxu0  ;;  %v7074_v20 = vadd.f32 %v7073_v6, %v7072_v0 }
 0x11d   : > { %v9408_v31 = vadd.f32 %v6949_v1, %v6948_v47 }
 0x11e   : > { %2159 = vmatmul.mubr.bf16.gmra.mrb[120].mxu0 %v9073_v44 }
 0x11f   : > { %2166 = vmatprep.mubr.bf16.mxu0 %v9116_v9 }
 0x120   : > { %v7075_v1 = vpop.f32.mrb[8].mxu1 }
 0x121   : > { %v6951_v38 = vpop.f32.mrb[16].mxu0 }
 0x122   : > { %v6952_v43 = vpop.f32.mrb[17].mxu0 }
 0x123   : > { %v6953_v33 = vadd.f32 %v6952_v43, %v6951_v38  ;;  %v6954_v63 = vpop.f32.mrb[18].mxu0  ;;  %v7076_v38 = vpop.f32.mrb[9].mxu1 }
 0x124   : > { %v6955_v26 = vpop.f32.mrb[19].mxu0  ;;  %v7077_v44 = vadd.f32 %v7076_v38, %v7075_v1  ;;  %v7078_v22 = vpop.f32.mrb[10].mxu1 }
 0x125   : > { %v1791_v18 = vadd.f32 %v6953_v33, %v9415_v8  ;;  %v6956_v11 = vadd.f32 %v6955_v26, %v6954_v63  ;;  %v7079_v33 = vpop.f32.mrb[11].mxu1 }
 0x126   : > { %2167 = vmatmul.mubr.bf16.gmra.mrb[124].mxu0 %v9128_v30  ;;  %v7080_v26 = vadd.f32 %v7079_v33, %v7078_v22 }
 0x127   : > { %v1794_v47 = vadd.f32 %v6956_v11, %v9415_v8  ;;  %2174 = vmatprep.mubr.bf16.mxu0 %v9149_v5  ;;  %v9421_v39 = vadd.f32 %v7065_v25, %v1791_v18 }
 0x129   : > { %v6957_v10 = vpop.f32.mrb[20].mxu0  ;;  %v9423_v34 = vadd.f32 %v7068_v62, %v1794_v47  ;;  %v7081_v62 = vpop.f32.mrb[12].mxu1  ;;  %v886_v47 = vrot.slane %v9162_v28, 5 }
 0x12a   : > { %v6958_v43 = vpop.f32.mrb[21].mxu0 }
 0x12b   : > { %v6959_v0 = vadd.f32 %v6958_v43, %v6957_v10  ;;  %v6960_v6 = vpop.f32.mrb[22].mxu0  ;;  %v7082_v10 = vpop.f32.mrb[13].mxu1  ;;  %v888_v40 = vrot.slane %v886_v47, 4 }
 0x12c   : > { %v6961_v63 = vpop.f32.mrb[23].mxu0  ;;  %v7083_v22 = vadd.f32 %v7082_v10, %v7081_v62  ;;  %v7084_v33 = vpop.f32.mrb[14].mxu1 }
 0x12d   : > { %v1799_v30 = vadd.f32 %v6959_v0, %v9415_v8  ;;  %v6962_v11 = vadd.f32 %v6961_v63, %v6960_v6  ;;  %v7085_v63 = vpop.f32.mrb[15].mxu1 }
 0x12e   : > { %2175 = vmatmul.mubr.bf16.gmra.mrb[128].mxu0 %v9155_v29  ;;  %v7086_v46 = vadd.f32 %v7085_v63, %v7084_v33 }
 0x12f   : > { %v1802_v25 = vadd.f32 %v6962_v11, %v9415_v8  ;;  %2182 = vmatprep.mubr.bf16.mxu0 %v9179_v49  ;;  %v9429_v18 = vadd.f32 %v7071_v32, %v1799_v30  ;;  %v6698_v11 = vrot.slane %v9159_v54, 9  ;;  %v889_v30 = vrot.slane %v9350_v59, 5  ;;  %v8204_v54 = vld [vmem:[%s10973_s3] sm:$0xff]  }
 0x130   : > { %v7087_v59 = vpop.f32.mrb[16].mxu1 }
 0x131   : > { %v6963_v1 = vpop.f32.mrb[24].mxu0  ;;  %v9432_v38 = vadd.f32 %v7074_v20, %v1802_v25  ;;  %v8203_v25 = vld [vmem:[%s10973_s3 + $0x40] sm:$0xff]  }
 0x132   : > { %v6964_v43 = vpop.f32.mrb[25].mxu0  ;;  %7383 = vmatprep.subr.bf16.mxu1 %v8203_v25 }
 0x133   : > { %v6965_v0 = vadd.f32 %v6964_v43, %v6963_v1  ;;  %v6966_v6 = vpop.f32.mrb[26].mxu0  ;;  %v890_v1 = vsel %vm8430_vm4, %v888_v40, %v889_v30  ;;  %v7088_v43 = vpop.f32.mrb[17].mxu1  ;;  %7384 = vmatpush3.bf16.msra.mxu1 %v8204_v54 }
 0x134   : > { %v6967_v29 = vpop.f32.mrb[27].mxu0  ;;  %v7090_v63 = vpop.f32.mrb[18].mxu1 }
 0x135   : > { %v1807_v32 = vadd.f32 %v6965_v0, %v9415_v8  ;;  %v6968_v28 = vadd.f32 %v6967_v29, %v6966_v6  ;;  %v887_v29 = vsel %vm8430_vm4, %v6698_v11, %v886_v47  ;;  %v7089_v6 = vadd.f32 %v7088_v43, %v7087_v59 }
 0x136   : > { %2183 = vmatmul.mubr.bf16.gmra.mrb[132].mxu0 %v9185_v13 }
 0x137   : > { %v1810_v20 = vadd.f32 %v6968_v28, %v9415_v8  ;;  %2190 = vmatprep.mubr.bf16.mxu0 %v9200_v61  ;;  %v9446_v62 = vadd.f32 %v7077_v44, %v1807_v32  ;;  %v9454_v44 = vcombine.low %v887_v29, %v890_v1  ;;  %v7091_v32 = vpop.f32.mrb[19].mxu1 }
 0x138   : > { %v7092_v55 = vadd.f32 %v7091_v32, %v7090_v63  ;;  %v7093_v30 = vpop.f32.mrb[20].mxu1 }
 0x139   : > { %v6969_v10 = vpop.f32.mrb[28].mxu0  ;;  %v9452_v33 = vadd.f32 %v7080_v26, %v1810_v20  ;;  %v7094_v25 = vpop.f32.mrb[21].mxu1 }
 0x13a   : > { %v6970_v0 = vpop.f32.mrb[29].mxu0  ;;  %v7095_v29 = vadd.f32 %v7094_v25, %v7093_v30  ;;  %v7096_v1 = vpop.f32.mrb[22].mxu1 }
 0x13b   : > { %v6971_v28 = vadd.f32 %v6970_v0, %v6969_v10  ;;  %v6972_v13 = vpop.f32.mrb[30].mxu0  ;;  %v7097_v0 = vpop.f32.mrb[23].mxu1 }
 0x13c   : > { %v6973_v24 = vpop.f32.mrb[31].mxu0 }
 0x13d   : > { %v1815_v47 = vadd.f32 %v6971_v28, %v9415_v8  ;;  %v6974_v11 = vadd.f32 %v6973_v24, %v6972_v13  ;;  %v7098_v13 = vadd.f32 %v7097_v0, %v7096_v1 }
 0x13e   : > { %2191 = vmatmul.mubr.bf16.gmra.mrb[136].mxu0 %v9202_v7 }
 0x13f   : > { %v1818_v40 = vadd.f32 %v6974_v11, %v9415_v8  ;;  %2198 = vmatprep.mubr.bf16.mxu0 %v9454_v44  ;;  %v9460_v26 = vadd.f32 %v7083_v22, %v1815_v47  ;;  %v8206_v47 = vld [vmem:[%s10973_s3 + $0x8] sm:$0xff]  }
 0x140   : > { %v7099_v11 = vpop.f32.mrb[24].mxu1 }
 0x141   : > { %v6975_v20 = vpop.f32.mrb[32].mxu0  ;;  %v9462_v54 = vadd.f32 %v7086_v46, %v1818_v40  ;;  %v8205_v46 = vld [vmem:[%s10973_s3 + $0x48] sm:$0xff]  }
 0x142   : > { %v6976_v59 = vpop.f32.mrb[33].mxu0  ;;  %7385 = vmatprep.subr.bf16.mxu1 %v8205_v46 }
 0x143   : > { %v6977_v10 = vadd.f32 %v6976_v59, %v6975_v20  ;;  %v6978_v43 = vpop.f32.mrb[34].mxu0  ;;  %v7100_v20 = vpop.f32.mrb[25].mxu1  ;;  %7386 = vmatpush3.bf16.msra.mxu1 %v8206_v47 }
 0x144   : > { %v6979_v24 = vpop.f32.mrb[35].mxu0  ;;  %v7101_v25 = vadd.f32 %v7100_v20, %v7099_v11  ;;  %v7102_v59 = vpop.f32.mrb[26].mxu1 }
 0x145   : > { %v6980_v63 = vadd.f32 %v6979_v24, %v6978_v43  ;;  %v1823_v28 = vadd.f32 %v6977_v10, %v9415_v8  ;;  %v7103_v10 = vpop.f32.mrb[27].mxu1 }
 0x146   : > { %2199 = vmatmul.mubr.bf16.gmra.mrb[140].mxu0 %v9383_v53  ;;  %v7104_v0 = vadd.f32 %v7103_v10, %v7102_v59 }
 0x147   : > { %v9466_v22 = vadd.f32 %v7089_v6, %v1823_v28  ;;  %v1826_v32 = vadd.f32 %v6980_v63, %v9415_v8  ;;  %7895 = vmatprep.mubr.bf16.mxu0 %v9259_v51 }
 0x149   : > { %v9476_v40 = vadd.f32 %v7092_v55, %v1826_v32  ;;  %v6981_v30 = vpop.f32.mrb[36].mxu0  ;;  %v7105_v32 = vpop.f32.mrb[28].mxu1 }
 0x14a   : > { %v6982_v6 = vpop.f32.mrb[37].mxu0  ;;  %v7106_v11 = vpop.f32.mrb[29].mxu1 }
 0x14b   : > { %v6983_v1 = vadd.f32 %v6982_v6, %v6981_v30  ;;  %v6984_v51 = vpop.f32.mrb[38].mxu0  ;;  %v7107_v20 = vadd.f32 %v7106_v11, %v7105_v32  ;;  %v7108_v6 = vpop.f32.mrb[30].mxu1 }
 0x14c   : > { %v6985_v43 = vpop.f32.mrb[39].mxu0  ;;  %v7109_v10 = vpop.f32.mrb[31].mxu1 }
 0x14d   : > { %v6986_v24 = vadd.f32 %v6985_v43, %v6984_v51  ;;  %v1831_v63 = vadd.f32 %v6983_v1, %v9415_v8  ;;  %v7110_v43 = vadd.f32 %v7109_v10, %v7108_v6 }
 0x14e   : > { %7896 = vmatmul.mubr.bf16.vlgmr.msra.gmra.mrb[144].mxu0 %v9283_v16 }
 0x14f   : > { %v9480_v28 = vadd.f32 %v7095_v29, %v1831_v63  ;;  %v1834_v55 = vadd.f32 %v6986_v24, %v9415_v8  ;;  %7899 = vmatprep.mubr.bf16.mxu0 %v11045_v41  ;;  %v8208_v63 = vld [vmem:[%s10973_s3 + $0x10] sm:$0xff]  }
 0x151   : > { %v9484_v46 = vadd.f32 %v7098_v13, %v1834_v55  ;;  %v6987_v47 = vpop.f32.mrb[40].mxu0  ;;  %v8207_v13 = vld [vmem:[%s10973_s3 + $0x50] sm:$0xff]   ;;  %v7111_v55 = vpop.f32.mrb[32].mxu1 }
 0x152   : > { %v6988_v30 = vpop.f32.mrb[41].mxu0  ;;  %v7112_v11 = vpop.f32.mrb[33].mxu1  ;;  %7387 = vmatprep.subr.bf16.mxu1 %v8207_v13 }
 0x153   : > { %v6989_v59 = vadd.f32 %v6988_v30, %v6987_v47  ;;  %v6990_v51 = vpop.f32.mrb[42].mxu0  ;;  %v7114_v30 = vpop.f32.mrb[34].mxu1  ;;  %7388 = vmatpush3.bf16.msra.mxu1 %v8208_v63 }
 0x154   : > { %v6991_v1 = vpop.f32.mrb[43].mxu0 }
 0x155   : > { %v6992_v16 = vadd.f32 %v6991_v1, %v6990_v51  ;;  %v1839_v29 = vadd.f32 %v6989_v59, %v9415_v8  ;;  %v7115_v59 = vpop.f32.mrb[35].mxu1 }
 0x156   : > { %7900 = vmatmul.mubr.bf16.gmra.mrb[148].mxu0 %v11046_v2  ;;  %v7116_v10 = vadd.f32 %v7115_v59, %v7114_v30 }
 0x157   : > { %v9488_v24 = vadd.f32 %v7101_v25, %v1839_v29  ;;  %v1842_v41 = vadd.f32 %v6992_v16, %v9415_v8  ;;  %7903 = vmatprep.mubr.bf16.mxu0 %v11047_v42  ;;  %v7113_v25 = vadd.f32 %v7112_v11, %v7111_v55 }
 0x159   : > { %v9498_v32 = vadd.f32 %v7104_v0, %v1842_v41  ;;  %v6993_v47 = vpop.f32.mrb[44].mxu0  ;;  %v7117_v41 = vpop.f32.mrb[36].mxu1 }
 0x15a   : > { %v6994_v2 = vpop.f32.mrb[45].mxu0  ;;  %v7118_v55 = vpop.f32.mrb[37].mxu1 }
 0x15b   : > { %v6995_v6 = vadd.f32 %v6994_v2, %v6993_v47  ;;  %v6996_v42 = vpop.f32.mrb[46].mxu0  ;;  %v7119_v11 = vadd.f32 %v7118_v55, %v7117_v41  ;;  %v7120_v2 = vpop.f32.mrb[38].mxu1 }
 0x15c   : > { %v6997_v51 = vpop.f32.mrb[47].mxu0  ;;  %v7121_v59 = vpop.f32.mrb[39].mxu1 }
 0x15d   : > { %v6998_v1 = vadd.f32 %v6997_v51, %v6996_v42  ;;  %v1847_v16 = vadd.f32 %v6995_v6, %v9415_v8  ;;  %v7122_v51 = vadd.f32 %v7121_v59, %v7120_v2 }
 0x15e   : > { %7904 = vmatmul.mubr.bf16.gmra.mrb[152].mxu0 %v11048_v57 }
 0x15f   : > { %v9502_v29 = vadd.f32 %v7107_v20, %v1847_v16  ;;  %v1850_v0 = vadd.f32 %v6998_v1, %v9415_v8  ;;  %7907 = vmatprep.mubr.bf16.mxu0 %v11049_v14  ;;  %v8210_v16 = vld [vmem:[%s10973_s3 + $0x18] sm:$0xff]  }
 0x161   : > { %v9506_v13 = vadd.f32 %v7110_v43, %v1850_v0  ;;  %v6999_v63 = vpop.f32.mrb[48].mxu0  ;;  %v8209_v43 = vld [vmem:[%s10973_s3 + $0x58] sm:$0xff]   ;;  %v7123_v0 = vpop.f32.mrb[40].mxu1 }
 0x162   : > { %v7000_v47 = vpop.f32.mrb[49].mxu0  ;;  %v7124_v55 = vpop.f32.mrb[41].mxu1  ;;  %7389 = vmatprep.subr.bf16.mxu1 %v8209_v43 }
 0x163   : > { %v7001_v30 = vadd.f32 %v7000_v47, %v6999_v63  ;;  %v7002_v42 = vpop.f32.mrb[50].mxu0  ;;  %v7125_v47 = vadd.f32 %v7124_v55, %v7123_v0  ;;  %7390 = vmatpush3.bf16.msra.mxu1 %v8210_v16 }
 0x164   : > { %v7003_v6 = vpop.f32.mrb[51].mxu0 }
 0x165   : > { %v1855_v57 = vadd.f32 %v7001_v30, %v9415_v8  ;;  %v7004_v20 = vadd.f32 %v7003_v6, %v7002_v42 }
 0x166   : > { %7908 = vmatmul.mubr.bf16.gmra.mrb[156].mxu0 %v11050_v52 }
 0x167   : > { %v1858_v14 = vadd.f32 %v7004_v20, %v9415_v8  ;;  %v9511_v1 = vadd.f32 %v7113_v25, %v1855_v57  ;;  %7911 = vmatprep.mubr.bf16.mxu0 %v11052_v27  ;;  %v7126_v25 = vpop.f32.mrb[42].mxu1 }
 0x168   : > { %v7127_v30 = vpop.f32.mrb[43].mxu1 }
 0x169   : > { %v9520_v41 = vadd.f32 %v7116_v10, %v1858_v14  ;;  %v7005_v63 = vpop.f32.mrb[52].mxu0  ;;  %v7128_v59 = vadd.f32 %v7127_v30, %v7126_v25  ;;  %v7129_v14 = vpop.f32.mrb[44].mxu1 }
 0x16a   : > { %v7006_v52 = vpop.f32.mrb[53].mxu0  ;;  %v7130_v0 = vpop.f32.mrb[45].mxu1 }
 0x16b   : > { %v7007_v2 = vadd.f32 %v7006_v52, %v7005_v63  ;;  %v7008_v27 = vpop.f32.mrb[54].mxu0  ;;  %v7131_v55 = vadd.f32 %v7130_v0, %v7129_v14  ;;  %v7132_v52 = vpop.f32.mrb[46].mxu1 }
 0x16c   : > { %v7009_v42 = vpop.f32.mrb[55].mxu0 }
 0x16d   : > { %v1863_v6 = vadd.f32 %v7007_v2, %v9415_v8  ;;  %v7010_v57 = vadd.f32 %v7009_v42, %v7008_v27  ;;  %v7133_v2 = vpop.f32.mrb[47].mxu1 }
 0x16e   : > { %7912 = vmatmul.mubr.bf16.gmra.mrb[160].mxu0 %v11053_v3  ;;  %v7134_v42 = vadd.f32 %v7133_v2, %v7132_v52  ;;  %v923_v2 = vrot.slane %v9370_v37, 5 }
 0x16f   : > { %v1866_v10 = vadd.f32 %v7010_v57, %v9415_v8  ;;  %v9525_v20 = vadd.f32 %v7119_v11, %v1863_v6  ;;  %7915 = vmatprep.mubr.bf16.mxu0 %v9116_v9  ;;  %v8211_v6 = vld [vmem:[%s10973_s3 + $0x60] sm:$0xff]  }
 0x170   : > { %v7263_v14 = vpop.f32.mrb[48].mxu1  ;;  %7391 = vmatprep.subr.bf16.mxu1 %v8211_v6 }
 0x171   : > { %v9528_v43 = vadd.f32 %v7122_v51, %v1866_v10  ;;  %v7011_v16 = vpop.f32.mrb[56].mxu0  ;;  %v920_v51 = vrot.slane %v9356_v12, 5  ;;  %v8212_v10 = vld [vmem:[%s10973_s3 + $0x20] sm:$0xff]   ;;  %v7264_v0 = vpop.f32.mrb[49].mxu1 }
 0x172   : > { %v7012_v63 = vpop.f32.mrb[57].mxu0  ;;  %7392 = vmatpush3.bf16.msra.mxu1 %v8212_v10 }
 0x173   : > { %v7013_v25 = vadd.f32 %v7012_v63, %v7011_v16  ;;  %v7014_v30 = vpop.f32.mrb[58].mxu0  ;;  %v9545_v63 = vadd.f32 %v7264_v0, %v7263_v14 }
 0x174   : > { %v7015_v27 = vpop.f32.mrb[59].mxu0 }
 0x175   : > { %v1871_v3 = vadd.f32 %v7013_v25, %v9415_v8  ;;  %v7016_v57 = vadd.f32 %v7015_v27, %v7014_v30  ;;  %v6699_v25 = vrot.slane %v9353_v35, 9  ;;  %v922_v30 = vrot.slane %v920_v51, 4 }
 0x176   : > { %7916 = vmatmul.mubr.bf16.gmra.mrb[164].mxu0 %v9149_v5 }
 0x177   : > { %v1874_v9 = vadd.f32 %v7016_v57, %v9415_v8  ;;  %v9533_v11 = vadd.f32 %v7125_v47, %v1871_v3  ;;  %7919 = vmatprep.mubr.bf16.mxu0 %v9179_v49  ;;  %v7266_v49 = vpop.f32.mrb[50].mxu1  ;;  %v921_v35 = vsel %vm8430_vm4, %v6699_v25, %v920_v51  ;;  %v924_v37 = vsel %vm8430_vm4, %v922_v30, %v923_v2 }
 0x178   : > { %v7267_v27 = vpop.f32.mrb[51].mxu1 }
 0x179   : > { %v9543_v16 = vadd.f32 %v7128_v59, %v1874_v9  ;;  %v7017_v5 = vpop.f32.mrb[60].mxu0  ;;  %v9549_v57 = vadd.f32 %v7267_v27, %v7266_v49  ;;  %v7269_v10 = vpop.f32.mrb[52].mxu1 }
 0x17a   : > { %v7018_v47 = vpop.f32.mrb[61].mxu0 }
 0x17b   : > { %v7019_v12 = vadd.f32 %v7018_v47, %v7017_v5  ;;  %v7020_v52 = vpop.f32.mrb[62].mxu0  ;;  %v7270_v47 = vpop.f32.mrb[53].mxu1 }
 0x17c   : > { %v7021_v3 = vpop.f32.mrb[63].mxu0 }
 0x17d   : > { %v1879_v59 = vadd.f32 %v7019_v12, %v9415_v8  ;;  %v7022_v9 = vadd.f32 %v7021_v3, %v7020_v52  ;;  %v6753_v12 = vcombine.low %v921_v35, %v924_v37  ;;  %v7272_v52 = vpop.f32.mrb[54].mxu1 }
 0x17e   : > { %7920 = vmatmul.mubr.bf16.gmra.mrb[168].mxu0 %v9200_v61  ;;  %v9563_v61 = vadd.f32 %v7270_v47, %v7269_v10  ;;  %v7273_v3 = vpop.f32.mrb[55].mxu1 }
 0x17f   : > { %v1882_v6 = vadd.f32 %v7022_v9, %v9415_v8  ;;  %v9554_v14 = vadd.f32 %v7131_v55, %v1879_v59  ;;  %7923 = vmatprep.mubr.bf16.mxu0 %v9454_v44  ;;  %v1759_v55 = vadd.f32 %v9367_v36, %v9415_v8  ;;  %v9567_v25 = vadd.f32 %v7273_v3, %v7272_v52  ;;  %v8213_v59 = vld [vmem:[%s10973_s3 + $0x68] sm:$0xff]  }
 0x180   : > { %v8214_v36 = vld [vmem:[%s10973_s3 + $0x28] sm:$0xff]   ;;  %v7275_v9 = vpop.f32.mrb[56].mxu1  ;;  %7393 = vmatprep.subr.bf16.mxu1 %v8213_v59 }
 0x181   : > { %v9561_v5 = vadd.f32 %v7134_v42, %v1882_v6  ;;  %v7039_v0 = vpop.f32.mrb[64].mxu0  ;;  %v1762_v42 = vadd.f32 %v9372_v21, %v9415_v8  ;;  %v7276_v35 = vpop.f32.mrb[57].mxu1  ;;  %7394 = vmatpush3.bf16.msra.mxu1 %v8214_v36 }
 0x182   : > { %v7040_v49 = vpop.f32.mrb[65].mxu0  ;;  %v9581_v10 = vadd.f32 %v7276_v35, %v7275_v9  ;;  %v7278_v21 = vpop.f32.mrb[58].mxu1 }
 0x183   : > { %11054 = vst [vmem:[#allocation7_spill] sm:$0xff] %v9561_v5  ;;  %v7041_v44 = vadd.f32 %v7040_v49, %v7039_v0  ;;  %v7042_v27 = vpop.f32.mrb[66].mxu0  ;;  %v1767_v0 = vadd.f32 %v9385_v48, %v9415_v8 }
 0x184   : > { %v7043_v51 = vpop.f32.mrb[67].mxu0 }
 0x185   : > { %v9569_v23 = vadd.f32 %v7041_v44, %v1759_v55  ;;  %v7044_v30 = vadd.f32 %v7043_v51, %v7042_v27  ;;  %v1770_v27 = vadd.f32 %v9387_v17, %v9415_v8 }
 0x186   : > { %7924 = vmatmul.mubr.bf16.gmra.mrb[172].mxu0 %v6753_v12  ;;  %v7279_v12 = vpop.f32.mrb[59].mxu1 }
 0x187   : > { %v9573_v2 = vadd.f32 %v7044_v30, %v1762_v42  ;;  %v9585_v55 = vadd.f32 %v7279_v12, %v7278_v21 }
 0x188   : > { %v7281_v42 = vpop.f32.mrb[60].mxu1 }
 0x189   : > { %v7045_v6 = vpop.f32.mrb[68].mxu0  ;;  %v7282_v59 = vpop.f32.mrb[61].mxu1 }
 0x18a   : > { %v7046_v37 = vpop.f32.mrb[69].mxu0  ;;  %v9593_v9 = vadd.f32 %v7282_v59, %v7281_v42  ;;  %v7284_v48 = vpop.f32.mrb[62].mxu1 }
 0x18b   : > { %v7047_v47 = vadd.f32 %v7046_v37, %v7045_v6  ;;  %v7048_v49 = vpop.f32.mrb[70].mxu0  ;;  %v1775_v6 = vadd.f32 %v9397_v60, %v9415_v8  ;;  %v7285_v21 = vpop.f32.mrb[63].mxu1  ;;  %v8216_v60 = vld [vmem:[%s10973_s3 + $0x30] sm:$0xff]  }
 0x18c   : > { %v7049_v52 = vpop.f32.mrb[71].mxu0 }
 0x18d   : > { %v9587_v44 = vadd.f32 %v7047_v47, %v1767_v0  ;;  %v7050_v3 = vadd.f32 %v7049_v52, %v7048_v49  ;;  %v9597_v47 = vadd.f32 %v7285_v21, %v7284_v48  ;;  %v1778_v49 = vadd.f32 %v9399_v45, %v9415_v8  ;;  %v8217_v21 = vld [vmem:[%s10973_s3 + $0xc0] sm:$0xff]  }
 0x18e   : > { %v1783_v45 = vadd.f32 %v9406_v58, %v9415_v8  ;;  %7495 = vmatprep.subr.bf16.mxu0 %v8217_v21 }
 0x18f   : > { %v9591_v51 = vadd.f32 %v7050_v3, %v1770_v27  ;;  %v8215_v27 = vld [vmem:[%s10973_s3 + $0x70] sm:$0xff]  }
 0x190   : > { %v7287_v3 = vpop.f32.mrb[64].mxu1  ;;  %7395 = vmatprep.subr.bf16.mxu1 %v8215_v27 }
 0x191   : > { %v7051_v30 = vpop.f32.mrb[72].mxu0  ;;  %7396 = vmatpush3.bf16.msra.mxu1 %v8216_v60  ;;  %v1786_v60 = vadd.f32 %v9408_v31, %v9415_v8 }
 0x192   : > { %v7052_v36 = vpop.f32.mrb[73].mxu0  ;;  %7397 = vmatprep.subr.bf16.mxu1 %v8221_v4  ;;  %v8229_v4 = vld [vmem:[%s10973_s3 + $0xe8] sm:$0xff]  }
 0x193   : > { %v7053_v35 = vadd.f32 %v7052_v36, %v7051_v30  ;;  %v7054_v37 = vpop.f32.mrb[74].mxu0  ;;  %v7288_v30 = vpop.f32.mrb[65].mxu1 }
 0x194   : > { %v7055_v0 = vpop.f32.mrb[75].mxu0  ;;  %v9611_v36 = vadd.f32 %v7288_v30, %v7287_v3  ;;  %v7290_v48 = vpop.f32.mrb[66].mxu1 }
 0x195   : > { %v9599_v17 = vadd.f32 %v7053_v35, %v1775_v6  ;;  %v7056_v12 = vadd.f32 %v7055_v0, %v7054_v37  ;;  %v7291_v37 = vpop.f32.mrb[67].mxu1 }
 0x197   : > { %v9603_v52 = vadd.f32 %v7056_v12, %v1778_v49  ;;  %v9618_v49 = vadd.f32 %v7291_v37, %v7290_v48  ;;  %v8218_v12 = vld [vmem:[%s10973_s3 + $0x80] sm:$0xff]  }
 0x198   : > { %7496 = vmatpush3.bf16.msra.mxu0 %v8218_v12  ;;  %v7293_v30 = vpop.f32.mrb[68].mxu1  ;;  %v8223_v12 = vld [vmem:[%s10973_s3 + $0xd0] sm:$0xff]  }
 0x199   : > { %v7057_v42 = vpop.f32.mrb[76].mxu0 }
 0x19a   : > { %v7058_v59 = vpop.f32.mrb[77].mxu0 }
 0x19b   : > { %v7059_v6 = vadd.f32 %v7058_v59, %v7057_v42  ;;  %v7060_v35 = vpop.f32.mrb[78].mxu0  ;;  %v8219_v42 = vld [vmem:[%s10973_s3 + $0xc8] sm:$0xff]  }
 0x19c   : > { %v7061_v0 = vpop.f32.mrb[79].mxu0  ;;  %v8220_v59 = vld [vmem:[%s10973_s3 + $0x88] sm:$0xff]   ;;  %7497 = vmatprep.subr.bf16.mxu0 %v8219_v42  ;;  %v8224_v42 = vld [vmem:[%s10973_s3 + $0x90] sm:$0xff]  }
 0x19d   : > { %v9623_v27 = vadd.f32 %v7059_v6, %v1783_v45  ;;  %v7062_v58 = vadd.f32 %v7061_v0, %v7060_v35  ;;  %v7294_v45 = vpop.f32.mrb[69].mxu1  ;;  %v8326_v6 = vmov 0   ;;  %7498 = vmatpush3.bf16.msra.mxu0 %v8220_v59 }
 0x19e   : > { %2561 = vst [vmem:[#allocation2] sm:$0xff] %v8326_v6  ;;  %2562 = vst [vmem:[#allocation2 + $0x8] sm:$0xff] %v8326_v6  ;;  %v9635_v8 = vadd.f32 %v7294_v45, %v7293_v30  ;;  %v7296_v35 = vpop.f32.mrb[70].mxu1  ;;  %7499 = vmatprep.subr.bf16.mxu0 %v8223_v12 }
 0x19f   : > { %v9627_v3 = vadd.f32 %v7062_v58, %v1786_v60  ;;  %2564 = vst [vmem:[#allocation2 + $0x110] sm:$0xff] %v8326_v6  ;;  %2565 = vst [vmem:[#allocation2 + $0x118] sm:$0xff] %v8326_v6  ;;  %v7297_v0 = vpop.f32.mrb[71].mxu1 }
 0x1a0   : > { %2567 = vst [vmem:[#allocation2 + $0x10] sm:$0xf] %v8326_v6  ;;  %2568 = vst [vmem:[#allocation2 + $0x20] sm:$0xf] %v8326_v6  ;;  %v9640_v58 = vadd.f32 %v7297_v0, %v7296_v35  ;;  %v8226_v35 = vld [vmem:[%s10973_s3 + $0x98] sm:$0xff]  }
 0x1a1   : > { %v7151_v48 = vpop.f32.mrb[80].mxu0  ;;  %2569 = vst [vmem:[#allocation2 + $0x30] sm:$0xf] %v8326_v6  ;;  %2570 = vst [vmem:[#allocation2 + $0x40] sm:$0xf] %v8326_v6  ;;  %7500 = vmatpush3.bf16.msra.mxu0 %v8224_v42 }
 0x1a2   : > { %2571 = vst [vmem:[#allocation2 + $0x50] sm:$0xf] %v8326_v6  ;;  %2572 = vst [vmem:[#allocation2 + $0x60] sm:$0xf] %v8326_v6  ;;  %v7152_v31 = vpop.f32.mrb[81].mxu0 }
 0x1a3   : > { %2573 = vst [vmem:[#allocation2 + $0x70] sm:$0xf] %v8326_v6  ;;  %2574 = vst [vmem:[#allocation2 + $0x80] sm:$0xf] %v8326_v6  ;;  %v7153_v37 = vadd.f32 %v7152_v31, %v7151_v48  ;;  %v7154_v21 = vpop.f32.mrb[82].mxu0  ;;  %v7299_v31 = vpop.f32.mrb[72].mxu1 }
 0x1a4   : > { %2575 = vst [vmem:[#allocation2 + $0x90] sm:$0xf] %v8326_v6  ;;  %2576 = vst [vmem:[#allocation2 + $0xa0] sm:$0xf] %v8326_v6  ;;  %v7155_v60 = vpop.f32.mrb[83].mxu0  ;;  %v7300_v53 = vpop.f32.mrb[73].mxu1 }
 0x1a5   : > { %2577 = vst [vmem:[#allocation2 + $0xb0] sm:$0xf] %v8326_v6  ;;  %2578 = vst [vmem:[#allocation2 + $0xc0] sm:$0xf] %v8326_v6  ;;  %v2081_v30 = vadd.f32 %v7153_v37, %v9569_v23  ;;  %v7156_v59 = vadd.f32 %v7155_v60, %v7154_v21  ;;  %v2700_v37 = vld [vmem:[#allocation2 + $0x8] sm:$0xf] }
 0x1a6   : > { %2579 = vst [vmem:[#allocation2 + $0xd0] sm:$0xf] %v8326_v6  ;;  %2580 = vst [vmem:[#allocation2 + $0xe0] sm:$0xf] %v8326_v6  ;;  %v7302_v12 = vpop.f32.mrb[74].mxu1  ;;  %v2741_v60 = vshrl.u32 %v2700_v37, 16 }
 0x1a7   : > { %2581 = vst [vmem:[#allocation2 + $0xf0] sm:$0xf] %v8326_v6  ;;  %2582 = vst [vmem:[#allocation2 + $0x100] sm:$0xf] %v8326_v6  ;;  %v2084_v48 = vadd.f32 %v7156_v59, %v9573_v2  ;;  %v9648_v45 = vadd.f32 %v9545_v63, %v2081_v30  ;;  %v9659_v63 = vadd.f32 %v7300_v53, %v7299_v31  ;;  %v2744_v42 = vshll.u32 %v2700_v37, 16  ;;  %v7303_v56 = vpop.f32.mrb[75].mxu1 }
 0x1a8   : > { %2585 = vst [vmem:[#allocation2 + $0x18] sm:$0xf0] %v8326_v6  ;;  %2586 = vst [vmem:[#allocation2 + $0x28] sm:$0xf0] %v8326_v6  ;;  %v9667_v53 = vadd.f32 %v7303_v56, %v7302_v12  ;;  %v8222_v31 = vld [vmem:[%s10973_s3 + $0x38] sm:$0xff]   ;;  %v3070_v56 = vrot.slane %v2700_v37, 4 }
 0x1a9   : > { %2587 = vst [vmem:[#allocation2 + $0x38] sm:$0xf0] %v8326_v6  ;;  %2588 = vst [vmem:[#allocation2 + $0x48] sm:$0xf0] %v8326_v6  ;;  %v7157_v0 = vpop.f32.mrb[84].mxu0  ;;  %v9657_v23 = vadd.f32 %v9549_v57, %v2084_v48  ;;  %v8227_v57 = vld [vmem:[%s10973_s3 + $0xe0] sm:$0xff]   ;;  %7398 = vmatpush3.bf16.msra.mxu1 %v8222_v31 }
 0x1aa   : > { %2589 = vst [vmem:[#allocation2 + $0x58] sm:$0xf0] %v8326_v6  ;;  %2590 = vst [vmem:[#allocation2 + $0x68] sm:$0xf0] %v8326_v6  ;;  %v7158_v21 = vpop.f32.mrb[85].mxu0 }
 0x1ab   : > { %2591 = vst [vmem:[#allocation2 + $0x78] sm:$0xf0] %v8326_v6  ;;  %2592 = vst [vmem:[#allocation2 + $0x88] sm:$0xf0] %v8326_v6  ;;  %v7159_v59 = vadd.f32 %v7158_v21, %v7157_v0  ;;  %v7160_v7 = vpop.f32.mrb[86].mxu0  ;;  %v2743_v0 = vrot.slane %v2741_v60, 3 }
 0x1ac   : > { %2593 = vst [vmem:[#allocation2 + $0x98] sm:$0xf0] %v8326_v6  ;;  %2594 = vst [vmem:[#allocation2 + $0xa8] sm:$0xf0] %v8326_v6  ;;  %v2746_v21 = vrot.slane %v2744_v42, 4  ;;  %v8230_v42 = vld [vmem:[%s10973_s3 + $0xa8] sm:$0xff]  }
 0x1ad   : > { %2595 = vst [vmem:[#allocation2 + $0xb8] sm:$0xf0] %v8326_v6  ;;  %2596 = vst [vmem:[#allocation2 + $0xc8] sm:$0xf0] %v8326_v6  ;;  %v2089_v50 = vadd.f32 %v7159_v59, %v9587_v44  ;;  %v7305_v44 = vpop.f32.mrb[76].mxu1 }
 0x1ae   : > { %2597 = vst [vmem:[#allocation2 + $0xd8] sm:$0xf0] %v8326_v6  ;;  %2598 = vst [vmem:[#allocation2 + $0xe8] sm:$0xf0] %v8326_v6  ;;  %v7306_v59 = vpop.f32.mrb[77].mxu1 }
 0x1af   : > { %2599 = vst [vmem:[#allocation2 + $0xf8] sm:$0xf0] %v8326_v6  ;;  %2600 = vst [vmem:[#allocation2 + $0x108] sm:$0xf0] %v8326_v6  ;;  %v9681_v60 = vadd.f32 %v9563_v61, %v2089_v50 }
 0x1b0   : > { %2566 = vst [vmem:[#allocation2] sm:$0xf] %v8326_v6  ;;  %2584 = vst [vmem:[#allocation2 + $0x8] sm:$0xf0] %v8326_v6 }
 0x1b1   : > { %2583 = vst [vmem:[#allocation2 + $0x110] sm:$0xf] %v8326_v6  ;;  %2601 = vst [vmem:[#allocation2 + $0x118] sm:$0xf0] %v8326_v6  ;;  %v8225_v6 = vld [vmem:[%s10973_s3 + $0xd8] sm:$0xff]  }
 0x1b2   : > { %11055 = vst [vmem:[#allocation9_spill] sm:$0xff] %v9648_v45  ;;  %11056 = vst [vmem:[#allocation10_spill] sm:$0xff] %v9657_v23  ;;  %7501 = vmatprep.subr.bf16.mxu0 %v8225_v6  ;;  %v7161_v6 = vpop.f32.mrb[87].mxu0  ;;  %v2747_v45 = vor.u32 %v2746_v21, %v2743_v0 }
 0x1b3   : > { %7502 = vmatpush3.bf16.msra.mxu0 %v8226_v35  ;;  %v8228_v35 = vld [vmem:[%s10973_s3 + $0xa0] sm:$0xff]   ;;  %v7162_v19 = vadd.f32 %v7161_v6, %v7160_v7  ;;  %v8232_v6 = vld [vmem:[%s10973_s3 + $0xf0] sm:$0xff]  }
 0x1b4   : > { %7503 = vmatprep.subr.bf16.mxu0 %v8227_v57 }
 0x1b5   : > { %v2092_v5 = vadd.f32 %v7162_v19, %v9591_v51  ;;  %v9694_v51 = vadd.f32 %v7306_v59, %v7305_v44 }
 0x1b7   : > { %v2699_v2 = vld [vmem:[#allocation2] sm:$0xf8]  ;;  %7504 = vmatpush3.bf16.msra.mxu0 %v8228_v35  ;;  %v9691_v19 = vadd.f32 %v9567_v25, %v2092_v5  ;;  %v8234_v25 = vld [vmem:[%s10973_s3 + $0xb0] sm:$0xff]  }
 0x1b8   : > { %v2733_v30 = vshrl.u32 %v2699_v2, 16  ;;  %v2736_v48 = vshll.u32 %v2699_v2, 16  ;;  %v9676_v2 = vld [vmem:[#allocation2] sm:$0xf0]  ;;  %7505 = vmatprep.subr.bf16.mxu0 %v8229_v4  ;;  %v8236_v4 = vld [vmem:[%s10973_s3 + $0xb8] sm:$0xff]  }
 0x1b9   : > { %v3069_v23 = vrot.slane %v9676_v2, 4 }
 0x1ba   : > { %v2735_v15 = vrot.slane %v2733_v30, 3  ;;  %v2738_v12 = vrot.slane %v2736_v48, 4  ;;  %v7163_v30 = vpop.f32.mrb[88].mxu0 }
 0x1bb   : > { %v3071_v37 = vsel %vm3068_vm6, %v3069_v23, %v3070_v56  ;;  %v7164_v61 = vpop.f32.mrb[89].mxu0  ;;  %7506 = vmatpush3.bf16.msra.mxu0 %v8230_v42  ;;  %v8235_v56 = vld [vmem:[%s10973_s3 + $0xf8] sm:$0xff]  }
 0x1bc   : > { %v2739_v7 = vor.u32 %v2738_v12, %v2735_v15  ;;  %5525 = vmatprep.mubr.bf16.mxu1 %v3071_v37  ;;  %v7308_v15 = vpop.f32.mrb[78].mxu1  ;;  %v7165_v23 = vadd.f32 %v7164_v61, %v7163_v30  ;;  %v7166_v57 = vpop.f32.mrb[90].mxu0  ;;  %7507 = vmatprep.subr.bf16.mxu0 %v8232_v6 }
 0x1bd   : > { %v7309_v48 = vpop.f32.mrb[79].mxu1  ;;  %v7167_v31 = vpop.f32.mrb[91].mxu0 }
 0x1be   : > { %v2748_v50 = vsel %vm2731_vm7, %v2739_v7, %v2747_v45  ;;  %v9699_v5 = vadd.f32 %v7309_v48, %v7308_v15  ;;  %v2097_v45 = vadd.f32 %v7165_v23, %v9599_v17  ;;  %v7168_v35 = vadd.f32 %v7167_v31, %v7166_v57  ;;  %v7311_v12 = vpop.f32.mrb[80].mxu1  ;;  %v7169_v7 = vpop.f32.mrb[92].mxu0  ;;  %v8233_v57 = vld [vmem:[%s10973_s3 + $0x100] sm:$0xff]  }
 0x1bf   : > { %5526 = vmatmul.mubr.bf16.vlgmr.msra.gmra.mrb[112].mxu1 %v2748_v50  ;;  %7508 = vmatpush3.bf16.msra.mxu0 %v8234_v25  ;;  %v7312_v44 = vpop.f32.mrb[81].mxu1  ;;  %v7170_v37 = vpop.f32.mrb[93].mxu0 }
 0x1c0   : > { %v2100_v0 = vadd.f32 %v7168_v35, %v9603_v52  ;;  %v9707_v21 = vadd.f32 %v9581_v10, %v2097_v45  ;;  %7509 = vmatprep.subr.bf16.mxu0 %v8235_v56  ;;  %v9718_v52 = vadd.f32 %v7312_v44, %v7311_v12  ;;  %v7314_v10 = vpop.f32.mrb[82].mxu1  ;;  %v7171_v42 = vadd.f32 %v7170_v37, %v7169_v7  ;;  %v7172_v30 = vpop.f32.mrb[94].mxu0 }
 0x1c1   : > { %v7315_v59 = vpop.f32.mrb[83].mxu1  ;;  %v7173_v50 = vpop.f32.mrb[95].mxu0 }
 0x1c2   : > { %v9716_v17 = vadd.f32 %v9585_v55, %v2100_v0  ;;  %v9720_v61 = vadd.f32 %v7315_v59, %v7314_v10  ;;  %v2105_v15 = vadd.f32 %v7171_v42, %v9623_v27  ;;  %v7174_v23 = vadd.f32 %v7173_v50, %v7172_v30  ;;  %v8231_v55 = vld [vmem:[%s10973_s3 + $0x140] sm:$0xff]   ;;  %v7317_v31 = vpop.f32.mrb[84].mxu1  ;;  %v7175_v25 = vpop.f32.mrb[96].mxu0 }
 0x1c3   : > { %7510 = vmatpush3.bf16.msra.mxu0 %v8236_v4  ;;  %7607 = vmatprep.subr.bf16.mxu1 %v8231_v55  ;;  %v7318_v45 = vpop.f32.mrb[85].mxu1  ;;  %v7176_v35 = vpop.f32.mrb[97].mxu0 }
 0x1c4   : > { %v2108_v48 = vadd.f32 %v7174_v23, %v9627_v3  ;;  %v9731_v6 = vadd.f32 %v9593_v9, %v2105_v15  ;;  %7608 = vmatpush3.bf16.msra.mxu1 %v8233_v57  ;;  %v9736_v0 = vadd.f32 %v7318_v45, %v7317_v31  ;;  %v7320_v56 = vpop.f32.mrb[86].mxu1  ;;  %v7177_v12 = vadd.f32 %v7176_v35, %v7175_v25  ;;  %v7178_v4 = vpop.f32.mrb[98].mxu0  ;;  %v8237_v45 = vld [vmem:[%s10973_s3 + $0x148] sm:$0xff]  }
 0x1c5   : > { %v7321_v7 = vpop.f32.mrb[87].mxu1  ;;  %v7179_v44 = vpop.f32.mrb[99].mxu0  ;;  %7609 = vmatprep.subr.bf16.mxu1 %v8237_v45 }
 0x1c6   : > { %v9734_v27 = vadd.f32 %v9597_v47, %v2108_v48  ;;  %v9738_v3 = vadd.f32 %v7321_v7, %v7320_v56  ;;  %v2113_v9 = vadd.f32 %v7177_v12, %v9421_v39  ;;  %v7180_v37 = vadd.f32 %v7179_v44, %v7178_v4  ;;  %v7323_v47 = vpop.f32.mrb[88].mxu1 }
 0x1c7   : > { %v7324_v59 = vpop.f32.mrb[89].mxu1 }
 0x1c8   : > { %v2116_v10 = vadd.f32 %v7180_v37, %v9423_v34  ;;  %v9743_v42 = vadd.f32 %v9611_v36, %v2113_v9  ;;  %v9748_v23 = vadd.f32 %v7324_v59, %v7323_v47  ;;  %v7326_v55 = vpop.f32.mrb[90].mxu1 }
 0x1c9   : > { %v7181_v30 = vpop.f32.mrb[100].mxu0  ;;  %v7327_v31 = vpop.f32.mrb[91].mxu1 }
 0x1ca   : > { %v9746_v50 = vadd.f32 %v9618_v49, %v2116_v10  ;;  %v7182_v15 = vpop.f32.mrb[101].mxu0  ;;  %v9750_v25 = vadd.f32 %v7327_v31, %v7326_v55  ;;  %v7329_v56 = vpop.f32.mrb[92].mxu1 }
 0x1cb   : > { %v7183_v57 = vadd.f32 %v7182_v15, %v7181_v30  ;;  %v7184_v48 = vpop.f32.mrb[102].mxu0  ;;  %v7330_v4 = vpop.f32.mrb[93].mxu1 }
 0x1cc   : > { %v7185_v39 = vpop.f32.mrb[103].mxu0  ;;  %v9766_v9 = vadd.f32 %v7330_v4, %v7329_v56  ;;  %v7332_v37 = vpop.f32.mrb[94].mxu1 }
 0x1cd   : > { %v2121_v34 = vadd.f32 %v7183_v57, %v9429_v18  ;;  %v7186_v36 = vadd.f32 %v7185_v39, %v7184_v48  ;;  %v8238_v18 = vld [vmem:[%s10973_s3 + $0x108] sm:$0xff]   ;;  %v7333_v47 = vpop.f32.mrb[95].mxu1 }
 0x1ce   : > { %7610 = vmatpush3.bf16.msra.mxu1 %v8238_v18  ;;  %v9768_v30 = vadd.f32 %v7333_v47, %v7332_v37 }
 0x1cf   : > { %v2124_v49 = vadd.f32 %v7186_v36, %v9432_v38  ;;  %v9758_v35 = vadd.f32 %v9635_v8, %v2121_v34 }
 0x1d0   : > { %v7335_v57 = vpop.f32.mrb[96].mxu1 }
 0x1d1   : > { %v7187_v12 = vpop.f32.mrb[104].mxu0  ;;  %v9761_v7 = vadd.f32 %v9640_v58, %v2124_v49  ;;  %v7336_v31 = vpop.f32.mrb[97].mxu1 }
 0x1d2   : > { %v7188_v44 = vpop.f32.mrb[105].mxu0  ;;  %v9778_v36 = vadd.f32 %v7336_v31, %v7335_v57  ;;  %v7338_v45 = vpop.f32.mrb[98].mxu1  ;;  %v8239_v31 = vld [vmem:[%s10973_s3 + $0x150] sm:$0xff]  }
 0x1d3   : > { %v7189_v10 = vadd.f32 %v7188_v44, %v7187_v12  ;;  %v7190_v38 = vpop.f32.mrb[106].mxu0  ;;  %v7339_v12 = vpop.f32.mrb[99].mxu1  ;;  %7611 = vmatprep.subr.bf16.mxu1 %v8239_v31 }
 0x1d4   : > { %v7191_v8 = vpop.f32.mrb[107].mxu0  ;;  %v9780_v4 = vadd.f32 %v7339_v12, %v7338_v45 }
 0x1d5   : > { %v2129_v59 = vadd.f32 %v7189_v10, %v9446_v62  ;;  %v7192_v15 = vadd.f32 %v7191_v8, %v7190_v38 }
 0x1d7   : > { %v2132_v58 = vadd.f32 %v7192_v15, %v9452_v33  ;;  %v9773_v55 = vadd.f32 %v9659_v63, %v2129_v59 }
 0x1d9   : > { %v7193_v48 = vpop.f32.mrb[108].mxu0  ;;  %v9776_v39 = vadd.f32 %v9667_v53, %v2132_v58  ;;  %v7341_v53 = vpop.f32.mrb[100].mxu1 }
 0x1da   : > { %v7194_v34 = vpop.f32.mrb[109].mxu0  ;;  %v7342_v10 = vpop.f32.mrb[101].mxu1 }
 0x1db   : > { %v7195_v49 = vadd.f32 %v7194_v34, %v7193_v48  ;;  %v7196_v56 = vpop.f32.mrb[110].mxu0  ;;  %v9790_v8 = vadd.f32 %v7342_v10, %v7341_v53  ;;  %v7344_v59 = vpop.f32.mrb[102].mxu1 }
 0x1dc   : > { %v7197_v62 = vpop.f32.mrb[111].mxu0  ;;  %v7345_v57 = vpop.f32.mrb[103].mxu1 }
 0x1dd   : > { %v2137_v33 = vadd.f32 %v7195_v49, %v9460_v26  ;;  %v7198_v63 = vadd.f32 %v7197_v62, %v7196_v56  ;;  %v9792_v48 = vadd.f32 %v7345_v57, %v7344_v59 }
 0x1df   : > { %v2140_v18 = vadd.f32 %v7198_v63, %v9462_v54  ;;  %v9785_v44 = vadd.f32 %v9694_v51, %v2137_v33  ;;  %v8240_v63 = vld [vmem:[%s10973_s3 + $0x110] sm:$0xff]  }
 0x1e0   : > { %v7347_v45 = vpop.f32.mrb[104].mxu1  ;;  %7612 = vmatpush3.bf16.msra.mxu1 %v8240_v63 }
 0x1e1   : > { %v7199_v37 = vpop.f32.mrb[112].mxu0  ;;  %v9788_v38 = vadd.f32 %v9699_v5, %v2140_v18  ;;  %v7348_v56 = vpop.f32.mrb[105].mxu1 }
 0x1e2   : > { %v7200_v47 = vpop.f32.mrb[113].mxu0  ;;  %v9805_v33 = vadd.f32 %v7348_v56, %v7347_v45 }
 0x1e3   : > { %v7201_v15 = vadd.f32 %v7200_v47, %v7199_v37  ;;  %v7202_v58 = vpop.f32.mrb[114].mxu0 }
 0x1e4   : > { %v7203_v26 = vpop.f32.mrb[115].mxu0 }
 0x1e5   : > { %v2145_v54 = vadd.f32 %v7201_v15, %v9466_v22  ;;  %v7204_v51 = vadd.f32 %v7203_v26, %v7202_v58  ;;  %v7350_v22 = vpop.f32.mrb[106].mxu1 }
 0x1e6   : > { %v7351_v53 = vpop.f32.mrb[107].mxu1 }
 0x1e7   : > { %v2148_v5 = vadd.f32 %v7204_v51, %v9476_v40  ;;  %v9800_v34 = vadd.f32 %v9718_v52, %v2145_v54  ;;  %v9810_v37 = vadd.f32 %v7351_v53, %v7350_v22 }
 0x1e8   : > { %v7353_v15 = vpop.f32.mrb[108].mxu1 }
 0x1e9   : > { %v7205_v49 = vpop.f32.mrb[116].mxu0  ;;  %v9803_v12 = vadd.f32 %v9720_v61, %v2148_v5  ;;  %v7354_v57 = vpop.f32.mrb[109].mxu1 }
 0x1ea   : > { %v7206_v62 = vpop.f32.mrb[117].mxu0  ;;  %v9820_v51 = vadd.f32 %v7354_v57, %v7353_v15  ;;  %v7356_v31 = vpop.f32.mrb[110].mxu1 }
 0x1eb   : > { %v7207_v18 = vadd.f32 %v7206_v62, %v7205_v49  ;;  %v7208_v40 = vpop.f32.mrb[118].mxu0  ;;  %v7357_v49 = vpop.f32.mrb[111].mxu1 }
 0x1ec   : > { %v7209_v52 = vpop.f32.mrb[119].mxu0  ;;  %v9822_v56 = vadd.f32 %v7357_v49, %v7356_v31 }
 0x1ed   : > { %v2153_v10 = vadd.f32 %v7207_v18, %v9480_v28  ;;  %v7210_v47 = vadd.f32 %v7209_v52, %v7208_v40  ;;  %v8241_v40 = vld [vmem:[%s10973_s3 + $0x158] sm:$0xff]  }
 0x1ee   : > { %7613 = vmatprep.subr.bf16.mxu1 %v8241_v40 }
 0x1ef   : > { %v2156_v61 = vadd.f32 %v7210_v47, %v9484_v46  ;;  %v9815_v59 = vadd.f32 %v9736_v0, %v2153_v10 }
 0x1f1   : > { %v7211_v58 = vpop.f32.mrb[120].mxu0  ;;  %v9818_v26 = vadd.f32 %v9738_v3, %v2156_v61 }
 0x1f2   : > { %v7212_v54 = vpop.f32.mrb[121].mxu0 }
 0x1f3   : > { %v7213_v5 = vadd.f32 %v7212_v54, %v7211_v58  ;;  %v7214_v45 = vpop.f32.mrb[122].mxu0 }
 0x1f4   : > { %v7215_v28 = vpop.f32.mrb[123].mxu0 }
 0x1f5   : > { %v2161_v46 = vadd.f32 %v7213_v5, %v9488_v24  ;;  %v7216_v0 = vadd.f32 %v7215_v28, %v7214_v45 }
 0x1f7   : > { %v2164_v62 = vadd.f32 %v7216_v0, %v9498_v32  ;;  %v9827_v22 = vadd.f32 %v9748_v23, %v2161_v46  ;;  %v8242_v32 = vld [vmem:[%s10973_s3 + $0x118] sm:$0xff]  }
 0x1f8   : > { %7614 = vmatpush3.bf16.msra.mxu1 %v8242_v32 }
 0x1f9   : > { %v7217_v3 = vpop.f32.mrb[124].mxu0  ;;  %v9830_v63 = vadd.f32 %v9750_v25, %v2164_v62  ;;  %v8243_v62 = vld [vmem:[%s10973_s3 + $0x160] sm:$0xff]  }
 0x1fa   : > { %v7218_v18 = vpop.f32.mrb[125].mxu0  ;;  %7615 = vmatprep.subr.bf16.mxu1 %v8243_v62 }
 0x1fb   : > { %v7219_v53 = vadd.f32 %v7218_v18, %v7217_v3  ;;  %v7220_v52 = vpop.f32.mrb[126].mxu0 }
 0x1fc   : > { %v7221_v10 = vpop.f32.mrb[127].mxu0 }
 0x1fd   : > { %v2169_v24 = vadd.f32 %v7219_v53, %v9502_v29  ;;  %v7222_v47 = vadd.f32 %v7221_v10, %v7220_v52 }
 0x1ff   : > { %v2172_v23 = vadd.f32 %v7222_v47, %v9506_v13  ;;  %v9841_v25 = vadd.f32 %v9766_v9, %v2169_v24 }
 0x201   : > { %v7223_v61 = vpop.f32.mrb[128].mxu0  ;;  %v9844_v15 = vadd.f32 %v9768_v30, %v2172_v23 }
 0x202   : > { %v7224_v58 = vpop.f32.mrb[129].mxu0 }
 0x203   : > { %v7225_v57 = vadd.f32 %v7224_v58, %v7223_v61  ;;  %v7226_v54 = vpop.f32.mrb[130].mxu0 }
 0x204   : > { %v7227_v31 = vpop.f32.mrb[131].mxu0 }
 0x205   : > { %v2177_v29 = vadd.f32 %v7225_v57, %v9511_v1  ;;  %v7228_v5 = vadd.f32 %v7227_v31, %v7226_v54 }
 0x207   : > { %v2180_v45 = vadd.f32 %v7228_v5, %v9520_v41  ;;  %v9849_v49 = vadd.f32 %v9778_v36, %v2177_v29  ;;  %v11057_v29 = vld [vmem:[#allocation7_spill] sm:$0xff] }
 0x209   : > { %v7229_v13 = vpop.f32.mrb[132].mxu0  ;;  %v9852_v9 = vadd.f32 %v9780_v4, %v2180_v45  ;;  %v8244_v4 = vld [vmem:[%s10973_s3 + $0x120] sm:$0xff]  }
 0x20a   : > { %v7230_v28 = vpop.f32.mrb[133].mxu0  ;;  %7616 = vmatpush3.bf16.msra.mxu1 %v8244_v4 }
 0x20b   : > { %v7231_v46 = vadd.f32 %v7230_v28, %v7229_v13  ;;  %v7232_v30 = vpop.f32.mrb[134].mxu0  ;;  %v11058_v28 = vld [vmem:[#allocation9_spill] sm:$0xff] }
 0x20c   : > { %v7233_v0 = vpop.f32.mrb[135].mxu0 }
 0x20d   : > { %v2185_v1 = vadd.f32 %v7231_v46, %v9525_v20  ;;  %v7234_v3 = vadd.f32 %v7233_v0, %v7232_v30 }
 0x20f   : > { %v2188_v41 = vadd.f32 %v7234_v3, %v9528_v43  ;;  %v9860_v36 = vadd.f32 %v9790_v8, %v2185_v1  ;;  %v3133_v3 = vld [vmem:[#allocation2 + $0x8] sm:$0x1f] }
 0x211   : > { %v7235_v18 = vpop.f32.mrb[136].mxu0  ;;  %v9866_v40 = vadd.f32 %v9792_v48, %v2188_v41 }
 0x212   : > { %v7236_v53 = vpop.f32.mrb[137].mxu0 }
 0x213   : > { %v7237_v52 = vadd.f32 %v7236_v53, %v7235_v18  ;;  %v7238_v10 = vpop.f32.mrb[138].mxu0 }
 0x214   : > { %v7239_v20 = vpop.f32.mrb[139].mxu0 }
 0x215   : > { %v2193_v24 = vadd.f32 %v7237_v52, %v9533_v11  ;;  %v7240_v47 = vadd.f32 %v7239_v20, %v7238_v10  ;;  %v8245_v11 = vld [vmem:[%s10973_s3 + $0x168] sm:$0xff]   ;;  %v3153_v52 = vshll.u32 %v9676_v2, 16  ;;  %v3158_v10 = vshrl.u32 %v3133_v3, 16 }
 0x216   : > { %7617 = vmatprep.subr.bf16.mxu1 %v8245_v11  ;;  %v3161_v20 = vshll.u32 %v3133_v3, 16 }
 0x217   : > { %v2196_v43 = vadd.f32 %v7240_v47, %v9543_v16  ;;  %v9871_v8 = vadd.f32 %v9805_v33, %v2193_v24  ;;  %v3155_v11 = vrot.slane %v3153_v52, 5 }
 0x219   : > { %v7241_v32 = vpop.f32.mrb[140].mxu0  ;;  %v9874_v23 = vadd.f32 %v9810_v37, %v2196_v43 }
 0x21a   : > { %v7242_v61 = vpop.f32.mrb[141].mxu0 }
 0x21b   : > { %v7243_v48 = vadd.f32 %v7242_v61, %v7241_v32  ;;  %v7244_v58 = vpop.f32.mrb[142].mxu0 }
 0x21c   : > { %v7245_v57 = vpop.f32.mrb[143].mxu0 }
 0x21d   : > { %v2201_v54 = vadd.f32 %v7243_v48, %v9554_v14  ;;  %v7246_v31 = vadd.f32 %v7245_v57, %v7244_v58  ;;  %v8246_v14 = vld [vmem:[%s10973_s3 + $0x128] sm:$0xff]  }
 0x21e   : > { %7618 = vmatpush3.bf16.msra.mxu1 %v8246_v14 }
 0x21f   : > { %v2204_v16 = vadd.f32 %v7246_v31, %v11057_v29  ;;  %v9882_v33 = vadd.f32 %v9820_v51, %v2201_v54  ;;  %v11059_v51 = vld [vmem:[#allocation10_spill] sm:$0xff]  ;;  %v3160_v29 = vrot.slane %v3158_v10, 4 }
 0x221   : > { %v7897_v5 = vpop.f32.mrb[144].mxu0  ;;  %v9885_v37 = vadd.f32 %v9822_v56, %v2204_v16 }
 0x222   : > { %v2411_v45 = vadd.f32 %v7897_v5, %v9681_v60  ;;  %v2402_v13 = vpop.f32.mrb[145].mxu0  ;;  %v3150_v60 = vshrl.u32 %v9676_v2, 16  ;;  %v3163_v2 = vrot.slane %v3161_v20, 5 }
 0x223   : > { %v2403_v46 = vadd.f32 %v2402_v13, %v11058_v28  ;;  %v7898_v30 = vpop.f32.mrb[146].mxu0 }
 0x224   : > { %v2414_v0 = vadd.f32 %v7898_v30, %v9691_v19  ;;  %v2405_v62 = vpop.f32.mrb[147].mxu0  ;;  %v2531_v41 = vmax.f32 %v2411_v45, 0.0  ;;  %v3152_v57 = vrot.slane %v3150_v60, 4 }
 0x225   : > { %v2406_v1 = vadd.f32 %v2405_v62, %v11059_v51  ;;  %v2529_v4 = vmax.f32 %v2403_v46, 0.0  ;;  %v3164_v46 = vor.u32 %v3163_v2, %v3160_v29 }
 0x226   : > { %v2532_v56 = vmax.f32 %v2414_v0, 0.0  ;;  %v3156_v28 = vor.u32 %v3155_v11, %v3152_v57 }
 0x227   : > { %v2530_v18 = vmax.f32 %v2406_v1, 0.0 }
 0x228   : > { %v2603_v53 = vpack.c.bf16 %v2532_v56, %v2531_v41 }
 0x229   : > { %v2602_v24 = vpack.c.bf16 %v2530_v18, %v2529_v4  ;;  %v7901_v47 = vpop.f32.mrb[148].mxu0 }
 0x22a   : > { %v2635_v43 = vrot.slane %v2603_v53, 4  ;;  %v2427_v19 = vadd.f32 %v7901_v47, %v9731_v6  ;;  %v2418_v32 = vpop.f32.mrb[149].mxu0  ;;  %v9909_v53 = vsel %vm307_vm2, %v3156_v28, %v3164_v46 }
 0x22b   : > { %v2634_v61 = vrot.slane %v2602_v24, 4  ;;  %v2419_v48 = vadd.f32 %v2418_v32, %v9707_v21  ;;  %v7902_v58 = vpop.f32.mrb[150].mxu0  ;;  %v8247_v21 = vld [vmem:[%s10973_s3 + $0x170] sm:$0xff]  }
 0x22c   : > { %2669 = vst [vmem:[#allocation2 + $0x28] ss:$-4 sps:$4 sm:$0xff] %v2635_v43   ;;  %v2430_v54 = vadd.f32 %v7902_v58, %v9734_v27  ;;  %v2421_v31 = vpop.f32.mrb[151].mxu0  ;;  %v2535_v5 = vmax.f32 %v2427_v19, 0.0  ;;  %7619 = vmatprep.subr.bf16.mxu1 %v8247_v21  ;;  %v8248_v24 = vld [vmem:[%s10973_s3 + $0x130] sm:$0xff]  }
 0x22d   : > { %2667 = vst [vmem:[#allocation2 + $0x18] ss:$-4 sps:$4 sm:$0xff] %v2634_v61   ;;  %v2422_v16 = vadd.f32 %v2421_v31, %v9716_v17  ;;  %v2533_v13 = vmax.f32 %v2419_v48, 0.0  ;;  %7620 = vmatpush3.bf16.msra.mxu1 %v8248_v24 }
 0x22e   : > { %v2536_v45 = vmax.f32 %v2430_v54, 0.0 }
 0x22f   : > { %v2534_v6 = vmax.f32 %v2422_v16, 0.0 }
 0x230   : > { %v2605_v14 = vpack.c.bf16 %v2536_v45, %v2535_v5 }
 0x231   : > { %v2604_v30 = vpack.c.bf16 %v2534_v6, %v2533_v13  ;;  %v7905_v27 = vpop.f32.mrb[152].mxu0 }
 0x232   : > { %v2637_v0 = vrot.slane %v2605_v14, 4  ;;  %v2443_v62 = vadd.f32 %v7905_v27, %v9758_v35  ;;  %v2434_v51 = vpop.f32.mrb[153].mxu0 }
 0x233   : > { %v2636_v1 = vrot.slane %v2604_v30, 4  ;;  %v2435_v17 = vadd.f32 %v2434_v51, %v9743_v42  ;;  %v7906_v3 = vpop.f32.mrb[154].mxu0  ;;  %v9917_v6 = vld [vmem:[#allocation2 + $0x28] sm:$0xf]  ;;  %v9920_v27 = vld [vmem:[#allocation2 + $0x20] sm:$0xf0] }
 0x234   : > { %2673 = vst [vmem:[#allocation2 + $0x48] ss:$-4 sps:$4 sm:$0xff] %v2637_v0   ;;  %v2539_v41 = vmax.f32 %v2443_v62, 0.0  ;;  %v2446_v56 = vadd.f32 %v7906_v3, %v9761_v7  ;;  %v2437_v4 = vpop.f32.mrb[155].mxu0  ;;  %v2702_v18 = vld [vmem:[#allocation2 + $0x18] sm:$0xf] }
 0x235   : > { %v9906_v60 = vld [vmem:[#allocation2 + $0x10] sm:$0xf0]  ;;  %2671 = vst [vmem:[#allocation2 + $0x38] ss:$-4 sps:$4 sm:$0xff] %v2636_v1   ;;  %v2537_v52 = vmax.f32 %v2435_v17, 0.0  ;;  %v2438_v35 = vadd.f32 %v2437_v4, %v9746_v50  ;;  %v3073_v20 = vrot.slane %v2702_v18, 4 }
 0x236   : > { %v3072_v10 = vrot.slane %v9906_v60, 4  ;;  %v2701_v42 = vld [vmem:[#allocation2 + $0x10] sm:$0xf8]  ;;  %v2540_v7 = vmax.f32 %v2446_v56, 0.0  ;;  %v2758_v19 = vshrl.u32 %v2702_v18, 16  ;;  %v2761_v58 = vshll.u32 %v2702_v18, 16 }
 0x237   : > { %v2750_v47 = vshrl.u32 %v2701_v42, 16  ;;  %v2753_v43 = vshll.u32 %v2701_v42, 16  ;;  %v3437_v32 = vld [vmem:[#allocation2 + $0x10] sm:$0xf8]  ;;  %v2538_v61 = vmax.f32 %v2438_v35, 0.0 }
 0x238   : > { %v3074_v48 = vsel %vm3068_vm6, %v3072_v10, %v3073_v20  ;;  %v3438_v57 = vld [vmem:[#allocation2 + $0x18] sm:$0xf]  ;;  %v3470_v54 = vshrl.u32 %v3437_v32, 16  ;;  %v2607_v50 = vpack.c.bf16 %v2540_v7, %v2539_v41  ;;  %v2760_v29 = vrot.slane %v2758_v19, 3  ;;  %v3439_v3 = vld [vmem:[#allocation2 + $0x20] sm:$0xf8] }
 0x239   : > { %5533 = vmatprep.mubr.bf16.mxu1 %v3074_v48  ;;  %v2752_v31 = vrot.slane %v2750_v47, 3  ;;  %v2755_v11 = vrot.slane %v2753_v43, 4  ;;  %v2606_v2 = vpack.c.bf16 %v2538_v61, %v2537_v52  ;;  %v7909_v16 = vpop.f32.mrb[156].mxu0  ;;  %v2763_v5 = vrot.slane %v2761_v58, 4 }
 0x23a   : > { %v3472_v45 = vrot.slane %v3470_v54, 3  ;;  %v3473_v13 = vshll.u32 %v3437_v32, 16  ;;  %v2639_v14 = vrot.slane %v2607_v50, 4  ;;  %v2459_v28 = vadd.f32 %v7909_v16, %v9785_v44  ;;  %v2450_v46 = vpop.f32.mrb[157].mxu0  ;;  %v3440_v44 = vld [vmem:[#allocation2 + $0x28] sm:$0xf] }
 0x23b   : > { %v2756_v21 = vor.u32 %v2755_v11, %v2752_v31  ;;  %v3478_v30 = vshrl.u32 %v3438_v57, 16  ;;  %v2638_v0 = vrot.slane %v2606_v2, 4  ;;  %v2451_v62 = vadd.f32 %v2450_v46, %v9773_v55  ;;  %v7910_v51 = vpop.f32.mrb[158].mxu0  ;;  %v8249_v55 = vld [vmem:[%s10973_s3 + $0x1c0] sm:$0xff]   ;;  %v8251_v46 = vld [vmem:[%s10973_s3 + $0x1c8] sm:$0xff]  }
 0x23c   : > { %v2764_v1 = vor.u32 %v2763_v5, %v2760_v29  ;;  %v3475_v17 = vrot.slane %v3473_v13, 4  ;;  %2677 = vst [vmem:[#allocation2 + $0x68] ss:$-4 sps:$4 sm:$0xff] %v2639_v14   ;;  %v2543_v41 = vmax.f32 %v2459_v28, 0.0  ;;  %v2462_v56 = vadd.f32 %v7910_v51, %v9788_v38  ;;  %v2453_v4 = vpop.f32.mrb[159].mxu0  ;;  %7719 = vmatprep.subr.bf16.mxu0 %v8249_v55  ;;  %v8250_v16 = vld [vmem:[%s10973_s3 + $0x180] sm:$0xff]  }
 0x23d   : > { %v3480_v18 = vrot.slane %v3478_v30, 3  ;;  %v3481_v52 = vshll.u32 %v3438_v57, 16  ;;  %2675 = vst [vmem:[#allocation2 + $0x58] ss:$-4 sps:$4 sm:$0xff] %v2638_v0   ;;  %v2541_v35 = vmax.f32 %v2451_v62, 0.0  ;;  %v2454_v10 = vadd.f32 %v2453_v4, %v9776_v39 }
 0x23e   : > { %v2765_v20 = vsel %vm2731_vm7, %v2756_v21, %v2764_v1  ;;  %v3476_v42 = vor.u32 %v3475_v17, %v3472_v45  ;;  %v2544_v24 = vmax.f32 %v2462_v56, 0.0  ;;  %v3075_v38 = vrot.slane %v9920_v27, 4  ;;  %v2703_v54 = vld [vmem:[#allocation2 + $0x20] sm:$0xf8]  ;;  %v9941_v1 = vld [vmem:[#allocation2 + $0x38] sm:$0xf] }
 0x23f   : > { %5534 = vmatmul.mubr.bf16.gmra.mrb[116].mxu1 %v2765_v20  ;;  %v3483_v7 = vrot.slane %v3481_v52, 4  ;;  %v3076_v47 = vrot.slane %v9917_v6, 4  ;;  %v2542_v43 = vmax.f32 %v2454_v10, 0.0  ;;  %v3487_v19 = vshrl.u32 %v3439_v3, 16  ;;  %v9945_v4 = vld [vmem:[#allocation2 + $0x30] sm:$0xf0] }
 0x240   : > { %v3490_v32 = vshll.u32 %v3439_v3, 16  ;;  %v3495_v61 = vshrl.u32 %v3440_v44, 16  ;;  %v2609_v39 = vpack.c.bf16 %v2544_v24, %v2543_v41  ;;  %v3498_v57 = vshll.u32 %v3440_v44, 16  ;;  %v3134_v55 = vld [vmem:[#allocation2 + $0x18] sm:$0x1f] }
 0x241   : > { %v3484_v48 = vor.u32 %v3483_v7, %v3480_v18  ;;  %v3077_v58 = vsel %vm3068_vm6, %v3075_v38, %v3076_v47  ;;  %v2608_v50 = vpack.c.bf16 %v2542_v43, %v2541_v35  ;;  %v3489_v31 = vrot.slane %v3487_v19, 3  ;;  %v7913_v2 = vpop.f32.mrb[160].mxu0  ;;  %v8253_v18 = vld [vmem:[%s10973_s3 + $0x178] sm:$0xff]  }
 0x242   : > { %5541 = vmatprep.mubr.bf16.mxu1 %v3077_v58  ;;  %v3492_v11 = vrot.slane %v3490_v32, 4  ;;  %v3497_v29 = vrot.slane %v3495_v61, 3  ;;  %v2641_v5 = vrot.slane %v2609_v39, 4  ;;  %v3500_v13 = vrot.slane %v3498_v57, 4  ;;  %v2466_v28 = vpop.f32.mrb[161].mxu0  ;;  %7621 = vmatprep.subr.bf16.mxu1 %v8253_v18 }
 0x243   : > { %v3485_v45 = vsel %vm2731_vm7, %v3476_v42, %v3484_v48  ;;  %v2475_v14 = vadd.f32 %v7913_v2, %v9815_v59  ;;  %v2640_v21 = vrot.slane %v2608_v50, 4  ;;  %v2467_v0 = vadd.f32 %v2466_v28, %v9800_v34  ;;  %v7914_v62 = vpop.f32.mrb[162].mxu0 }
 0x244   : > { %5686 = vmatprep.mubr.bf16.mxu0 %v3485_v45  ;;  %v3493_v30 = vor.u32 %v3492_v11, %v3489_v31  ;;  %v2767_v51 = vshrl.u32 %v2703_v54, 16  ;;  %2681 = vst [vmem:[#allocation2 + $0x88] ss:$-4 sps:$4 sm:$0xff] %v2641_v5   ;;  %v3501_v17 = vor.u32 %v3500_v13, %v3497_v29  ;;  %v2478_v59 = vadd.f32 %v7914_v62, %v9818_v26  ;;  %v2469_v41 = vpop.f32.mrb[163].mxu0  ;;  %v8252_v26 = vld [vmem:[%s10973_s3 + $0x188] sm:$0xff]   ;;  %v8255_v31 = vld [vmem:[%s10973_s3 + $0x1d0] sm:$0xff]  }
 0x245   : > { %5687 = vmatmul.mubr.bf16.vlgmr.msra.gmra.mrb[176].mxu0 %v9909_v53  ;;  %v2547_v3 = vmax.f32 %v2475_v14, 0.0  ;;  %v2770_v56 = vshll.u32 %v2703_v54, 16  ;;  %2679 = vst [vmem:[#allocation2 + $0x78] ss:$-4 sps:$4 sm:$0xff] %v2640_v21   ;;  %v2545_v34 = vmax.f32 %v2467_v0, 0.0  ;;  %v2470_v52 = vadd.f32 %v2469_v41, %v9803_v12  ;;  %v8254_v12 = vld [vmem:[%s10973_s3 + $0x138] sm:$0xff]  }
 0x246   : > { %v2769_v44 = vrot.slane %v2767_v51, 3  ;;  %v2775_v35 = vshrl.u32 %v9917_v6, 16  ;;  %7720 = vmatpush3.bf16.msra.mxu0 %v8250_v16  ;;  %v3502_v53 = vsel %vm2731_vm7, %v3493_v30, %v3501_v17  ;;  %v2548_v10 = vmax.f32 %v2478_v59, 0.0  ;;  %7622 = vmatpush3.bf16.msra.mxu1 %v8254_v12  ;;  %v3442_v54 = vld [vmem:[#allocation2 + $0x38] sm:$0xf] }
 0x247   : > { %v2772_v20 = vrot.slane %v2770_v56, 4  ;;  %v2778_v42 = vshll.u32 %v9917_v6, 16  ;;  %7721 = vmatprep.subr.bf16.mxu0 %v8251_v46  ;;  %5694 = vmatprep.mubr.bf16.mxu0 %v3502_v53  ;;  %v2546_v24 = vmax.f32 %v2470_v52, 0.0  ;;  %v3078_v38 = vrot.slane %v9945_v4, 4  ;;  %v3441_v6 = vld [vmem:[#allocation2 + $0x30] sm:$0xf8] }
 0x248   : > { %v2777_v7 = vrot.slane %v2775_v35, 3  ;;  %v3079_v47 = vrot.slane %v9941_v1, 4  ;;  %v2611_v43 = vpack.c.bf16 %v2548_v10, %v2547_v3  ;;  %v3167_v61 = vshrl.u32 %v9906_v60, 16  ;;  %v2705_v56 = vld [vmem:[#allocation2 + $0x30] sm:$0xf8] }
 0x249   : > { %v2773_v19 = vor.u32 %v2772_v20, %v2769_v44  ;;  %v2780_v32 = vrot.slane %v2778_v42, 4  ;;  %v2610_v39 = vpack.c.bf16 %v2546_v24, %v2545_v34  ;;  %v3170_v58 = vshll.u32 %v9906_v60, 16  ;;  %v7917_v50 = vpop.f32.mrb[164].mxu0  ;;  %v8256_v60 = vld [vmem:[%s10973_s3 + $0x190] sm:$0xff]   ;;  %v9976_v20 = vld [vmem:[#allocation2 + $0x40] sm:$0xf0] }
 0x24a   : > { %v3080_v48 = vsel %vm3068_vm6, %v3078_v38, %v3079_v47  ;;  %v3175_v57 = vshrl.u32 %v3134_v55, 16  ;;  %7722 = vmatpush3.bf16.msra.mxu0 %v8252_v26  ;;  %v2643_v11 = vrot.slane %v2611_v43, 4  ;;  %v3169_v2 = vrot.slane %v3167_v61, 4  ;;  %v2482_v5 = vpop.f32.mrb[165].mxu0  ;;  %v9979_v43 = vld [vmem:[#allocation2 + $0x48] sm:$0xf] }
 0x24b   : > { %v2781_v29 = vor.u32 %v2780_v32, %v2777_v7  ;;  %v3178_v16 = vshll.u32 %v3134_v55, 16  ;;  %v2642_v45 = vrot.slane %v2610_v39, 4  ;;  %v3172_v13 = vrot.slane %v3170_v58, 5  ;;  %v7918_v46 = vpop.f32.mrb[166].mxu0  ;;  %7723 = vmatprep.subr.bf16.mxu0 %v8255_v31 }
 0x24c   : > { %v3177_v14 = vrot.slane %v3175_v57, 4  ;;  %v3504_v28 = vshrl.u32 %v3441_v6, 16  ;;  %2685 = vst [vmem:[#allocation2 + $0xa8] ss:$-4 sps:$4 sm:$0xff] %v2643_v11   ;;  %v3507_v0 = vshll.u32 %v3441_v6, 16  ;;  %v3512_v62 = vshrl.u32 %v3442_v54, 16 }
 0x24d   : > { %v2782_v21 = vsel %vm2731_vm7, %v2773_v19, %v2781_v29  ;;  %v3180_v30 = vrot.slane %v3178_v16, 5  ;;  %v2485_v51 = vpop.f32.mrb[167].mxu0  ;;  %2683 = vst [vmem:[#allocation2 + $0x98] ss:$-4 sps:$4 sm:$0xff] %v2642_v45   ;;  %v3173_v17 = vor.u32 %v3172_v13, %v3169_v2  ;;  %v3515_v59 = vshll.u32 %v3442_v54, 16  ;;  %v8257_v6 = vld [vmem:[%s10973_s3 + $0x1d8] sm:$0xff]  }
 0x24e   : > { %5542 = vmatmul.mubr.bf16.gmra.mrb[120].mxu1 %v2782_v21  ;;  %v3506_v3 = vrot.slane %v3504_v28, 3  ;;  %v2491_v41 = vadd.f32 %v7917_v50, %v9841_v25  ;;  %7724 = vmatpush3.bf16.msra.mxu0 %v8256_v60  ;;  %v3509_v34 = vrot.slane %v3507_v0, 4  ;;  %v3514_v52 = vrot.slane %v3512_v62, 3  ;;  %v3135_v54 = vld [vmem:[#allocation2 + $0x28] sm:$0x1f]  ;;  %v8259_v60 = vld [vmem:[%s10973_s3 + $0x1e0] sm:$0xff]  }
 0x24f   : > { %5549 = vmatprep.mubr.bf16.mxu1 %v3080_v48  ;;  %v3181_v18 = vor.u32 %v3180_v30, %v3177_v14  ;;  %v2483_v44 = vadd.f32 %v2482_v5, %v9827_v22  ;;  %v3517_v35 = vrot.slane %v3515_v59, 4  ;;  %v2494_v53 = vadd.f32 %v7918_v46, %v9844_v15  ;;  %v3443_v50 = vld [vmem:[#allocation2 + $0x40] sm:$0xf8]  ;;  %7725 = vmatprep.subr.bf16.mxu0 %v8257_v6  ;;  %v8258_v5 = vld [vmem:[%s10973_s3 + $0x198] sm:$0xff]   ;;  %v3444_v46 = vld [vmem:[#allocation2 + $0x48] sm:$0xf] }
 0x250   : > { %v2551_v26 = vmax.f32 %v2491_v41, 0.0  ;;  %v2486_v10 = vadd.f32 %v2485_v51, %v9830_v63  ;;  %v3510_v55 = vor.u32 %v3509_v34, %v3506_v3  ;;  %v2784_v12 = vshrl.u32 %v2705_v56, 16  ;;  %v8260_v34 = vld [vmem:[%s10973_s3 + $0x1a0] sm:$0xff]   ;;  %v10018_v6 = vld [vmem:[#allocation2 + $0x50] sm:$0xf0] }
 0x251   : > { %v3182_v42 = vsel %vm307_vm2, %v3173_v17, %v3181_v18  ;;  %v2549_v25 = vmax.f32 %v2483_v44, 0.0  ;;  %v3518_v24 = vor.u32 %v3517_v35, %v3514_v52  ;;  %v2552_v7 = vmax.f32 %v2494_v53, 0.0  ;;  %v7921_v22 = vpop.f32.mrb[168].mxu0  ;;  %v2707_v53 = vld [vmem:[#allocation2 + $0x40] sm:$0xf8] }
 0x252   : > { %5695 = vmatmul.mubr.bf16.gmra.mrb[180].mxu0 %v3182_v42  ;;  %v2550_v38 = vmax.f32 %v2486_v10, 0.0  ;;  %v2787_v47 = vshll.u32 %v2705_v56, 16  ;;  %v2786_v19 = vrot.slane %v2784_v12, 3  ;;  %v2792_v15 = vshrl.u32 %v9941_v1, 16  ;;  %v2498_v61 = vpop.f32.mrb[169].mxu0 }
 0x253   : > { %v2795_v63 = vshll.u32 %v9941_v1, 16  ;;  %v3081_v32 = vrot.slane %v9976_v20, 4  ;;  %v3519_v39 = vsel %vm2731_vm7, %v3510_v55, %v3518_v24  ;;  %v2613_v48 = vpack.c.bf16 %v2552_v7, %v2551_v26  ;;  %v7922_v31 = vpop.f32.mrb[170].mxu0  ;;  %7726 = vmatpush3.bf16.msra.mxu0 %v8258_v5  ;;  %v8261_v7 = vld [vmem:[%s10973_s3 + $0x1e8] sm:$0xff]  }
 0x254   : > { %v2612_v58 = vpack.c.bf16 %v2550_v38, %v2549_v25  ;;  %v2789_v57 = vrot.slane %v2787_v47, 4  ;;  %5702 = vmatprep.mubr.bf16.mxu0 %v3519_v39  ;;  %v2794_v11 = vrot.slane %v2792_v15, 3  ;;  %v3082_v1 = vrot.slane %v9979_v43, 4  ;;  %v2501_v16 = vpop.f32.mrb[171].mxu0  ;;  %7727 = vmatprep.subr.bf16.mxu0 %v8259_v60 }
 0x255   : > { %v2797_v29 = vrot.slane %v2795_v63, 4  ;;  %v3184_v2 = vshrl.u32 %v9920_v27, 16  ;;  %v2645_v45 = vrot.slane %v2613_v48, 4  ;;  %v3187_v28 = vshll.u32 %v9920_v27, 16 }
 0x256   : > { %v2644_v13 = vrot.slane %v2612_v58, 4  ;;  %v2790_v14 = vor.u32 %v2789_v57, %v2786_v19  ;;  %v3083_v30 = vsel %vm3068_vm6, %v3081_v32, %v3082_v1  ;;  %v3192_v62 = vshrl.u32 %v3135_v54, 16  ;;  %v10023_v57 = vld [vmem:[#allocation2 + $0x58] sm:$0xf]  ;;  %v8264_v1 = vld [vmem:[%s10973_s3 + $0x1f0] sm:$0xff]  }
 0x257   : > { %v2798_v21 = vor.u32 %v2797_v29, %v2794_v11  ;;  %v3186_v0 = vrot.slane %v3184_v2, 4  ;;  %2689 = vst [vmem:[#allocation2 + $0xc8] ss:$-4 sps:$4 sm:$0xff] %v2645_v45   ;;  %v3189_v51 = vrot.slane %v3187_v28, 5  ;;  %v3195_v17 = vshll.u32 %v3135_v54, 16  ;;  %7728 = vmatpush3.bf16.msra.mxu0 %v8260_v34  ;;  %v8263_v54 = vld [vmem:[%s10973_s3 + $0x200] sm:$0xff]  }
 0x258   : > { %2687 = vst [vmem:[#allocation2 + $0xb8] ss:$-4 sps:$4 sm:$0xff] %v2644_v13   ;;  %v3521_v3 = vshrl.u32 %v3443_v50, 16  ;;  %v3524_v59 = vshll.u32 %v3443_v50, 16  ;;  %v3194_v41 = vrot.slane %v3192_v62, 4  ;;  %v3529_v56 = vshrl.u32 %v3444_v46, 16  ;;  %7729 = vmatprep.subr.bf16.mxu0 %v8261_v7  ;;  %7927 = vmatprep.subr.bf16.mxu1 %v8263_v54 }
 0x259   : > { %v2799_v27 = vsel %vm2731_vm7, %v2790_v14, %v2798_v21  ;;  %v3532_v18 = vshll.u32 %v3444_v46, 16  ;;  %v3190_v52 = vor.u32 %v3189_v51, %v3186_v0  ;;  %v3197_v44 = vrot.slane %v3195_v17, 5  ;;  %v10002_v10 = vpop.f32.mrb[172].mxu0  ;;  %v3136_v13 = vld [vmem:[#allocation2 + $0x38] sm:$0x1f]  ;;  %v8265_v17 = vld [vmem:[%s10973_s3 + $0x1b0] sm:$0xff]  }
 0x25a   : > { %5550 = vmatmul.mubr.bf16.gmra.mrb[124].mxu1 %v2799_v27  ;;  %v3523_v35 = vrot.slane %v3521_v3, 3  ;;  %v3526_v26 = vrot.slane %v3524_v59, 4  ;;  %v3531_v42 = vrot.slane %v3529_v56, 3  ;;  %v2507_v25 = vadd.f32 %v7921_v22, %v9860_v36  ;;  %v10006_v24 = vpop.f32.mrb[173].mxu0  ;;  %v8262_v36 = vld [vmem:[%s10973_s3 + $0x1a8] sm:$0xff]  }
 0x25b   : > { %5557 = vmatprep.mubr.bf16.mxu1 %v3083_v30  ;;  %v3534_v55 = vrot.slane %v3532_v18, 4  ;;  %v2499_v12 = vadd.f32 %v2498_v61, %v9849_v49  ;;  %v3198_v38 = vor.u32 %v3197_v44, %v3194_v41  ;;  %v2510_v19 = vadd.f32 %v7922_v31, %v9866_v40  ;;  %v10013_v63 = vpop.f32.mrb[174].mxu0  ;;  %7730 = vmatpush3.bf16.msra.mxu0 %v8262_v36  ;;  %v3445_v21 = vld [vmem:[#allocation2 + $0x50] sm:$0xf8]  ;;  %v3446_v51 = vld [vmem:[#allocation2 + $0x58] sm:$0xf] }
 0x25c   : > { %v3527_v47 = vor.u32 %v3526_v26, %v3523_v35  ;;  %v2502_v15 = vadd.f32 %v2501_v16, %v9852_v9  ;;  %v2555_v22 = vmax.f32 %v2507_v25, 0.0  ;;  %v2801_v61 = vshrl.u32 %v2707_v53, 16  ;;  %v10020_v39 = vpop.f32.mrb[175].mxu0  ;;  %7731 = vmatprep.subr.bf16.mxu0 %v8264_v1  ;;  %v2709_v7 = vld [vmem:[#allocation2 + $0x50] sm:$0xf8] }
 0x25d   : > { %v3535_v49 = vor.u32 %v3534_v55, %v3531_v42  ;;  %v2553_v32 = vmax.f32 %v2499_v12, 0.0  ;;  %v3199_v48 = vsel %vm307_vm2, %v3190_v52, %v3198_v38  ;;  %v2556_v40 = vmax.f32 %v2510_v19, 0.0  ;;  %v8267_v38 = vld [vmem:[%s10973_s3 + $0x1b8] sm:$0xff]   ;;  %v10057_v54 = vld [vmem:[#allocation2 + $0x60] sm:$0xf0] }
 0x25e   : > { %v2554_v58 = vmax.f32 %v2502_v15, 0.0  ;;  %v2804_v9 = vshll.u32 %v2707_v53, 16  ;;  %5703 = vmatmul.mubr.bf16.gmra.mrb[184].mxu0 %v3199_v48  ;;  %v2803_v31 = vrot.slane %v2801_v61, 3  ;;  %v2809_v11 = vshrl.u32 %v9979_v43, 16  ;;  %v8266_v53 = vld [vmem:[%s10973_s3 + $0x1f8] sm:$0xff]  }
 0x25f   : > { %v3536_v50 = vsel %vm2731_vm7, %v3527_v47, %v3535_v49  ;;  %v2812_v29 = vshll.u32 %v9979_v43, 16  ;;  %v2615_v2 = vpack.c.bf16 %v2556_v40, %v2555_v22  ;;  %v3084_v45 = vrot.slane %v10018_v6, 4  ;;  %7732 = vmatpush3.bf16.msra.mxu0 %v8265_v17 }
 0x260   : > { %5710 = vmatprep.mubr.bf16.mxu0 %v3536_v50  ;;  %v2614_v16 = vpack.c.bf16 %v2554_v58, %v2553_v32  ;;  %v2806_v5 = vrot.slane %v2804_v9, 4  ;;  %v2811_v14 = vrot.slane %v2809_v11, 3  ;;  %v3085_v46 = vrot.slane %v10023_v57, 4  ;;  %7733 = vmatprep.subr.bf16.mxu0 %v8266_v53  ;;  %v2712_v50 = vld [vmem:[#allocation2 + $0x68] sm:$0xf] }
 0x261   : > { %v2814_v28 = vrot.slane %v2812_v29, 4  ;;  %v3201_v60 = vshrl.u32 %v9945_v4, 16  ;;  %v2647_v43 = vrot.slane %v2615_v2, 4  ;;  %v3204_v62 = vshll.u32 %v9945_v4, 16  ;;  %v3137_v2 = vld [vmem:[#allocation2 + $0x48] sm:$0x1f] }
 0x262   : > { %v2646_v30 = vrot.slane %v2614_v16, 4  ;;  %v2807_v0 = vor.u32 %v2806_v5, %v2803_v31  ;;  %v3086_v59 = vsel %vm3068_vm6, %v3084_v45, %v3085_v46  ;;  %v3209_v41 = vshrl.u32 %v3136_v13, 16 }
 0x263   : > { %v2815_v3 = vor.u32 %v2814_v28, %v2811_v14  ;;  %v3203_v27 = vrot.slane %v3201_v60, 4  ;;  %2693 = vst [vmem:[#allocation2 + $0xe8] ss:$-4 sps:$4 sm:$0xff] %v2647_v43   ;;  %v3206_v56 = vrot.slane %v3204_v62, 5  ;;  %v3212_v18 = vshll.u32 %v3136_v13, 16  ;;  %7734 = vmatpush3.bf16.msra.mxu0 %v8267_v38 }
 0x264   : > { %2691 = vst [vmem:[#allocation2 + $0xd8] ss:$-4 sps:$4 sm:$0xff] %v2646_v30   ;;  %v3538_v34 = vshrl.u32 %v3445_v21, 16  ;;  %v3541_v52 = vshll.u32 %v3445_v21, 16  ;;  %v3211_v4 = vrot.slane %v3209_v41, 4  ;;  %v3546_v35 = vshrl.u32 %v3446_v51, 16 }
 0x265   : > { %v2816_v44 = vsel %vm2731_vm7, %v2807_v0, %v2815_v3  ;;  %v3549_v26 = vshll.u32 %v3446_v51, 16  ;;  %v3207_v42 = vor.u32 %v3206_v56, %v3203_v27  ;;  %v3214_v55 = vrot.slane %v3212_v18, 5  ;;  %v3447_v14 = vld [vmem:[#allocation2 + $0x60] sm:$0xf8]  ;;  %v3448_v43 = vld [vmem:[#allocation2 + $0x68] sm:$0xf] }
 0x266   : > { %5558 = vmatmul.mubr.bf16.gmra.mrb[128].mxu1 %v2816_v44  ;;  %v3540_v25 = vrot.slane %v3538_v34, 3  ;;  %v3543_v12 = vrot.slane %v3541_v52, 4  ;;  %v3548_v47 = vrot.slane %v3546_v35, 3  ;;  %v2523_v15 = vadd.f32 %v10002_v10, %v9882_v33  ;;  %v2711_v27 = vld [vmem:[#allocation2 + $0x60] sm:$0xf8] }
 0x267   : > { %5565 = vmatprep.mubr.bf16.mxu1 %v3086_v59  ;;  %v3551_v19 = vrot.slane %v3549_v26, 4  ;;  %v2515_v36 = vadd.f32 %v10006_v24, %v9871_v8  ;;  %v3215_v49 = vor.u32 %v3214_v55, %v3211_v4  ;;  %v2526_v32 = vadd.f32 %v10013_v63, %v9885_v37  ;;  %v10068_v35 = vld [vmem:[#allocation2 + $0x70] sm:$0xf0] }
 0x268   : > { %v3544_v22 = vor.u32 %v3543_v12, %v3540_v25  ;;  %v2518_v61 = vadd.f32 %v10020_v39, %v9874_v23  ;;  %v2559_v40 = vmax.f32 %v2523_v15, 0.0  ;;  %v2818_v9 = vshrl.u32 %v2709_v7, 16  ;;  %v2714_v25 = vld [vmem:[#allocation2 + $0x78] sm:$0xf] }
 0x269   : > { %v3552_v48 = vor.u32 %v3551_v19, %v3548_v47  ;;  %v2557_v58 = vmax.f32 %v2515_v36, 0.0  ;;  %v3216_v33 = vsel %vm307_vm2, %v3207_v42, %v3215_v49  ;;  %v2560_v10 = vmax.f32 %v2526_v32, 0.0 }
 0x26a   : > { %v2558_v8 = vmax.f32 %v2518_v61, 0.0  ;;  %v2821_v24 = vshll.u32 %v2709_v7, 16  ;;  %5711 = vmatmul.mubr.bf16.gmra.mrb[188].mxu0 %v3216_v33  ;;  %v2820_v37 = vrot.slane %v2818_v9, 3  ;;  %v2826_v63 = vshrl.u32 %v10023_v57, 16 }
 0x26b   : > { %v3553_v31 = vsel %vm2731_vm7, %v3544_v22, %v3552_v48  ;;  %v2829_v23 = vshll.u32 %v10023_v57, 16  ;;  %v2617_v39 = vpack.c.bf16 %v2560_v10, %v2559_v40  ;;  %v3087_v1 = vrot.slane %v10057_v54, 4  ;;  %v3138_v22 = vld [vmem:[#allocation2 + $0x58] sm:$0x1f] }
 0x26c   : > { %5718 = vmatprep.mubr.bf16.mxu0 %v3553_v31  ;;  %v2616_v11 = vpack.c.bf16 %v2558_v8, %v2557_v58  ;;  %v2823_v29 = vrot.slane %v2821_v24, 4  ;;  %v2828_v16 = vrot.slane %v2826_v63, 3  ;;  %v3088_v45 = vrot.slane %v2712_v50, 4  ;;  %v3449_v58 = vld [vmem:[#allocation2 + $0x70] sm:$0xf8] }
 0x26d   : > { %v2831_v5 = vrot.slane %v2829_v23, 4  ;;  %v3218_v13 = vshrl.u32 %v9976_v20, 16  ;;  %v2649_v28 = vrot.slane %v2617_v39, 4  ;;  %v3221_v21 = vshll.u32 %v9976_v20, 16  ;;  %v3450_v24 = vld [vmem:[#allocation2 + $0x78] sm:$0xf] }
 0x26e   : > { %v2648_v46 = vrot.slane %v2616_v11, 4  ;;  %v2824_v60 = vor.u32 %v2823_v29, %v2820_v37  ;;  %v3089_v30 = vsel %vm3068_vm6, %v3087_v1, %v3088_v45  ;;  %v3226_v62 = vshrl.u32 %v3137_v2, 16  ;;  %v2713_v1 = vld [vmem:[#allocation2 + $0x70] sm:$0xf8] }
 0x26f   : > { %v2832_v57 = vor.u32 %v2831_v5, %v2828_v16  ;;  %v3220_v0 = vrot.slane %v3218_v13, 4  ;;  %2697 = vst [vmem:[#allocation2 + $0x108] ss:$-4 sps:$4 sm:$0xff] %v2649_v28   ;;  %v3223_v51 = vrot.slane %v3221_v21, 5  ;;  %v3229_v17 = vshll.u32 %v3137_v2, 16 }
 0x270   : > { %2695 = vst [vmem:[#allocation2 + $0xf8] ss:$-4 sps:$4 sm:$0xff] %v2648_v46   ;;  %v3555_v3 = vshrl.u32 %v3447_v14, 16  ;;  %v3558_v59 = vshll.u32 %v3447_v14, 16  ;;  %v3228_v56 = vrot.slane %v3226_v62, 4  ;;  %v3563_v18 = vshrl.u32 %v3448_v43, 16 }
 0x271   : > { %v2833_v41 = vsel %vm2731_vm7, %v2824_v60, %v2832_v57  ;;  %v3566_v34 = vshll.u32 %v3448_v43, 16  ;;  %v3224_v20 = vor.u32 %v3223_v51, %v3220_v0  ;;  %v3231_v52 = vrot.slane %v3229_v17, 5  ;;  %v10077_v46 = vld [vmem:[#allocation2 + $0x80] sm:$0xf0] }
 0x272   : > { %5566 = vmatmul.mubr.bf16.gmra.mrb[132].mxu1 %v2833_v41  ;;  %v3557_v44 = vrot.slane %v3555_v3, 3  ;;  %v3560_v4 = vrot.slane %v3558_v59, 4  ;;  %v3565_v26 = vrot.slane %v3563_v18, 3  ;;  %v2835_v42 = vshrl.u32 %v2711_v27, 16  ;;  %v3139_v3 = vld [vmem:[#allocation2 + $0x68] sm:$0x1f] }
 0x273   : > { %5573 = vmatprep.mubr.bf16.mxu1 %v3089_v30  ;;  %v3568_v53 = vrot.slane %v3566_v34, 4  ;;  %v2838_v55 = vshll.u32 %v2711_v27, 16  ;;  %v3232_v12 = vor.u32 %v3231_v52, %v3228_v56  ;;  %v2843_v38 = vshrl.u32 %v2712_v50, 16  ;;  %v2716_v30 = vld [vmem:[#allocation2 + $0x88] sm:$0xf] }
 0x274   : > { %v3561_v7 = vor.u32 %v3560_v4, %v3557_v44  ;;  %v2846_v47 = vshll.u32 %v2712_v50, 16  ;;  %v2837_v15 = vrot.slane %v2835_v42, 3  ;;  %v3090_v49 = vrot.slane %v10068_v35, 4  ;;  %v3451_v44 = vld [vmem:[#allocation2 + $0x80] sm:$0xf8] }
 0x275   : > { %v3569_v19 = vor.u32 %v3568_v53, %v3565_v26  ;;  %v2840_v36 = vrot.slane %v2838_v55, 4  ;;  %v3233_v32 = vsel %vm307_vm2, %v3224_v20, %v3232_v12  ;;  %v2845_v61 = vrot.slane %v2843_v38, 3  ;;  %v3452_v55 = vld [vmem:[#allocation2 + $0x88] sm:$0xf] }
 0x276   : > { %v2848_v48 = vrot.slane %v2846_v47, 4  ;;  %v3091_v40 = vrot.slane %v2714_v25, 4  ;;  %5719 = vmatmul.mubr.bf16.gmra.mrb[192].mxu0 %v3233_v32  ;;  %v3235_v10 = vshrl.u32 %v10018_v6, 16  ;;  %v3238_v8 = vshll.u32 %v10018_v6, 16  ;;  %v2715_v47 = vld [vmem:[#allocation2 + $0x80] sm:$0xf8] }
 0x277   : > { %v3570_v9 = vsel %vm2731_vm7, %v3561_v7, %v3569_v19  ;;  %v2841_v33 = vor.u32 %v2840_v36, %v2837_v15  ;;  %v3243_v37 = vshrl.u32 %v3138_v22, 16  ;;  %v3246_v63 = vshll.u32 %v3138_v22, 16 }
 0x278   : > { %5726 = vmatprep.mubr.bf16.mxu0 %v3570_v9  ;;  %v2849_v50 = vor.u32 %v2848_v48, %v2845_v61  ;;  %v3092_v31 = vsel %vm3068_vm6, %v3090_v49, %v3091_v40  ;;  %v3237_v23 = vrot.slane %v3235_v10, 4  ;;  %v3240_v39 = vrot.slane %v3238_v8, 5 }
 0x279   : > { %v3572_v11 = vshrl.u32 %v3449_v58, 16  ;;  %v3575_v29 = vshll.u32 %v3449_v58, 16  ;;  %v3245_v16 = vrot.slane %v3243_v37, 4  ;;  %v3248_v5 = vrot.slane %v3246_v63, 5 }
 0x27a   : > { %v2850_v2 = vsel %vm2731_vm7, %v2841_v33, %v2849_v50  ;;  %v3580_v45 = vshrl.u32 %v3450_v24, 16  ;;  %v3241_v13 = vor.u32 %v3240_v39, %v3237_v23  ;;  %v3583_v28 = vshll.u32 %v3450_v24, 16  ;;  %v10086_v33 = vld [vmem:[#allocation2 + $0x90] sm:$0xf0] }
 0x27b   : > { %5574 = vmatmul.mubr.bf16.gmra.mrb[136].mxu1 %v2850_v2  ;;  %v3574_v6 = vrot.slane %v3572_v11, 3  ;;  %v3577_v14 = vrot.slane %v3575_v29, 4  ;;  %v3249_v60 = vor.u32 %v3248_v5, %v3245_v16  ;;  %v2852_v43 = vshrl.u32 %v2713_v1, 16  ;;  %v3140_v11 = vld [vmem:[#allocation2 + $0x78] sm:$0x1f] }
 0x27c   : > { %5581 = vmatprep.mubr.bf16.mxu1 %v3092_v31  ;;  %v3582_v21 = vrot.slane %v3580_v45, 3  ;;  %v2855_v57 = vshll.u32 %v2713_v1, 16  ;;  %v3585_v62 = vrot.slane %v3583_v28, 4  ;;  %v2860_v51 = vshrl.u32 %v2714_v25, 16  ;;  %v2718_v31 = vld [vmem:[#allocation2 + $0x98] sm:$0xf] }
 0x27d   : > { %v3578_v0 = vor.u32 %v3577_v14, %v3574_v6  ;;  %v2863_v17 = vshll.u32 %v2714_v25, 16  ;;  %v3250_v59 = vsel %vm307_vm2, %v3241_v13, %v3249_v60  ;;  %v2854_v27 = vrot.slane %v2852_v43, 3  ;;  %v3453_v14 = vld [vmem:[#allocation2 + $0x90] sm:$0xf8] }
 0x27e   : > { %v2857_v41 = vrot.slane %v2855_v57, 4  ;;  %v3093_v56 = vrot.slane %v10077_v46, 4  ;;  %5727 = vmatmul.mubr.bf16.gmra.mrb[196].mxu0 %v3250_v59  ;;  %v3586_v18 = vor.u32 %v3585_v62, %v3582_v21  ;;  %v2862_v34 = vrot.slane %v2860_v51, 3  ;;  %v3454_v57 = vld [vmem:[#allocation2 + $0x98] sm:$0xf] }
 0x27f   : > { %v2865_v20 = vrot.slane %v2863_v17, 4  ;;  %v3094_v52 = vrot.slane %v2716_v30, 4  ;;  %v3252_v26 = vshrl.u32 %v10057_v54, 16  ;;  %v3255_v53 = vshll.u32 %v10057_v54, 16  ;;  %v2717_v17 = vld [vmem:[#allocation2 + $0x90] sm:$0xf8] }
 0x280   : > { %v2858_v4 = vor.u32 %v2857_v41, %v2854_v27  ;;  %v3260_v42 = vshrl.u32 %v3139_v3, 16  ;;  %v3587_v25 = vsel %vm2731_vm7, %v3578_v0, %v3586_v18  ;;  %v3263_v38 = vshll.u32 %v3139_v3, 16 }
 0x281   : > { %v2866_v12 = vor.u32 %v2865_v20, %v2862_v34  ;;  %v3095_v7 = vsel %vm3068_vm6, %v3093_v56, %v3094_v52  ;;  %5734 = vmatprep.mubr.bf16.mxu0 %v3587_v25  ;;  %v3254_v19 = vrot.slane %v3252_v26, 4  ;;  %v3257_v15 = vrot.slane %v3255_v53, 5  ;;  %v10095_v26 = vld [vmem:[#allocation2 + $0xa0] sm:$0xf0] }
 0x282   : > { %v3262_v36 = vrot.slane %v3260_v42, 4  ;;  %v3589_v49 = vshrl.u32 %v3451_v44, 16  ;;  %v3265_v32 = vrot.slane %v3263_v38, 5  ;;  %v3592_v61 = vshll.u32 %v3451_v44, 16 }
 0x283   : > { %v2867_v22 = vsel %vm2731_vm7, %v2858_v4, %v2866_v12  ;;  %v3597_v48 = vshrl.u32 %v3452_v55, 16  ;;  %v3258_v54 = vor.u32 %v3257_v15, %v3254_v19  ;;  %v3600_v58 = vshll.u32 %v3452_v55, 16  ;;  %v2720_v12 = vld [vmem:[#allocation2 + $0xa8] sm:$0xf] }
 0x284   : > { %5582 = vmatmul.mubr.bf16.gmra.mrb[140].mxu1 %v2867_v22  ;;  %v3591_v40 = vrot.slane %v3589_v49, 3  ;;  %v2869_v9 = vshrl.u32 %v2715_v47, 16  ;;  %v3266_v10 = vor.u32 %v3265_v32, %v3262_v36  ;;  %v3594_v8 = vrot.slane %v3592_v61, 4  ;;  %v3141_v15 = vld [vmem:[#allocation2 + $0x88] sm:$0x1f] }
 0x285   : > { %5589 = vmatprep.mubr.bf16.mxu1 %v3095_v7  ;;  %v3599_v24 = vrot.slane %v3597_v48, 3  ;;  %v2872_v50 = vshll.u32 %v2715_v47, 16  ;;  %v3602_v37 = vrot.slane %v3600_v58, 4  ;;  %v2877_v23 = vshrl.u32 %v2716_v30, 16  ;;  %v3455_v58 = vld [vmem:[#allocation2 + $0xa0] sm:$0xf8] }
 0x286   : > { %v2871_v63 = vrot.slane %v2869_v9, 3  ;;  %v2880_v39 = vshll.u32 %v2716_v30, 16  ;;  %v3267_v29 = vsel %vm307_vm2, %v3258_v54, %v3266_v10  ;;  %v3595_v1 = vor.u32 %v3594_v8, %v3591_v40 }
 0x287   : > { %v2874_v2 = vrot.slane %v2872_v50, 4  ;;  %v3096_v16 = vrot.slane %v10086_v33, 4  ;;  %5735 = vmatmul.mubr.bf16.gmra.mrb[200].mxu0 %v3267_v29  ;;  %v3603_v5 = vor.u32 %v3602_v37, %v3599_v24  ;;  %v2879_v45 = vrot.slane %v2877_v23, 3  ;;  %v3456_v50 = vld [vmem:[#allocation2 + $0xa8] sm:$0xf] }
 0x288   : > { %v2882_v13 = vrot.slane %v2880_v39, 4  ;;  %v3097_v6 = vrot.slane %v2718_v31, 4  ;;  %v3269_v60 = vshrl.u32 %v10068_v35, 16  ;;  %v3272_v21 = vshll.u32 %v10068_v35, 16  ;;  %v2719_v39 = vld [vmem:[#allocation2 + $0xa0] sm:$0xf8] }
 0x289   : > { %v2875_v28 = vor.u32 %v2874_v2, %v2871_v63  ;;  %v3277_v43 = vshrl.u32 %v3140_v11, 16  ;;  %v3604_v30 = vsel %vm2731_vm7, %v3595_v1, %v3603_v5  ;;  %v3280_v51 = vshll.u32 %v3140_v11, 16 }
 0x28a   : > { %v2883_v0 = vor.u32 %v2882_v13, %v2879_v45  ;;  %v3098_v62 = vsel %vm3068_vm6, %v3096_v16, %v3097_v6  ;;  %5742 = vmatprep.mubr.bf16.mxu0 %v3604_v30  ;;  %v3271_v3 = vrot.slane %v3269_v60, 4  ;;  %v3274_v59 = vrot.slane %v3272_v21, 5  ;;  %v10104_v60 = vld [vmem:[#allocation2 + $0xb0] sm:$0xf0] }
 0x28b   : > { %v3279_v27 = vrot.slane %v3277_v43, 4  ;;  %v3606_v41 = vshrl.u32 %v3453_v14, 16  ;;  %v3282_v18 = vrot.slane %v3280_v51, 5  ;;  %v3609_v34 = vshll.u32 %v3453_v14, 16 }
 0x28c   : > { %v2884_v56 = vsel %vm2731_vm7, %v2875_v28, %v2883_v0  ;;  %v3614_v20 = vshrl.u32 %v3454_v57, 16  ;;  %v3275_v35 = vor.u32 %v3274_v59, %v3271_v3  ;;  %v3617_v44 = vshll.u32 %v3454_v57, 16  ;;  %v2722_v0 = vld [vmem:[#allocation2 + $0xb8] sm:$0xf] }
 0x28d   : > { %5590 = vmatmul.mubr.bf16.gmra.mrb[144].mxu1 %v2884_v56  ;;  %v3608_v52 = vrot.slane %v3606_v41, 3  ;;  %v2886_v4 = vshrl.u32 %v2717_v17, 16  ;;  %v3283_v53 = vor.u32 %v3282_v18, %v3279_v27  ;;  %v3611_v42 = vrot.slane %v3609_v34, 4  ;;  %v3142_v59 = vld [vmem:[#allocation2 + $0x98] sm:$0x1f] }
 0x28e   : > { %5597 = vmatprep.mubr.bf16.mxu1 %v3098_v62  ;;  %v3616_v55 = vrot.slane %v3614_v20, 3  ;;  %v2889_v25 = vshll.u32 %v2717_v17, 16  ;;  %v3619_v7 = vrot.slane %v3617_v44, 4  ;;  %v2894_v47 = vshrl.u32 %v2718_v31, 16  ;;  %v3457_v44 = vld [vmem:[#allocation2 + $0xb0] sm:$0xf8] }
 0x28f   : > { %v2888_v38 = vrot.slane %v2886_v4, 3  ;;  %v2897_v19 = vshll.u32 %v2718_v31, 16  ;;  %v3284_v36 = vsel %vm307_vm2, %v3275_v35, %v3283_v53  ;;  %v3612_v49 = vor.u32 %v3611_v42, %v3608_v52 }
 0x290   : > { %v2891_v22 = vrot.slane %v2889_v25, 4  ;;  %v3099_v32 = vrot.slane %v10095_v26, 4  ;;  %5743 = vmatmul.mubr.bf16.gmra.mrb[204].mxu0 %v3284_v36  ;;  %v3620_v61 = vor.u32 %v3619_v7, %v3616_v55  ;;  %v2896_v48 = vrot.slane %v2894_v47, 3  ;;  %v3458_v25 = vld [vmem:[#allocation2 + $0xb8] sm:$0xf] }
 0x291   : > { %v2899_v54 = vrot.slane %v2897_v19, 4  ;;  %v3100_v40 = vrot.slane %v2720_v12, 4  ;;  %v3286_v10 = vshrl.u32 %v10077_v46, 16  ;;  %v3289_v8 = vshll.u32 %v10077_v46, 16  ;;  %v2721_v19 = vld [vmem:[#allocation2 + $0xb0] sm:$0xf8] }
 0x292   : > { %v2892_v9 = vor.u32 %v2891_v22, %v2888_v38  ;;  %v3294_v24 = vshrl.u32 %v3141_v15, 16  ;;  %v3621_v31 = vsel %vm2731_vm7, %v3612_v49, %v3620_v61  ;;  %v3297_v23 = vshll.u32 %v3141_v15, 16 }
 0x293   : > { %v2900_v37 = vor.u32 %v2899_v54, %v2896_v48  ;;  %v3101_v63 = vsel %vm3068_vm6, %v3099_v32, %v3100_v40  ;;  %5750 = vmatprep.mubr.bf16.mxu0 %v3621_v31  ;;  %v3288_v11 = vrot.slane %v3286_v10, 4  ;;  %v3291_v29 = vrot.slane %v3289_v8, 5  ;;  %v10113_v10 = vld [vmem:[#allocation2 + $0xc0] sm:$0xf0] }
 0x294   : > { %v3296_v1 = vrot.slane %v3294_v24, 4  ;;  %v3623_v2 = vshrl.u32 %v3455_v58, 16  ;;  %v3299_v5 = vrot.slane %v3297_v23, 5  ;;  %v3626_v45 = vshll.u32 %v3455_v58, 16 }
 0x295   : > { %v2901_v16 = vsel %vm2731_vm7, %v2892_v9, %v2900_v37  ;;  %v3631_v13 = vshrl.u32 %v3456_v50, 16  ;;  %v3292_v46 = vor.u32 %v3291_v29, %v3288_v11  ;;  %v3634_v14 = vshll.u32 %v3456_v50, 16  ;;  %v2724_v37 = vld [vmem:[#allocation2 + $0xc8] sm:$0xf] }
 0x296   : > { %5598 = vmatmul.mubr.bf16.gmra.mrb[148].mxu1 %v2901_v16  ;;  %v3625_v6 = vrot.slane %v3623_v2, 3  ;;  %v2903_v28 = vshrl.u32 %v2719_v39, 16  ;;  %v3300_v21 = vor.u32 %v3299_v5, %v3296_v1  ;;  %v3628_v43 = vrot.slane %v3626_v45, 4  ;;  %v3143_v29 = vld [vmem:[#allocation2 + $0xa8] sm:$0x1f] }
 0x297   : > { %5605 = vmatprep.mubr.bf16.mxu1 %v3101_v63  ;;  %v3633_v57 = vrot.slane %v3631_v13, 3  ;;  %v2906_v30 = vshll.u32 %v2719_v39, 16  ;;  %v3636_v62 = vrot.slane %v3634_v14, 4  ;;  %v2911_v17 = vshrl.u32 %v2720_v12, 16  ;;  %v3459_v14 = vld [vmem:[#allocation2 + $0xc0] sm:$0xf8] }
 0x298   : > { %v2905_v51 = vrot.slane %v2903_v28, 3  ;;  %v2914_v3 = vshll.u32 %v2720_v12, 16  ;;  %v3301_v27 = vsel %vm307_vm2, %v3292_v46, %v3300_v21  ;;  %v3629_v41 = vor.u32 %v3628_v43, %v3625_v6 }
 0x299   : > { %v2908_v56 = vrot.slane %v2906_v30, 4  ;;  %v3102_v18 = vrot.slane %v10104_v60, 4  ;;  %5751 = vmatmul.mubr.bf16.gmra.mrb[208].mxu0 %v3301_v27  ;;  %v3637_v34 = vor.u32 %v3636_v62, %v3633_v57  ;;  %v2913_v20 = vrot.slane %v2911_v17, 3  ;;  %v3460_v30 = vld [vmem:[#allocation2 + $0xc8] sm:$0xf] }
 0x29a   : > { %v2916_v35 = vrot.slane %v2914_v3, 4  ;;  %v3103_v52 = vrot.slane %v2722_v0, 4  ;;  %v3303_v53 = vshrl.u32 %v10086_v33, 16  ;;  %v3306_v42 = vshll.u32 %v10086_v33, 16  ;;  %v2723_v3 = vld [vmem:[#allocation2 + $0xc0] sm:$0xf8] }
 0x29b   : > { %v2909_v4 = vor.u32 %v2908_v56, %v2905_v51  ;;  %v3311_v55 = vshrl.u32 %v3142_v59, 16  ;;  %v3638_v12 = vsel %vm2731_vm7, %v3629_v41, %v3637_v34  ;;  %v3314_v47 = vshll.u32 %v3142_v59, 16  ;;  %v10121_v59 = vpop.f32.mrb[112].mxu1 }
 0x29c   : > { %v2917_v7 = vor.u32 %v2916_v35, %v2913_v20  ;;  %v3104_v38 = vsel %vm3068_vm6, %v3102_v18, %v3103_v52  ;;  %5758 = vmatprep.mubr.bf16.mxu0 %v3638_v12  ;;  %v3305_v15 = vrot.slane %v3303_v53, 4  ;;  %v3308_v36 = vrot.slane %v3306_v42, 5  ;;  %v10124_v42 = vld [vmem:[#allocation2 + $0xd0] sm:$0xf0] }
 0x29d   : > { %v3313_v49 = vrot.slane %v3311_v55, 4  ;;  %v3640_v22 = vshrl.u32 %v3457_v44, 16  ;;  %v3316_v61 = vrot.slane %v3314_v47, 5  ;;  %v3643_v48 = vshll.u32 %v3457_v44, 16 }
 0x29e   : > { %v2918_v32 = vsel %vm2731_vm7, %v2909_v4, %v2917_v7  ;;  %v3648_v54 = vshrl.u32 %v3458_v25, 16  ;;  %v3309_v33 = vor.u32 %v3308_v36, %v3305_v15  ;;  %v3651_v58 = vshll.u32 %v3458_v25, 16 }
 0x29f   : > { %5606 = vmatmul.mubr.bf16.gmra.mrb[152].mxu1 %v2918_v32  ;;  %v3642_v40 = vrot.slane %v3640_v22, 3  ;;  %v2920_v9 = vshrl.u32 %v2721_v19, 16  ;;  %v3317_v8 = vor.u32 %v3316_v61, %v3313_v49  ;;  %v3645_v24 = vrot.slane %v3643_v48, 4  ;;  %v3144_v49 = vld [vmem:[#allocation2 + $0xb8] sm:$0x1f] }
 0x2a0   : > { %5613 = vmatprep.mubr.bf16.mxu1 %v3104_v38  ;;  %v3650_v50 = vrot.slane %v3648_v54, 3  ;;  %v2923_v31 = vshll.u32 %v2721_v19, 16  ;;  %v3653_v63 = vrot.slane %v3651_v58, 4  ;;  %v2928_v39 = vshrl.u32 %v2722_v0, 16  ;;  %v2726_v38 = vld [vmem:[#allocation2 + $0xd8] sm:$0xf] }
 0x2a1   : > { %v2922_v23 = vrot.slane %v2920_v9, 3  ;;  %v2931_v11 = vshll.u32 %v2722_v0, 16  ;;  %v3318_v1 = vsel %vm307_vm2, %v3309_v33, %v3317_v8  ;;  %v3646_v2 = vor.u32 %v3645_v24, %v3642_v40  ;;  %v10128_v54 = vpop.f32.mrb[113].mxu1  ;;  %v3461_v8 = vld [vmem:[#allocation2 + $0xd0] sm:$0xf8] }
 0x2a2   : > { %v2925_v16 = vrot.slane %v2923_v31, 4  ;;  %v3105_v5 = vrot.slane %v10113_v10, 4  ;;  %5759 = vmatmul.mubr.bf16.gmra.mrb[212].mxu0 %v3318_v1  ;;  %v3654_v45 = vor.u32 %v3653_v63, %v3650_v50  ;;  %v2930_v13 = vrot.slane %v2928_v39, 3  ;;  %v10130_v24 = vpop.f32.mrb[114].mxu1 }
 0x2a3   : > { %v2933_v46 = vrot.slane %v2931_v11, 4  ;;  %v3106_v6 = vrot.slane %v2724_v37, 4  ;;  %v3320_v21 = vshrl.u32 %v10095_v26, 16  ;;  %v3323_v43 = vshll.u32 %v10095_v26, 16  ;;  %v10134_v39 = vpop.f32.mrb[115].mxu1 }
 0x2a4   : > { %v2926_v28 = vor.u32 %v2925_v16, %v2922_v23  ;;  %v3328_v57 = vshrl.u32 %v3143_v29, 16  ;;  %v3655_v0 = vsel %vm2731_vm7, %v3646_v2, %v3654_v45  ;;  %v3331_v17 = vshll.u32 %v3143_v29, 16  ;;  %v3462_v23 = vld [vmem:[#allocation2 + $0xd8] sm:$0xf]  ;;  %v2725_v16 = vld [vmem:[#allocation2 + $0xd0] sm:$0xf8] }
 0x2a5   : > { %v2934_v62 = vor.u32 %v2933_v46, %v2930_v13  ;;  %v3107_v51 = vsel %vm3068_vm6, %v3105_v5, %v3106_v6  ;;  %5766 = vmatprep.mubr.bf16.mxu0 %v3655_v0  ;;  %v3322_v27 = vrot.slane %v3320_v21, 4  ;;  %v3325_v41 = vrot.slane %v3323_v43, 5  ;;  %v10139_v0 = vld [vmem:[#allocation2 + $0xe0] sm:$0xf0] }
 0x2a6   : > { %v3330_v56 = vrot.slane %v3328_v57, 4  ;;  %v3657_v18 = vshrl.u32 %v3459_v14, 16  ;;  %v3333_v20 = vrot.slane %v3331_v17, 5  ;;  %v3660_v26 = vshll.u32 %v3459_v14, 16 }
 0x2a7   : > { %v2935_v34 = vsel %vm2731_vm7, %v2926_v28, %v2934_v62  ;;  %v3665_v35 = vshrl.u32 %v3460_v30, 16  ;;  %v3326_v52 = vor.u32 %v3325_v41, %v3322_v27  ;;  %v3668_v4 = vshll.u32 %v3460_v30, 16  ;;  %v2728_v27 = vld [vmem:[#allocation2 + $0xe8] sm:$0xf] }
 0x2a8   : > { %5614 = vmatmul.mubr.bf16.gmra.mrb[156].mxu1 %v2935_v34  ;;  %v3659_v44 = vrot.slane %v3657_v18, 3  ;;  %v2937_v53 = vshrl.u32 %v2723_v3, 16  ;;  %v3334_v55 = vor.u32 %v3333_v20, %v3330_v56  ;;  %v3662_v25 = vrot.slane %v3660_v26, 4  ;;  %v3145_v20 = vld [vmem:[#allocation2 + $0xc8] sm:$0x1f] }
 0x2a9   : > { %5621 = vmatprep.mubr.bf16.mxu1 %v3107_v51  ;;  %v3667_v12 = vrot.slane %v3665_v35, 3  ;;  %v2940_v7 = vshll.u32 %v2723_v3, 16  ;;  %v3670_v47 = vrot.slane %v3668_v4, 4  ;;  %v2945_v15 = vshrl.u32 %v2724_v37, 16 }
 0x2aa   : > { %v2939_v19 = vrot.slane %v2937_v53, 3  ;;  %v2948_v36 = vshll.u32 %v2724_v37, 16  ;;  %v3335_v22 = vsel %vm307_vm2, %v3326_v52, %v3334_v55  ;;  %v3663_v32 = vor.u32 %v3662_v25, %v3659_v44 }
 0x2ab   : > { %v2942_v61 = vrot.slane %v2940_v7, 4  ;;  %v3108_v48 = vrot.slane %v10124_v42, 4  ;;  %5767 = vmatmul.mubr.bf16.gmra.mrb[216].mxu0 %v3335_v22  ;;  %v3671_v33 = vor.u32 %v3670_v47, %v3667_v12  ;;  %v2947_v40 = vrot.slane %v2945_v15, 3  ;;  %v3463_v12 = vld [vmem:[#allocation2 + $0xe0] sm:$0xf8] }
 0x2ac   : > { %v2950_v58 = vrot.slane %v2948_v36, 4  ;;  %v3109_v9 = vrot.slane %v2726_v38, 4  ;;  %v3337_v31 = vshrl.u32 %v10104_v60, 16  ;;  %v3340_v37 = vshll.u32 %v10104_v60, 16 }
 0x2ad   : > { %v2943_v50 = vor.u32 %v2942_v61, %v2939_v19  ;;  %v3345_v63 = vshrl.u32 %v3144_v49, 16  ;;  %v3672_v11 = vsel %vm2731_vm7, %v3663_v32, %v3671_v33  ;;  %v3348_v2 = vshll.u32 %v3144_v49, 16  ;;  %v2727_v61 = vld [vmem:[#allocation2 + $0xe0] sm:$0xf8] }
 0x2ae   : > { %v2951_v29 = vor.u32 %v2950_v58, %v2947_v40  ;;  %v3110_v1 = vsel %vm3068_vm6, %v3108_v48, %v3109_v9  ;;  %5774 = vmatprep.mubr.bf16.mxu0 %v3672_v11  ;;  %v3339_v5 = vrot.slane %v3337_v31, 4  ;;  %v3342_v45 = vrot.slane %v3340_v37, 5  ;;  %v10148_v11 = vld [vmem:[#allocation2 + $0xf0] sm:$0xf0] }
 0x2af   : > { %v3347_v13 = vrot.slane %v3345_v63, 4  ;;  %v3674_v46 = vshrl.u32 %v3461_v8, 16  ;;  %v3350_v14 = vrot.slane %v3348_v2, 5  ;;  %v3677_v60 = vshll.u32 %v3461_v8, 16 }
 0x2b0   : > { %v2952_v6 = vsel %vm2731_vm7, %v2943_v50, %v2951_v29  ;;  %v3682_v28 = vshrl.u32 %v3462_v23, 16  ;;  %v3343_v21 = vor.u32 %v3342_v45, %v3339_v5  ;;  %v3685_v57 = vshll.u32 %v3462_v23, 16  ;;  %v2730_v5 = vld [vmem:[#allocation2 + $0xf8] sm:$0xf] }
 0x2b1   : > { %5622 = vmatmul.mubr.bf16.gmra.mrb[160].mxu1 %v2952_v6  ;;  %v3676_v43 = vrot.slane %v3674_v46, 3  ;;  %v2954_v30 = vshrl.u32 %v2725_v16, 16  ;;  %v3351_v62 = vor.u32 %v3350_v14, %v3347_v13  ;;  %v3679_v51 = vrot.slane %v3677_v60, 4  ;;  %v3146_v14 = vld [vmem:[#allocation2 + $0xd8] sm:$0x1f] }
 0x2b2   : > { %5629 = vmatprep.mubr.bf16.mxu1 %v3110_v1  ;;  %v3684_v17 = vrot.slane %v3682_v28, 3  ;;  %v2957_v3 = vshll.u32 %v2725_v16, 16  ;;  %v3687_v41 = vrot.slane %v3685_v57, 4  ;;  %v2962_v18 = vshrl.u32 %v2726_v38, 16 }
 0x2b3   : > { %v2956_v56 = vrot.slane %v2954_v30, 3  ;;  %v2965_v34 = vshll.u32 %v2726_v38, 16  ;;  %v3352_v26 = vsel %vm307_vm2, %v3343_v21, %v3351_v62  ;;  %v3680_v35 = vor.u32 %v3679_v51, %v3676_v43  ;;  %v3464_v38 = vld [vmem:[#allocation2 + $0xe8] sm:$0xf] }
 0x2b4   : > { %v2959_v52 = vrot.slane %v2957_v3, 4  ;;  %v3111_v44 = vrot.slane %v10139_v0, 4  ;;  %5775 = vmatmul.mubr.bf16.gmra.mrb[220].mxu0 %v3352_v26  ;;  %v3688_v4 = vor.u32 %v3687_v41, %v3684_v17  ;;  %v2964_v53 = vrot.slane %v2962_v18, 3  ;;  %v3465_v17 = vld [vmem:[#allocation2 + $0xf0] sm:$0xf8] }
 0x2b5   : > { %v2967_v55 = vrot.slane %v2965_v34, 4  ;;  %v3112_v25 = vrot.slane %v2728_v27, 4  ;;  %v3354_v47 = vshrl.u32 %v10113_v10, 16  ;;  %v3357_v19 = vshll.u32 %v10113_v10, 16 }
 0x2b6   : > { %v2960_v7 = vor.u32 %v2959_v52, %v2956_v56  ;;  %v3362_v15 = vshrl.u32 %v3145_v20, 16  ;;  %v3689_v36 = vsel %vm2731_vm7, %v3680_v35, %v3688_v4  ;;  %v3365_v32 = vshll.u32 %v3145_v20, 16  ;;  %v2729_v52 = vld [vmem:[#allocation2 + $0xf0] sm:$0xf8] }
 0x2b7   : > { %v2968_v49 = vor.u32 %v2967_v55, %v2964_v53  ;;  %v3113_v22 = vsel %vm3068_vm6, %v3111_v44, %v3112_v25  ;;  %5782 = vmatprep.mubr.bf16.mxu0 %v3689_v36  ;;  %v3356_v48 = vrot.slane %v3354_v47, 4  ;;  %v3359_v33 = vrot.slane %v3357_v19, 5 }
 0x2b8   : > { %v3364_v40 = vrot.slane %v3362_v15, 4  ;;  %v3691_v58 = vshrl.u32 %v3463_v12, 16  ;;  %v3367_v8 = vrot.slane %v3365_v32, 5  ;;  %v3694_v50 = vshll.u32 %v3463_v12, 16 }
 0x2b9   : > { %v2969_v9 = vsel %vm2731_vm7, %v2960_v7, %v2968_v49  ;;  %v3699_v31 = vshrl.u32 %v3464_v38, 16  ;;  %v3360_v10 = vor.u32 %v3359_v33, %v3356_v48  ;;  %v3702_v63 = vshll.u32 %v3464_v38, 16 }
 0x2ba   : > { %5630 = vmatmul.mubr.bf16.gmra.mrb[164].mxu1 %v2969_v9  ;;  %v3693_v37 = vrot.slane %v3691_v58, 3  ;;  %v2971_v23 = vshrl.u32 %v2727_v61, 16  ;;  %v3368_v29 = vor.u32 %v3367_v8, %v3364_v40  ;;  %v3696_v1 = vrot.slane %v3694_v50, 4  ;;  %v3147_v58 = vld [vmem:[#allocation2 + $0xe8] sm:$0x1f] }
 0x2bb   : > { %5637 = vmatprep.mubr.bf16.mxu1 %v3113_v22  ;;  %v3701_v2 = vrot.slane %v3699_v31, 3  ;;  %v2974_v16 = vshll.u32 %v2727_v61, 16  ;;  %v3704_v45 = vrot.slane %v3702_v63, 4  ;;  %v2979_v46 = vshrl.u32 %v2728_v27, 16 }
 0x2bc   : > { %v2973_v13 = vrot.slane %v2971_v23, 3  ;;  %v2982_v6 = vshll.u32 %v2728_v27, 16  ;;  %v3369_v60 = vsel %vm307_vm2, %v3360_v10, %v3368_v29  ;;  %v3697_v28 = vor.u32 %v3696_v1, %v3693_v37  ;;  %v3466_v27 = vld [vmem:[#allocation2 + $0xf8] sm:$0xf]  ;;  %v3757_v10 = vld [vmem:[#allocation2 + $0x10] sm:$0xf0] }
 0x2bd   : > { %v2976_v21 = vrot.slane %v2974_v16, 4  ;;  %v3114_v43 = vrot.slane %v10148_v11, 4  ;;  %5783 = vmatmul.mubr.bf16.gmra.mrb[224].mxu0 %v3369_v60  ;;  %v3705_v57 = vor.u32 %v3704_v45, %v3701_v2  ;;  %v2981_v30 = vrot.slane %v2979_v46, 3  ;;  %v3869_v1 = vld [vmem:[#allocation2 + $0x18] sm:$0x1f] }
 0x2be   : > { %v2984_v62 = vrot.slane %v2982_v6, 4  ;;  %v3115_v51 = vrot.slane %v2730_v5, 4  ;;  %v3371_v41 = vshrl.u32 %v10124_v42, 16  ;;  %v3374_v56 = vshll.u32 %v10124_v42, 16  ;;  %v3467_v60 = vld [vmem:[#allocation2 + $0x100] sm:$0xf8] }
 0x2bf   : > { %v2977_v3 = vor.u32 %v2976_v21, %v2973_v13  ;;  %v3379_v18 = vshrl.u32 %v3146_v14, 16  ;;  %v3706_v34 = vsel %vm2731_vm7, %v3697_v28, %v3705_v57  ;;  %v3382_v35 = vshll.u32 %v3146_v14, 16 }
 0x2c0   : > { %v2985_v20 = vor.u32 %v2984_v62, %v2981_v30  ;;  %v3116_v26 = vsel %vm3068_vm6, %v3114_v43, %v3115_v51  ;;  %5790 = vmatprep.mubr.bf16.mxu0 %v3706_v34  ;;  %v3373_v44 = vrot.slane %v3371_v41, 4  ;;  %v3376_v4 = vrot.slane %v3374_v56, 5  ;;  %v3468_v30 = vld [vmem:[#allocation2 + $0x108] sm:$0xf] }
 0x2c1   : > { %v3381_v53 = vrot.slane %v3379_v18, 4  ;;  %v3708_v55 = vshrl.u32 %v3465_v17, 16  ;;  %v3384_v12 = vrot.slane %v3382_v35, 5  ;;  %v3711_v7 = vshll.u32 %v3465_v17, 16  ;;  %v3148_v35 = vld [vmem:[#allocation2 + $0xf8] sm:$0x1f] }
 0x2c2   : > { %v2986_v25 = vsel %vm2731_vm7, %v2977_v3, %v2985_v20  ;;  %v3716_v47 = vshrl.u32 %v3466_v27, 16  ;;  %v3377_v42 = vor.u32 %v3376_v4, %v3373_v44  ;;  %v3719_v15 = vshll.u32 %v3466_v27, 16 }
 0x2c3   : > { %5638 = vmatmul.mubr.bf16.gmra.mrb[168].mxu1 %v2986_v25  ;;  %v3710_v19 = vrot.slane %v3708_v55, 3  ;;  %v2988_v38 = vshrl.u32 %v2729_v52, 16  ;;  %v3385_v36 = vor.u32 %v3384_v12, %v3381_v53  ;;  %v3713_v49 = vrot.slane %v3711_v7, 4 }
 0x2c4   : > { %5645 = vmatprep.mubr.bf16.mxu1 %v3116_v26  ;;  %v3718_v22 = vrot.slane %v3716_v47, 3  ;;  %v2991_v32 = vshll.u32 %v2729_v52, 16  ;;  %v3721_v61 = vrot.slane %v3719_v15, 4  ;;  %v2996_v33 = vshrl.u32 %v2730_v5, 16  ;;  %v8291_v47 = vld [vmem:[#allocation2 + $0x18] sm:$0xf] }
 0x2c5   : > { %v2990_v48 = vrot.slane %v2988_v38, 3  ;;  %v2999_v40 = vshll.u32 %v2730_v5, 16  ;;  %v3386_v9 = vsel %vm307_vm2, %v3377_v42, %v3385_v36  ;;  %v3714_v8 = vor.u32 %v3713_v49, %v3710_v19  ;;  %v3758_v36 = vld [vmem:[#allocation2 + $0x20] sm:$0xf0] }
 0x2c6   : > { %v2993_v50 = vrot.slane %v2991_v32, 4  ;;  %v3388_v31 = vshrl.u32 %v10139_v0, 16  ;;  %5791 = vmatmul.mubr.bf16.gmra.mrb[228].mxu0 %v3386_v9  ;;  %v3722_v37 = vor.u32 %v3721_v61, %v3718_v22  ;;  %v2998_v63 = vrot.slane %v2996_v33, 3  ;;  %v4175_v33 = vld [vmem:[#allocation2 + $0x28] sm:$0xf] }
 0x2c7   : > { %v3001_v23 = vrot.slane %v2999_v40, 4  ;;  %v3391_v29 = vshll.u32 %v10139_v0, 16  ;;  %v3396_v45 = vshrl.u32 %v3147_v58, 16  ;;  %v3399_v13 = vshll.u32 %v3147_v58, 16 }
 0x2c8   : > { %v2994_v2 = vor.u32 %v2993_v50, %v2990_v48  ;;  %v3390_v16 = vrot.slane %v3388_v31, 4  ;;  %v3723_v5 = vsel %vm2731_vm7, %v3714_v8, %v3722_v37  ;;  %v3886_v14 = vshrl.u32 %v3757_v10, 16  ;;  %v3870_v48 = vld [vmem:[#allocation2 + $0x28] sm:$0x1f] }
 0x2c9   : > { %v3002_v46 = vor.u32 %v3001_v23, %v2998_v63  ;;  %v3393_v6 = vrot.slane %v3391_v29, 5  ;;  %5798 = vmatprep.mubr.bf16.mxu0 %v3723_v5  ;;  %v3398_v28 = vrot.slane %v3396_v45, 4  ;;  %v3401_v21 = vrot.slane %v3399_v13, 5  ;;  %v8268_v50 = vld [vmem:[%s10973_s3 + $0x208] sm:$0xff]   ;;  %v4494_v63 = vld [vmem:[#allocation2 + $0x20] sm:$0xf0] }
 0x2ca   : > { %v3889_v43 = vshll.u32 %v3757_v10, 16  ;;  %v3894_v57 = vshrl.u32 %v3869_v1, 16  ;;  %v3888_v51 = vrot.slane %v3886_v14, 4  ;;  %v3897_v17 = vshll.u32 %v3869_v1, 16  ;;  %v8292_v5 = vld [vmem:[%s10973_s3 + $0x200] sm:$0xff]   ;;  %v8269_v14 = vld [vmem:[%s10973_s3 + $0x210] sm:$0xff]  }
 0x2cb   : > { %v3003_v62 = vsel %vm2731_vm7, %v2994_v2, %v3002_v46  ;;  %v3394_v0 = vor.u32 %v3393_v6, %v3390_v16  ;;  %v3402_v3 = vor.u32 %v3401_v21, %v3398_v28  ;;  %v3725_v18 = vshrl.u32 %v3467_v60, 16  ;;  %v3759_v6 = vld [vmem:[#allocation2 + $0x30] sm:$0xf0] }
 0x2cc   : > { %5646 = vmatmul.mubr.bf16.gmra.mrb[172].mxu1 %v3003_v62  ;;  %v3891_v41 = vrot.slane %v3889_v43, 5  ;;  %v3896_v56 = vrot.slane %v3894_v57, 4  ;;  %v3899_v27 = vrot.slane %v3897_v17, 5  ;;  %v3728_v34 = vshll.u32 %v3467_v60, 16  ;;  %v3871_v57 = vld [vmem:[#allocation2 + $0x38] sm:$0x1f] }
 0x2cd   : > { %v3733_v20 = vshrl.u32 %v3468_v30, 16  ;;  %v3736_v26 = vshll.u32 %v3468_v30, 16  ;;  %v3403_v52 = vsel %vm307_vm2, %v3394_v0, %v3402_v3  ;;  %v3727_v4 = vrot.slane %v3725_v18, 3  ;;  %v4174_v17 = vld [vmem:[#allocation2 + $0x20] sm:$0xf8] }
 0x2ce   : > { %v3892_v44 = vor.u32 %v3891_v41, %v3888_v51  ;;  %v3805_v53 = vrot.slane %v3757_v10, 4  ;;  %5799 = vmatmul.mubr.bf16.gmra.mrb[232].mxu0 %v3403_v52  ;;  %v3900_v55 = vor.u32 %v3899_v27, %v3896_v56  ;;  %v3730_v25 = vrot.slane %v3728_v34, 4  ;;  %v8293_v56 = vld [vmem:[#allocation2 + $0x28] sm:$0xf]  ;;  %v10178_v34 = vld [vmem:[#allocation2 + $0x38] sm:$0xf] }
 0x2cf   : > { %v3735_v12 = vrot.slane %v3733_v20, 3  ;;  %v3738_v7 = vrot.slane %v3736_v26, 4  ;;  %v3806_v42 = vrot.slane %v8291_v47, 4  ;;  %v3405_v19 = vshrl.u32 %v10148_v11, 16 }
 0x2d0   : > { %v3408_v15 = vshll.u32 %v10148_v11, 16  ;;  %v3413_v38 = vshrl.u32 %v3148_v35, 16  ;;  %v3901_v49 = vsel %vm307_vm2, %v3892_v44, %v3900_v55  ;;  %v3731_v22 = vor.u32 %v3730_v25, %v3727_v4  ;;  %v10181_v44 = vld [vmem:[#allocation2 + $0x30] sm:$0xf0] }
 0x2d1   : > { %v3739_v32 = vor.u32 %v3738_v7, %v3735_v12  ;;  %v3416_v61 = vshll.u32 %v3148_v35, 16  ;;  %5847 = vmatprep.mubr.bf16.mxu1 %v3901_v49  ;;  %v3807_v40 = vsel %vm3068_vm6, %v3805_v53, %v3806_v42  ;;  %v3407_v58 = vrot.slane %v3405_v19, 4  ;;  %v8270_v12 = vld [vmem:[%s10973_s3 + $0x218] sm:$0xff]   ;;  %v10190_v49 = vld [vmem:[#allocation2 + $0x40] sm:$0xf0] }
 0x2d2   : > { %v3410_v9 = vrot.slane %v3408_v15, 5  ;;  %v3415_v8 = vrot.slane %v3413_v38, 4  ;;  %v3903_v10 = vshrl.u32 %v3758_v36, 16  ;;  %v3906_v37 = vshll.u32 %v3758_v36, 16 }
 0x2d3   : > { %v3740_v11 = vsel %vm2731_vm7, %v3731_v22, %v3739_v32  ;;  %v3418_v31 = vrot.slane %v3416_v61, 5  ;;  %v3911_v29 = vshrl.u32 %v3870_v48, 16  ;;  %v3914_v1 = vshll.u32 %v3870_v48, 16 }
 0x2d4   : > { %5806 = vmatprep.mubr.bf16.mxu0 %v3740_v11  ;;  %5848 = vmatmul.mubr.bf16.vlgmr.msra.gmra.mrb[176].mxu1 %v3807_v40  ;;  %v3411_v23 = vor.u32 %v3410_v9, %v3407_v58  ;;  %v4215_v2 = vshrl.u32 %v4175_v33, 16  ;;  %v3905_v45 = vrot.slane %v3903_v10, 4  ;;  %v3908_v13 = vrot.slane %v3906_v37, 5  ;;  %v8294_v58 = vld [vmem:[#allocation2 + $0x38] sm:$0xf] }
 0x2d5   : > { %v3419_v16 = vor.u32 %v3418_v31, %v3415_v8  ;;  %7928 = vmatpush3.bf16.msra.mxu1 %v8292_v5  ;;  %v4218_v46 = vshll.u32 %v4175_v33, 16  ;;  %v3913_v60 = vrot.slane %v3911_v29, 4  ;;  %v3916_v28 = vrot.slane %v3914_v1, 5  ;;  %v4176_v8 = vld [vmem:[#allocation2 + $0x30] sm:$0xf8] }
 0x2d6   : > { %v4217_v21 = vrot.slane %v4215_v2, 3  ;;  %v4542_v43 = vrot.slane %v4494_v63, 4  ;;  %7929 = vmatprep.subr.bf16.mxu1 %v8268_v50  ;;  %v3909_v62 = vor.u32 %v3908_v13, %v3905_v45  ;;  %v4543_v51 = vrot.slane %v4175_v33, 4  ;;  %v3872_v33 = vld [vmem:[#allocation2 + $0x48] sm:$0x1f] }
 0x2d7   : > { %v3420_v30 = vsel %vm307_vm2, %v3411_v23, %v3419_v16  ;;  %v4220_v0 = vrot.slane %v4218_v46, 4  ;;  %v3917_v3 = vor.u32 %v3916_v28, %v3913_v60  ;;  %v3808_v41 = vrot.slane %v3758_v36, 4  ;;  %v4496_v1 = vld [vmem:[#allocation2 + $0x40] sm:$0xf0]  ;;  %v10201_v5 = vld [vmem:[#allocation2 + $0x48] sm:$0xf] }
 0x2d8   : > { %5807 = vmatmul.mubr.bf16.gmra.mrb[236].mxu0 %v3420_v30  ;;  %v3809_v18 = vrot.slane %v8293_v56, 4  ;;  %v3920_v27 = vshrl.u32 %v3759_v6, 16  ;;  %v4544_v20 = vsel %vm3068_vm6, %v4542_v43, %v4543_v51  ;;  %v3923_v26 = vshll.u32 %v3759_v6, 16  ;;  %v8272_v28 = vld [vmem:[%s10973_s3 + $0x228] sm:$0xff]  }
 0x2d9   : > { %v3928_v35 = vshrl.u32 %v3871_v57, 16  ;;  %v3931_v52 = vshll.u32 %v3871_v57, 16  ;;  %7930 = vmatpush3.bf16.msra.mxu1 %v8268_v50  ;;  %v3918_v4 = vsel %vm307_vm2, %v3909_v62, %v3917_v3  ;;  %6008 = vmatprep.mubr.bf16.mxu0 %v4544_v20  ;;  %v4207_v25 = vshrl.u32 %v4174_v17, 16  ;;  %v8271_v50 = vld [vmem:[%s10973_s3 + $0x220] sm:$0xff]   ;;  %v10208_v62 = vld [vmem:[#allocation2 + $0x50] sm:$0xf0] }
 0x2da   : > { %v3810_v53 = vsel %vm3068_vm6, %v3808_v41, %v3809_v18  ;;  %v3922_v55 = vrot.slane %v3920_v27, 4  ;;  %7931 = vmatprep.subr.bf16.mxu1 %v8269_v14  ;;  %5855 = vmatprep.mubr.bf16.mxu1 %v3918_v4  ;;  %v3925_v7 = vrot.slane %v3923_v26, 5  ;;  %v4210_v19 = vshll.u32 %v4174_v17, 16  ;;  %v3873_v41 = vld [vmem:[#allocation2 + $0x58] sm:$0x1f] }
 0x2db   : > { %v3930_v47 = vrot.slane %v3928_v35, 4  ;;  %v3933_v42 = vrot.slane %v3931_v52, 5  ;;  %v4209_v15 = vrot.slane %v4207_v25, 3  ;;  %v4545_v38 = vrot.slane %v10181_v44, 4  ;;  %v8295_v20 = vld [vmem:[#allocation2 + $0x48] sm:$0xf] }
 0x2dc   : > { %5856 = vmatmul.mubr.bf16.gmra.mrb[180].mxu1 %v3810_v53  ;;  %v4546_v36 = vrot.slane %v10178_v34, 4  ;;  %v3926_v22 = vor.u32 %v3925_v7, %v3922_v55  ;;  %v4212_v61 = vrot.slane %v4210_v19, 4  ;;  %v4221_v48 = vor.u32 %v4220_v0, %v4217_v21  ;;  %v4178_v35 = vld [vmem:[#allocation2 + $0x40] sm:$0xf8]  ;;  %v8273_v55 = vld [vmem:[%s10973_s3 + $0x230] sm:$0xff]  }
 0x2dd   : > { %v3934_v32 = vor.u32 %v3933_v42, %v3930_v47  ;;  %7932 = vmatpush3.bf16.msra.mxu1 %v8269_v14  ;;  %v3811_v40 = vrot.slane %v3759_v6, 4  ;;  %v3812_v9 = vrot.slane %v8294_v58, 4  ;;  %v3937_v10 = vshrl.u32 %v10190_v49, 16  ;;  %v10220_v42 = vld [vmem:[#allocation2 + $0x58] sm:$0xf] }
 0x2de   : > { %7933 = vmatprep.subr.bf16.mxu1 %v8270_v12  ;;  %v4213_v31 = vor.u32 %v4212_v61, %v4209_v15  ;;  %v4547_v37 = vsel %vm3068_vm6, %v4545_v38, %v4546_v36  ;;  %v3940_v23 = vshll.u32 %v10190_v49, 16  ;;  %v3945_v29 = vshrl.u32 %v3872_v33, 16 }
 0x2df   : > { %v3935_v11 = vsel %vm307_vm2, %v3926_v22, %v3934_v32  ;;  %v3813_v63 = vsel %vm3068_vm6, %v3811_v40, %v3812_v9  ;;  %v3939_v16 = vrot.slane %v3937_v10, 4  ;;  %v3948_v45 = vshll.u32 %v3872_v33, 16 }
 0x2e0   : > { %5863 = vmatprep.mubr.bf16.mxu1 %v3935_v11  ;;  %v4222_v2 = vsel %vm2731_vm7, %v4213_v31, %v4221_v48  ;;  %v4224_v13 = vshrl.u32 %v4176_v8, 16  ;;  %v3942_v46 = vrot.slane %v3940_v23, 5  ;;  %v3947_v6 = vrot.slane %v3945_v29, 4 }
 0x2e1   : > { %7934 = vmatpush3.bf16.msra.mxu1 %v8270_v12  ;;  %6009 = vmatmul.mubr.bf16.vlgmr.msra.gmra.mrb[240].mxu0 %v4222_v2  ;;  %v4227_v14 = vshll.u32 %v4176_v8, 16  ;;  %v4232_v60 = vshrl.u32 %v10178_v34, 16  ;;  %v3950_v21 = vrot.slane %v3948_v45, 5  ;;  %v4235_v57 = vshll.u32 %v10178_v34, 16  ;;  %v10225_v8 = vld [vmem:[#allocation2 + $0x60] sm:$0xf0] }
 0x2e2   : > { %7935 = vmatprep.subr.bf16.mxu1 %v8271_v50  ;;  %6016 = vmatprep.mubr.bf16.mxu0 %v4547_v37  ;;  %v4226_v43 = vrot.slane %v4224_v13, 3  ;;  %v4548_v30 = vrot.slane %v4496_v1, 4  ;;  %v3943_v0 = vor.u32 %v3942_v46, %v3939_v16  ;;  %v4549_v3 = vrot.slane %v10201_v5, 4  ;;  %v4180_v2 = vld [vmem:[#allocation2 + $0x50] sm:$0xf8] }
 0x2e3   : > { %v4229_v51 = vrot.slane %v4227_v14, 4  ;;  %v4234_v17 = vrot.slane %v4232_v60, 3  ;;  %v3951_v56 = vor.u32 %v3950_v21, %v3947_v6  ;;  %v4237_v18 = vrot.slane %v4235_v57, 4  ;;  %v8296_v45 = vld [vmem:[#allocation2 + $0x58] sm:$0xf]  ;;  %v8275_v21 = vld [vmem:[%s10975_s5] sm:$0xff]  }
 0x2e4   : > { %5864 = vmatmul.mubr.bf16.gmra.mrb[184].mxu1 %v3813_v63  ;;  %v3814_v27 = vrot.slane %v10190_v49, 4  ;;  %v3815_v26 = vrot.slane %v8295_v20, 4  ;;  %v4550_v34 = vsel %vm3068_vm6, %v4548_v30, %v4549_v3  ;;  %v3954_v4 = vshrl.u32 %v10208_v62, 16  ;;  %v4497_v49 = vld [vmem:[#allocation2 + $0x50] sm:$0xf0] }
 0x2e5   : > { %7936 = vmatpush3.bf16.msra.mxu1 %v8271_v50  ;;  %v4230_v52 = vor.u32 %v4229_v51, %v4226_v43  ;;  %v3957_v53 = vshll.u32 %v10208_v62, 16  ;;  %v3952_v25 = vsel %vm307_vm2, %v3943_v0, %v3951_v56  ;;  %v4238_v12 = vor.u32 %v4237_v18, %v4234_v17  ;;  %v8274_v50 = vld [vmem:[%s10973_s3 + $0x238] sm:$0xff]   ;;  %v3874_v63 = vld [vmem:[#allocation2 + $0x68] sm:$0x1f] }
 0x2e6   : > { %7937 = vmatprep.subr.bf16.mxu1 %v8272_v28  ;;  %v3816_v7 = vsel %vm3068_vm6, %v3814_v27, %v3815_v26  ;;  %v3962_v47 = vshrl.u32 %v3873_v41, 16  ;;  %5871 = vmatprep.mubr.bf16.mxu1 %v3952_v25  ;;  %v3956_v19 = vrot.slane %v3954_v4, 4  ;;  %v3965_v38 = vshll.u32 %v3873_v41, 16  ;;  %v4183_v0 = vld [vmem:[#allocation2 + $0x68] sm:$0xf] }
 0x2e7   : > { %v3959_v15 = vrot.slane %v3957_v53, 5  ;;  %v4241_v36 = vshrl.u32 %v4178_v35, 16  ;;  %v4239_v22 = vsel %vm2731_vm7, %v4230_v52, %v4238_v12  ;;  %v4244_v61 = vshll.u32 %v4178_v35, 16  ;;  %v4498_v26 = vld [vmem:[#allocation2 + $0x60] sm:$0xf0] }
 0x2e8   : > { %v3964_v32 = vrot.slane %v3962_v47, 4  ;;  %v4249_v48 = vshrl.u32 %v10201_v5, 16  ;;  %v3967_v40 = vrot.slane %v3965_v38, 5  ;;  %v4252_v9 = vshll.u32 %v10201_v5, 16  ;;  %v10243_v12 = vld [vmem:[#allocation2 + $0x70] sm:$0xf0] }
 0x2e9   : > { %7938 = vmatpush3.bf16.msra.mxu1 %v8272_v28  ;;  %6017 = vmatmul.mubr.bf16.gmra.mrb[244].mxu0 %v4239_v22  ;;  %v3960_v33 = vor.u32 %v3959_v15, %v3956_v19  ;;  %v4243_v58 = vrot.slane %v4241_v36, 3  ;;  %v4246_v11 = vrot.slane %v4244_v61, 4  ;;  %v4551_v10 = vrot.slane %v4497_v49, 4  ;;  %v4182_v15 = vld [vmem:[#allocation2 + $0x60] sm:$0xf8] }
 0x2ea   : > { %7939 = vmatprep.subr.bf16.mxu1 %v8273_v55  ;;  %6024 = vmatprep.mubr.bf16.mxu0 %v4550_v34  ;;  %v4251_v31 = vrot.slane %v4249_v48, 3  ;;  %v4552_v37 = vrot.slane %v10220_v42, 4  ;;  %v3968_v23 = vor.u32 %v3967_v40, %v3964_v32  ;;  %v4254_v29 = vrot.slane %v4252_v9, 4  ;;  %v4185_v40 = vld [vmem:[#allocation2 + $0x78] sm:$0xf] }
 0x2eb   : > { %v3817_v1 = vrot.slane %v10208_v62, 4  ;;  %v4247_v16 = vor.u32 %v4246_v11, %v4243_v58  ;;  %v3818_v13 = vrot.slane %v8296_v45, 4  ;;  %v3971_v5 = vshrl.u32 %v10225_v8, 16  ;;  %v8297_v9 = vld [vmem:[#allocation2 + $0x68] sm:$0xf] }
 0x2ec   : > { %5872 = vmatmul.mubr.bf16.gmra.mrb[188].mxu1 %v3816_v7  ;;  %v3974_v46 = vshll.u32 %v10225_v8, 16  ;;  %v3969_v6 = vsel %vm307_vm2, %v3960_v33, %v3968_v23  ;;  %v4255_v14 = vor.u32 %v4254_v29, %v4251_v31  ;;  %v4553_v60 = vsel %vm3068_vm6, %v4551_v10, %v4552_v37  ;;  %v3875_v7 = vld [vmem:[#allocation2 + $0x78] sm:$0x1f]  ;;  %v4499_v29 = vld [vmem:[#allocation2 + $0x70] sm:$0xf0] }
 0x2ed   : > { %7940 = vmatpush3.bf16.msra.mxu1 %v8273_v55  ;;  %v3979_v28 = vshrl.u32 %v3874_v63, 16  ;;  %5879 = vmatprep.mubr.bf16.mxu1 %v3969_v6  ;;  %v3973_v43 = vrot.slane %v3971_v5, 4  ;;  %v3982_v30 = vshll.u32 %v3874_v63, 16  ;;  %v4258_v62 = vshrl.u32 %v4180_v2, 16  ;;  %v10250_v45 = vld [vmem:[#allocation2 + $0x80] sm:$0xf0] }
 0x2ee   : > { %7941 = vmatprep.subr.bf16.mxu1 %v8274_v50  ;;  %v3976_v57 = vrot.slane %v3974_v46, 5  ;;  %v4256_v51 = vsel %vm2731_vm7, %v4247_v16, %v4255_v14  ;;  %v4261_v3 = vshll.u32 %v4180_v2, 16  ;;  %v4266_v41 = vshrl.u32 %v10220_v42, 16  ;;  %v3876_v6 = vld [vmem:[#allocation2 + $0x88] sm:$0x1f] }
 0x2ef   : > { %v3981_v17 = vrot.slane %v3979_v28, 4  ;;  %v3984_v18 = vrot.slane %v3982_v30, 5  ;;  %v4260_v27 = vrot.slane %v4258_v62, 3  ;;  %v4269_v20 = vshll.u32 %v10220_v42, 16 }
 0x2f0   : > { %v3977_v56 = vor.u32 %v3976_v57, %v3973_v43  ;;  %v4263_v35 = vrot.slane %v4261_v3, 4  ;;  %v4268_v52 = vrot.slane %v4266_v41, 3  ;;  %v4283_v34 = vshrl.u32 %v4183_v0, 16 }
 0x2f1   : > { %7942 = vmatpush3.bf16.msra.mxu1 %v8274_v50  ;;  %6025 = vmatmul.mubr.bf16.gmra.mrb[248].mxu0 %v4256_v51  ;;  %v4286_v4 = vshll.u32 %v4183_v0, 16  ;;  %v3819_v53 = vsel %vm3068_vm6, %v3817_v1, %v3818_v13  ;;  %v3985_v55 = vor.u32 %v3984_v18, %v3981_v17  ;;  %v4271_v25 = vrot.slane %v4269_v20, 4 }
 0x2f2   : > { %7975 = vmatprep.subr.bf16.mxu1 %v8275_v21  ;;  %6032 = vmatprep.mubr.bf16.mxu0 %v4553_v60  ;;  %v4264_v47 = vor.u32 %v4263_v35, %v4260_v27  ;;  %v4554_v19 = vrot.slane %v4498_v26, 4  ;;  %v4555_v42 = vrot.slane %v4183_v0, 4  ;;  %v4285_v49 = vrot.slane %v4283_v34, 3  ;;  %v4184_v0 = vld [vmem:[#allocation2 + $0x70] sm:$0xf8] }
 0x2f3   : > { %v3986_v38 = vsel %vm307_vm2, %v3977_v56, %v3985_v55  ;;  %v4272_v36 = vor.u32 %v4271_v25, %v4268_v52  ;;  %v4288_v22 = vrot.slane %v4286_v4, 4  ;;  %v3820_v32 = vrot.slane %v10225_v8, 4  ;;  %v4187_v56 = vld [vmem:[#allocation2 + $0x88] sm:$0xf]  ;;  %v8298_v27 = vld [vmem:[#allocation2 + $0x78] sm:$0xf] }
 0x2f4   : > { %5880 = vmatmul.mubr.bf16.gmra.mrb[192].mxu1 %v3819_v53  ;;  %v3988_v61 = vshrl.u32 %v10243_v12, 16  ;;  %v3991_v48 = vshll.u32 %v10243_v12, 16  ;;  %v3996_v33 = vshrl.u32 %v3875_v7, 16  ;;  %v3821_v50 = vrot.slane %v8297_v9, 4  ;;  %v4500_v55 = vld [vmem:[#allocation2 + $0x80] sm:$0xf0] }
 0x2f5   : > { %5887 = vmatprep.mubr.bf16.mxu1 %v3986_v38  ;;  %v4273_v58 = vsel %vm2731_vm7, %v4264_v47, %v4272_v36  ;;  %v3999_v11 = vshll.u32 %v3875_v7, 16  ;;  %v4275_v31 = vshrl.u32 %v4182_v15, 16  ;;  %v4278_v23 = vshll.u32 %v4182_v15, 16 }
 0x2f6   : > { %v3990_v10 = vrot.slane %v3988_v61, 4  ;;  %v3993_v37 = vrot.slane %v3991_v48, 5  ;;  %v3998_v63 = vrot.slane %v3996_v33, 4  ;;  %v4300_v8 = vshrl.u32 %v4185_v40, 16 }
 0x2f7   : > { %v4001_v1 = vrot.slane %v3999_v11, 5  ;;  %v4277_v2 = vrot.slane %v4275_v31, 3  ;;  %v4303_v16 = vshll.u32 %v4185_v40, 16  ;;  %v4556_v13 = vsel %vm3068_vm6, %v4554_v19, %v4555_v42  ;;  %v10263_v42 = vld [vmem:[#allocation2 + $0x90] sm:$0xf0] }
 0x2f8   : > { %v3994_v5 = vor.u32 %v3993_v37, %v3990_v10  ;;  %v4280_v46 = vrot.slane %v4278_v23, 4  ;;  %v4289_v14 = vor.u32 %v4288_v22, %v4285_v49  ;;  %v3822_v60 = vsel %vm3068_vm6, %v3820_v32, %v3821_v50  ;;  %v3877_v49 = vld [vmem:[#allocation2 + $0x98] sm:$0x1f]  ;;  %v4186_v50 = vld [vmem:[#allocation2 + $0x80] sm:$0xf8] }
 0x2f9   : > { %6033 = vmatmul.mubr.bf16.gmra.mrb[252].mxu0 %v4273_v58  ;;  %v4002_v28 = vor.u32 %v4001_v1, %v3998_v63  ;;  %v4557_v21 = vrot.slane %v4499_v29, 4  ;;  %v10254_v43 = vrot.slane %v4300_v8, 3  ;;  %v10256_v57 = vrot.slane %v4303_v16, 4  ;;  %v4189_v63 = vld [vmem:[#allocation2 + $0x98] sm:$0xf] }
 0x2fa   : > { %6040 = vmatprep.mubr.bf16.mxu0 %v4556_v13  ;;  %v4558_v30 = vrot.slane %v4185_v40, 4  ;;  %v4005_v62 = vshrl.u32 %v10250_v45, 16  ;;  %v4281_v17 = vor.u32 %v4280_v46, %v4277_v2  ;;  %v4008_v3 = vshll.u32 %v10250_v45, 16  ;;  %v8299_v29 = vld [vmem:[#allocation2 + $0x88] sm:$0xf] }
 0x2fb   : > { %v4003_v51 = vsel %vm307_vm2, %v3994_v5, %v4002_v28  ;;  %v4013_v41 = vshrl.u32 %v3876_v6, 16  ;;  %v3823_v18 = vrot.slane %v10243_v12, 4  ;;  %v3824_v20 = vrot.slane %v8298_v27, 4 }
 0x2fc   : > { %5888 = vmatmul.mubr.bf16.gmra.mrb[196].mxu1 %v3822_v60  ;;  %v4007_v26 = vrot.slane %v4005_v62, 4  ;;  %v4016_v35 = vshll.u32 %v3876_v6, 16  ;;  %v4010_v52 = vrot.slane %v4008_v3, 5  ;;  %v4292_v4 = vshrl.u32 %v4184_v0, 16  ;;  %v4501_v6 = vld [vmem:[#allocation2 + $0x90] sm:$0xf0] }
 0x2fd   : > { %5895 = vmatprep.mubr.bf16.mxu1 %v4003_v51  ;;  %v4015_v34 = vrot.slane %v4013_v41, 4  ;;  %v4295_v53 = vshll.u32 %v4184_v0, 16  ;;  %v4559_v25 = vsel %vm3068_vm6, %v4557_v21, %v4558_v30  ;;  %v4317_v47 = vshrl.u32 %v4187_v56, 16  ;;  %v10278_v21 = vld [vmem:[#allocation2 + $0xa0] sm:$0xf0] }
 0x2fe   : > { %v4018_v7 = vrot.slane %v4016_v35, 5  ;;  %v4320_v19 = vshll.u32 %v4187_v56, 16  ;;  %v4290_v15 = vsel %vm2731_vm7, %v4281_v17, %v4289_v14  ;;  %v4011_v38 = vor.u32 %v4010_v52, %v4007_v26  ;;  %v3878_v0 = vld [vmem:[#allocation2 + $0xa8] sm:$0x1f]  ;;  %v4188_v26 = vld [vmem:[#allocation2 + $0x90] sm:$0xf8] }
 0x2ff   : > { %v4294_v12 = vrot.slane %v4292_v4, 3  ;;  %v4297_v36 = vrot.slane %v4295_v53, 4  ;;  %v4306_v22 = vor.u32 %v10256_v57, %v10254_v43  ;;  %v3825_v32 = vsel %vm3068_vm6, %v3823_v18, %v3824_v20  ;;  %v4191_v53 = vld [vmem:[#allocation2 + $0xa8] sm:$0xf] }
 0x300   : > { %v4019_v61 = vor.u32 %v4018_v7, %v4015_v34  ;;  %v4560_v48 = vrot.slane %v4500_v55, 4  ;;  %v10269_v33 = vrot.slane %v4317_v47, 3  ;;  %v10271_v40 = vrot.slane %v4320_v19, 4 }
 0x301   : > { %6041 = vmatmul.mubr.bf16.gmra.mrb[0].mxu0 %v4290_v15  ;;  %v4561_v58 = vrot.slane %v4187_v56, 4  ;;  %v4022_v9 = vshrl.u32 %v10263_v42, 16  ;;  %v3826_v31 = vrot.slane %v10250_v45, 4  ;;  %v4025_v10 = vshll.u32 %v10263_v42, 16 }
 0x302   : > { %6048 = vmatprep.mubr.bf16.mxu0 %v4559_v25  ;;  %v4020_v11 = vsel %vm307_vm2, %v4011_v38, %v4019_v61  ;;  %v4030_v37 = vshrl.u32 %v3877_v49, 16  ;;  %v4298_v23 = vor.u32 %v4297_v36, %v4294_v12  ;;  %v3827_v1 = vrot.slane %v8299_v29, 4  ;;  %v8300_v25 = vld [vmem:[#allocation2 + $0x98] sm:$0xf]  ;;  %v10292_v61 = vld [vmem:[#allocation2 + $0xb0] sm:$0xf0] }
 0x303   : > { %v4024_v2 = vrot.slane %v4022_v9, 4  ;;  %v4033_v8 = vshll.u32 %v3877_v49, 16  ;;  %v4027_v16 = vrot.slane %v4025_v10, 5  ;;  %v4309_v5 = vshrl.u32 %v4186_v50, 16  ;;  %v4502_v49 = vld [vmem:[#allocation2 + $0xa0] sm:$0xf0] }
 0x304   : > { %5896 = vmatmul.mubr.bf16.gmra.mrb[200].mxu1 %v3825_v32  ;;  %v4032_v13 = vrot.slane %v4030_v37, 4  ;;  %v4312_v46 = vshll.u32 %v4186_v50, 16  ;;  %v4562_v14 = vsel %vm3068_vm6, %v4560_v48, %v4561_v58  ;;  %v4334_v28 = vshrl.u32 %v4189_v63, 16  ;;  %v3879_v58 = vld [vmem:[#allocation2 + $0xb8] sm:$0x1f] }
 0x305   : > { %5903 = vmatprep.mubr.bf16.mxu1 %v4020_v11  ;;  %v4035_v60 = vrot.slane %v4033_v8, 5  ;;  %v4337_v45 = vshll.u32 %v4189_v63, 16  ;;  %v4323_v43 = vor.u32 %v10271_v40, %v10269_v33  ;;  %v4028_v57 = vor.u32 %v4027_v16, %v4024_v2  ;;  %v4190_v10 = vld [vmem:[#allocation2 + $0xa0] sm:$0xf8] }
 0x306   : > { %v4311_v30 = vrot.slane %v4309_v5, 3  ;;  %v4314_v62 = vrot.slane %v4312_v46, 4  ;;  %v4307_v51 = vsel %vm2731_vm7, %v4298_v23, %v4306_v22  ;;  %v3828_v17 = vsel %vm3068_vm6, %v3826_v31, %v3827_v1  ;;  %v10300_v1 = vld [vmem:[#allocation2 + $0xb8] sm:$0xf] }
 0x307   : > { %v4036_v3 = vor.u32 %v4035_v60, %v4032_v13  ;;  %v4563_v41 = vrot.slane %v4501_v6, 4  ;;  %v10284_v56 = vrot.slane %v4334_v28, 3  ;;  %v10286_v18 = vrot.slane %v4337_v45, 4 }
 0x308   : > { %v4564_v27 = vrot.slane %v4189_v63, 4  ;;  %v4039_v20 = vshrl.u32 %v10278_v21, 16  ;;  %v4315_v35 = vor.u32 %v4314_v62, %v4311_v30  ;;  %v3829_v52 = vrot.slane %v10263_v42, 4 }
 0x309   : > { %6049 = vmatmul.mubr.bf16.gmra.mrb[4].mxu0 %v4307_v51  ;;  %v4042_v34 = vshll.u32 %v10278_v21, 16  ;;  %v4047_v4 = vshrl.u32 %v3878_v0, 16  ;;  %v4037_v55 = vsel %vm307_vm2, %v4028_v57, %v4036_v3  ;;  %v3830_v7 = vrot.slane %v8300_v25, 4  ;;  %v8301_v51 = vld [vmem:[#allocation2 + $0xa8] sm:$0xf] }
 0x30a   : > { %6056 = vmatprep.mubr.bf16.mxu0 %v4562_v14  ;;  %v4041_v47 = vrot.slane %v4039_v20, 4  ;;  %v4050_v19 = vshll.u32 %v3878_v0, 16  ;;  %v4326_v12 = vshrl.u32 %v4188_v26, 16  ;;  %v4329_v36 = vshll.u32 %v4188_v26, 16  ;;  %v10319_v26 = vld [vmem:[#allocation2 + $0xb0] sm:$0xf0] }
 0x30b   : > { %v4044_v15 = vrot.slane %v4042_v34, 5  ;;  %v4049_v38 = vrot.slane %v4047_v4, 4  ;;  %v4351_v32 = vshrl.u32 %v4191_v53, 16  ;;  %v4354_v42 = vshll.u32 %v4191_v53, 16  ;;  %v4192_v25 = vld [vmem:[#allocation2 + $0xb0] sm:$0xf8] }
 0x30c   : > { %5904 = vmatmul.mubr.bf16.gmra.mrb[204].mxu1 %v3828_v17  ;;  %v4052_v22 = vrot.slane %v4050_v19, 5  ;;  %v4328_v33 = vrot.slane %v4326_v12, 3  ;;  %v4331_v40 = vrot.slane %v4329_v36, 4  ;;  %v4324_v9 = vsel %vm2731_vm7, %v4315_v35, %v4323_v43 }
 0x30d   : > { %5911 = vmatprep.mubr.bf16.mxu1 %v4037_v55  ;;  %v4045_v48 = vor.u32 %v4044_v15, %v4041_v47  ;;  %v4340_v50 = vor.u32 %v10286_v18, %v10284_v56  ;;  %v4565_v11 = vsel %vm3068_vm6, %v4563_v41, %v4564_v27  ;;  %v3831_v37 = vsel %vm3068_vm6, %v3829_v52, %v3830_v7  ;;  %v10322_v52 = vld [vmem:[#allocation2 + $0xc0] sm:$0xf0]  ;;  %v3880_v55 = vld [vmem:[#allocation2 + $0xc8] sm:$0x1f] }
 0x30e   : > { %v4053_v31 = vor.u32 %v4052_v22, %v4049_v38  ;;  %v4566_v63 = vrot.slane %v4502_v49, 4  ;;  %v4567_v23 = vrot.slane %v4191_v53, 4  ;;  %v4056_v29 = vshrl.u32 %v10292_v61, 16 }
 0x30f   : > { %v10302_v2 = vrot.slane %v4351_v32, 3  ;;  %v10304_v8 = vrot.slane %v4354_v42, 4  ;;  %v4059_v16 = vshll.u32 %v10292_v61, 16  ;;  %v4064_v13 = vshrl.u32 %v3879_v58, 16  ;;  %v10340_v42 = vld [vmem:[#allocation2 + $0xc8] sm:$0xf] }
 0x310   : > { %v4054_v46 = vsel %vm307_vm2, %v4045_v48, %v4053_v31  ;;  %v4332_v6 = vor.u32 %v4331_v40, %v4328_v33  ;;  %v4058_v14 = vrot.slane %v4056_v29, 4  ;;  %v4067_v60 = vshll.u32 %v3879_v58, 16 }
 0x311   : > { %6057 = vmatmul.mubr.bf16.gmra.mrb[8].mxu0 %v4324_v9  ;;  %v4061_v45 = vrot.slane %v4059_v16, 5  ;;  %v4066_v43 = vrot.slane %v4064_v13, 4  ;;  %v4343_v57 = vshrl.u32 %v4190_v10, 16  ;;  %v4346_v30 = vshll.u32 %v4190_v10, 16 }
 0x312   : > { %v10307_v5 = vpop.f32.mrb[116].mxu1  ;;  %6064 = vmatprep.mubr.bf16.mxu0 %v4565_v11  ;;  %v3832_v0 = vrot.slane %v10278_v21, 4  ;;  %v3833_v17 = vrot.slane %v8301_v51, 4  ;;  %v4069_v3 = vrot.slane %v4067_v60, 5  ;;  %v4368_v41 = vshrl.u32 %v10300_v1, 16 }
 0x313   : > { %v10310_v28 = vpop.f32.mrb[117].mxu1  ;;  %v4345_v18 = vrot.slane %v4343_v57, 3  ;;  %v4348_v27 = vrot.slane %v4346_v30, 4  ;;  %v4371_v20 = vshll.u32 %v10300_v1, 16  ;;  %v4568_v35 = vsel %vm3068_vm6, %v4566_v63, %v4567_v23  ;;  %v8302_v63 = vld [vmem:[#allocation2 + $0xb8] sm:$0xf] }
 0x314   : > { %5912 = vmatmul.mubr.bf16.gmra.mrb[208].mxu1 %v3831_v37  ;;  %v10312_v62 = vpop.f32.mrb[118].mxu1  ;;  %v4341_v34 = vsel %vm2731_vm7, %v4332_v6, %v4340_v50  ;;  %v4357_v21 = vor.u32 %v10304_v8, %v10302_v2  ;;  %v4062_v4 = vor.u32 %v4061_v45, %v4058_v14  ;;  %v4070_v53 = vor.u32 %v4069_v3, %v4066_v43  ;;  %v10360_v43 = vld [vmem:[#allocation2 + $0xd0] sm:$0xf0] }
 0x315   : > { %5919 = vmatprep.mubr.bf16.mxu1 %v4054_v46  ;;  %v10316_v56 = vpop.f32.mrb[119].mxu1  ;;  %v3834_v47 = vsel %vm3068_vm6, %v3832_v0, %v3833_v17  ;;  %v10330_v19 = vrot.slane %v4368_v41, 3  ;;  %v4569_v15 = vrot.slane %v10319_v26, 4  ;;  %v4570_v38 = vrot.slane %v10300_v1, 4  ;;  %v10356_v46 = vld [vmem:[#allocation2 + $0xc0] sm:$0xf0] }
 0x316   : > { %v4349_v36 = vor.u32 %v4348_v27, %v4345_v18  ;;  %v10336_v49 = vrot.slane %v4371_v20, 4  ;;  %v4073_v22 = vshrl.u32 %v10322_v52, 16  ;;  %v4076_v32 = vshll.u32 %v10322_v52, 16  ;;  %v3881_v0 = vld [vmem:[#allocation2 + $0xd8] sm:$0x1f] }
 0x317   : > { %v3835_v33 = vrot.slane %v10292_v61, 4  ;;  %v4081_v40 = vshrl.u32 %v3880_v55, 16  ;;  %v4084_v58 = vshll.u32 %v3880_v55, 16  ;;  %v4360_v9 = vshrl.u32 %v4192_v25, 16  ;;  %v4194_v18 = vld [vmem:[#allocation2 + $0xc0] sm:$0xf8] }
 0x318   : > { %v10327_v7 = vpop.f32.mrb[176].mxu0  ;;  %v4071_v11 = vsel %vm307_vm2, %v4062_v4, %v4070_v53  ;;  %v4075_v31 = vrot.slane %v4073_v22, 4  ;;  %v4078_v10 = vrot.slane %v4076_v32, 5  ;;  %v4363_v37 = vshll.u32 %v4192_v25, 16  ;;  %v10383_v53 = vld [vmem:[%s10974_s4] ss:$0 sm:$0xff] }
 0x319   : > { %v10334_v12 = vpop.f32.mrb[177].mxu0  ;;  %6065 = vmatmul.mubr.bf16.gmra.mrb[12].mxu0 %v4341_v34  ;;  %v3836_v23 = vrot.slane %v8302_v63, 4  ;;  %v4083_v29 = vrot.slane %v4081_v40, 4  ;;  %v4086_v1 = vrot.slane %v4084_v58, 5  ;;  %v7401_v2 = vadd.f32 %v10128_v54, %v10121_v59 }
 0x31a   : > { %v10342_v48 = vpop.f32.mrb[178].mxu0  ;;  %6072 = vmatprep.mubr.bf16.mxu0 %v4568_v35  ;;  %v10350_v61 = vrot.slane %v4360_v9, 3  ;;  %v10352_v8 = vrot.slane %v4363_v37, 4  ;;  %v4385_v16 = vshrl.u32 %v10340_v42, 16  ;;  %v4388_v13 = vshll.u32 %v10340_v42, 16 }
 0x31b   : > { %v10345_v50 = vpop.f32.mrb[179].mxu0  ;;  %v4640_v6 = vshrl.u32 %v10181_v44, 16  ;;  %v4643_v14 = vshll.u32 %v10181_v44, 16  ;;  %v4079_v60 = vor.u32 %v4078_v10, %v4075_v31  ;;  %v4087_v45 = vor.u32 %v4086_v1, %v4083_v29 }
 0x31c   : > { %5920 = vmatmul.mubr.bf16.gmra.mrb[212].mxu1 %v3834_v47  ;;  %v4374_v59 = vor.u32 %v10336_v49, %v10330_v19  ;;  %v4571_v54 = vsel %vm3068_vm6, %v4569_v15, %v4570_v38  ;;  %v4776_v57 = vshrl.u32 %v10319_v26, 16  ;;  %v7404_v30 = vadd.f32 %v10134_v39, %v10130_v24  ;;  %v4197_v39 = vld [vmem:[#allocation2 + $0xd8] sm:$0xf]  ;;  %v10386_v19 = vld [vmem:[#allocation2 + $0xd0] sm:$0xf0] }
 0x31d   : > { %5927 = vmatprep.mubr.bf16.mxu1 %v4071_v11  ;;  %v4358_v51 = vsel %vm2731_vm7, %v4349_v36, %v4357_v21  ;;  %v3837_v17 = vsel %vm3068_vm6, %v3835_v33, %v3836_v23  ;;  %v4572_v3 = vrot.slane %v10356_v46, 4  ;;  %v4573_v41 = vrot.slane %v10340_v42, 4  ;;  %v8303_v42 = vld [vmem:[#allocation2 + $0xc8] sm:$0xf] }
 0x31e   : > { %v4366_v20 = vor.u32 %v10352_v8, %v10350_v61  ;;  %v4387_v35 = vrot.slane %v4385_v16, 3  ;;  %v4390_v34 = vrot.slane %v4388_v13, 4  ;;  %v4090_v24 = vshrl.u32 %v10360_v43, 16 }
 0x31f   : > { %v4088_v21 = vsel %vm307_vm2, %v4079_v60, %v4087_v45  ;;  %v4093_v55 = vshll.u32 %v10360_v43, 16  ;;  %v4098_v25 = vshrl.u32 %v3881_v0, 16  ;;  %v4101_v47 = vshll.u32 %v3881_v0, 16 }
 0x320   : > { %v3838_v38 = vrot.slane %v10322_v52, 4  ;;  %v4092_v36 = vrot.slane %v4090_v24, 4  ;;  %v4377_v49 = vshrl.u32 %v4194_v18, 16  ;;  %v4380_v22 = vshll.u32 %v4194_v18, 16  ;;  %v10408_v24 = vld [vmem:[#allocation2 + $0xe0] sm:$0xf0] }
 0x321   : > { %v10372_v27 = vpop.f32.mrb[120].mxu1  ;;  %6073 = vmatmul.mubr.bf16.gmra.mrb[16].mxu0 %v4358_v51  ;;  %v3839_v33 = vrot.slane %v8303_v42, 4  ;;  %v4095_v40 = vrot.slane %v4093_v55, 5  ;;  %v4100_v58 = vrot.slane %v4098_v25, 4  ;;  %v4103_v9 = vrot.slane %v4101_v47, 5 }
 0x322   : > { %v10377_v4 = vpop.f32.mrb[121].mxu1  ;;  %6080 = vmatprep.mubr.bf16.mxu0 %v4571_v54  ;;  %v4379_v31 = vrot.slane %v4377_v49, 3  ;;  %v4382_v10 = vrot.slane %v4380_v22, 4  ;;  %v4402_v37 = vshrl.u32 %v4197_v39, 16  ;;  %v4405_v63 = vshll.u32 %v4197_v39, 16 }
 0x323   : > { %v10388_v15 = vpop.f32.mrb[122].mxu1  ;;  %v4096_v52 = vor.u32 %v4095_v40, %v4092_v36  ;;  %v4104_v29 = vor.u32 %v4103_v9, %v4100_v58  ;;  %v4575_v1 = vrot.slane %v10386_v19, 4  ;;  %v4576_v61 = vrot.slane %v4197_v39, 4  ;;  %v4199_v55 = vld [vmem:[#allocation2 + $0xe8] sm:$0xf] }
 0x324   : > { %5928 = vmatmul.mubr.bf16.gmra.mrb[216].mxu1 %v3837_v17  ;;  %v10391_v32 = vpop.f32.mrb[123].mxu1  ;;  %v5528_v16 = vadd.f32 %v7401_v2, %v10383_v53  ;;  %v4391_v13 = vor.u32 %v4390_v34, %v4387_v35  ;;  %v4383_v60 = vor.u32 %v4382_v10, %v4379_v31  ;;  %v7407_v45 = vadd.f32 %v10310_v28, %v10307_v5  ;;  %v3882_v28 = vld [vmem:[#allocation2 + $0xe8] sm:$0x1f] }
 0x325   : > { %5935 = vmatprep.mubr.bf16.mxu1 %v4088_v21  ;;  %v10393_v11 = vpop.f32.mrb[180].mxu0  ;;  %v4375_v0 = vsel %vm2731_vm7, %v4366_v20, %v4374_v59  ;;  %v4574_v51 = vsel %vm3068_vm6, %v4572_v3, %v4573_v41  ;;  %v5531_v17 = vadd.f32 %v7404_v30, %v10383_v53  ;;  %v7513_v18 = vadd.f32 %v10334_v12, %v10327_v7  ;;  %v4196_v30 = vld [vmem:[#allocation2 + $0xd0] sm:$0xf8] }
 0x326   : > { %v10395_v23 = vpop.f32.mrb[181].mxu0  ;;  %v3840_v2 = vsel %vm3068_vm6, %v3838_v38, %v3839_v33  ;;  %v4105_v35 = vsel %vm307_vm2, %v4096_v52, %v4104_v29  ;;  %v10412_v34 = vrot.slane %v4402_v37, 3  ;;  %v10414_v5 = vrot.slane %v4405_v63, 4  ;;  %v10430_v38 = vld [vmem:[#allocation2 + $0xe0] sm:$0xf0] }
 0x327   : > { %v10398_v8 = vpop.f32.mrb[182].mxu0  ;;  %v4577_v59 = vsel %vm3068_vm6, %v4575_v1, %v4576_v61  ;;  %v10417_v3 = vadd.f32 %v7513_v18, %v5528_v16  ;;  %v7410_v7 = vadd.f32 %v10316_v56, %v10312_v62  ;;  %v7516_v12 = vadd.f32 %v10345_v50, %v10342_v48  ;;  %v8304_v50 = vld [vmem:[#allocation2 + $0xd8] sm:$0xf] }
 0x328   : > { %v7521_v54 = vpop.f32.mrb[183].mxu0  ;;  %v4392_v41 = vsel %vm2731_vm7, %v4383_v60, %v4391_v13  ;;  %v5536_v20 = vadd.f32 %v7407_v45, %v10383_v53  ;;  %v4107_v39 = vshrl.u32 %v10408_v24, 16  ;;  %v4110_v21 = vshll.u32 %v10408_v24, 16 }
 0x329   : > { %6081 = vmatmul.mubr.bf16.gmra.mrb[20].mxu0 %v4375_v0  ;;  %v10427_v25 = vadd.f32 %v7516_v12, %v5531_v17  ;;  %v3841_v47 = vrot.slane %v10360_v43, 4  ;;  %v4115_v62 = vshrl.u32 %v3882_v28, 16  ;;  %v4118_v56 = vshll.u32 %v3882_v28, 16  ;;  %v10457_v12 = vld [vmem:[#allocation2 + $0xf0] sm:$0xf0] }
 0x32a   : > { %6088 = vmatprep.mubr.bf16.mxu0 %v4574_v51  ;;  %v3842_v36 = vrot.slane %v8304_v50, 4  ;;  %v4109_v49 = vrot.slane %v4107_v39, 4  ;;  %v4112_v22 = vrot.slane %v4110_v21, 5  ;;  %v4394_v42 = vshrl.u32 %v4196_v30, 16 }
 0x32b   : > { %v4117_v40 = vrot.slane %v4115_v62, 4  ;;  %v4120_v58 = vrot.slane %v4118_v56, 5  ;;  %v4397_v9 = vshll.u32 %v4196_v30, 16  ;;  %v4419_v31 = vshrl.u32 %v4199_v55, 16  ;;  %v4201_v30 = vld [vmem:[#allocation2 + $0xf8] sm:$0xf] }
 0x32c   : > { %5936 = vmatmul.mubr.bf16.gmra.mrb[220].mxu1 %v3840_v2  ;;  %v4113_v43 = vor.u32 %v4112_v22, %v4109_v49  ;;  %v4396_v37 = vrot.slane %v4394_v42, 3  ;;  %v4422_v63 = vshll.u32 %v4199_v55, 16  ;;  %v4578_v52 = vrot.slane %v10430_v38, 4  ;;  %v10472_v49 = vld [vmem:[#allocation2 + $0xf0] sm:$0xf0] }
 0x32d   : > { %5943 = vmatprep.mubr.bf16.mxu1 %v4105_v35  ;;  %v10432_v48 = vpop.f32.mrb[124].mxu1  ;;  %v4121_v1 = vor.u32 %v4120_v58, %v4117_v40  ;;  %v4399_v61 = vrot.slane %v4397_v9, 4  ;;  %v10441_v16 = vrot.slane %v4419_v31, 3  ;;  %v4579_v13 = vrot.slane %v4199_v55, 4 }
 0x32e   : > { %v10434_v33 = vpop.f32.mrb[125].mxu1  ;;  %v10443_v60 = vrot.slane %v4422_v63, 4  ;;  %v7413_v45 = vadd.f32 %v10377_v4, %v10372_v27  ;;  %v7519_v0 = vadd.f32 %v10395_v23, %v10393_v11  ;;  %v10451_v51 = vadd.f32 %v10391_v32, %v10388_v15  ;;  %v3883_v27 = vld [vmem:[#allocation2 + $0xf8] sm:$0x1f] }
 0x32f   : > { %v10436_v10 = vpop.f32.mrb[126].mxu1  ;;  %v4779_v18 = vshll.u32 %v10319_v26, 16  ;;  %v5539_v2 = vadd.f32 %v7410_v7, %v10383_v53  ;;  %v3843_v35 = vsel %vm3068_vm6, %v3841_v47, %v3842_v36  ;;  %v7522_v28 = vadd.f32 %v7521_v54, %v10398_v8  ;;  %v8305_v47 = vld [vmem:[#allocation2 + $0xe8] sm:$0xf]  ;;  %v4200_v26 = vld [vmem:[#allocation2 + $0xf0] sm:$0xf8] }
 0x330   : > { %v10439_v29 = vpop.f32.mrb[127].mxu1  ;;  %v4408_v11 = vor.u32 %v10414_v5, %v10412_v34  ;;  %v4122_v15 = vsel %vm307_vm2, %v4113_v43, %v4121_v1  ;;  %v4400_v32 = vor.u32 %v4399_v61, %v4396_v37  ;;  %v10462_v23 = vadd.f32 %v7519_v0, %v5536_v20 }
 0x331   : > { %6089 = vmatmul.mubr.bf16.gmra.mrb[24].mxu0 %v4392_v41  ;;  %v7523_v17 = vpop.f32.mrb[184].mxu0  ;;  %v4425_v8 = vor.u32 %v10443_v60, %v10441_v16  ;;  %v4580_v54 = vsel %vm3068_vm6, %v4578_v52, %v4579_v13  ;;  %v10467_v41 = vadd.f32 %v7522_v28, %v5539_v2  ;;  %v3844_v39 = vrot.slane %v10408_v24, 4 }
 0x332   : > { %6096 = vmatprep.mubr.bf16.mxu0 %v4577_v59  ;;  %v7524_v4 = vpop.f32.mrb[185].mxu0  ;;  %v4198_v59 = vld [vmem:[#allocation2 + $0xe0] sm:$0xf8]  ;;  %v4124_v5 = vshrl.u32 %v10457_v12, 16  ;;  %v4127_v21 = vshll.u32 %v10457_v12, 16  ;;  %v4132_v20 = vshrl.u32 %v3883_v27, 16  ;;  %v4409_v24 = vsel %vm2731_vm7, %v4400_v32, %v4408_v11 }
 0x333   : > { %v7526_v7 = vpop.f32.mrb[186].mxu0  ;;  %v4135_v55 = vshll.u32 %v3883_v27, 16  ;;  %v3845_v62 = vrot.slane %v8305_v47, 4  ;;  %v4411_v56 = vshrl.u32 %v4198_v59, 16  ;;  %v4414_v50 = vshll.u32 %v4198_v59, 16 }
 0x334   : > { %5944 = vmatmul.mubr.bf16.gmra.mrb[224].mxu1 %v3843_v35  ;;  %v7527_v34 = vpop.f32.mrb[187].mxu0  ;;  %v4436_v36 = vshrl.u32 %v4201_v30, 16  ;;  %v4126_v22 = vrot.slane %v4124_v5, 4  ;;  %v4129_v42 = vrot.slane %v4127_v21, 5  ;;  %v4134_v40 = vrot.slane %v4132_v20, 4 }
 0x335   : > { %5951 = vmatprep.mubr.bf16.mxu1 %v4122_v15  ;;  %v4137_v58 = vrot.slane %v4135_v55, 5  ;;  %v4413_v9 = vrot.slane %v4411_v56, 3  ;;  %v4416_v31 = vrot.slane %v4414_v50, 4  ;;  %v4439_v43 = vshll.u32 %v4201_v30, 16  ;;  %v10487_v32 = vld [vmem:[#allocation2 + $0x100] sm:$0xf0] }
 0x336   : > { %v4130_v63 = vor.u32 %v4129_v42, %v4126_v22  ;;  %v4581_v1 = vrot.slane %v10472_v49, 4  ;;  %v4582_v61 = vrot.slane %v4201_v30, 4  ;;  %v3846_v13 = vsel %vm3068_vm6, %v3844_v39, %v3845_v62  ;;  %v3884_v5 = vld [vmem:[#allocation2 + $0x108] sm:$0x1f] }
 0x337   : > { %v4138_v52 = vor.u32 %v4137_v58, %v4134_v40  ;;  %v4417_v60 = vor.u32 %v4416_v31, %v4413_v9  ;;  %v10479_v0 = vrot.slane %v4436_v36, 3  ;;  %v10481_v2 = vrot.slane %v4439_v43, 4  ;;  %v4203_v47 = vld [vmem:[#allocation2 + $0x108] sm:$0xf] }
 0x338   : > { %v5544_v28 = vadd.f32 %v7413_v45, %v10383_v53  ;;  %v7419_v11 = vadd.f32 %v10434_v33, %v10432_v48  ;;  %v7525_v15 = vadd.f32 %v7524_v4, %v7523_v17  ;;  %v10491_v30 = vrot.slane %v4776_v57, 4 }
 0x339   : > { %v10475_v37 = vpop.f32.mrb[128].mxu1  ;;  %6097 = vmatmul.mubr.bf16.gmra.mrb[28].mxu0 %v4409_v24  ;;  %v4139_v27 = vsel %vm307_vm2, %v4130_v63, %v4138_v52  ;;  %v5547_v39 = vadd.f32 %v10451_v51, %v10383_v53  ;;  %v4583_v45 = vsel %vm3068_vm6, %v4581_v1, %v4582_v61  ;;  %v4426_v21 = vsel %vm2731_vm7, %v4417_v60, %v4425_v8  ;;  %v8306_v51 = vld [vmem:[#allocation2 + $0xf8] sm:$0xf] }
 0x33a   : > { %v7424_v16 = vpop.f32.mrb[129].mxu1  ;;  %6104 = vmatprep.mubr.bf16.mxu0 %v4580_v54  ;;  %v10493_v54 = vrot.slane %v4779_v18, 5  ;;  %v10499_v48 = vadd.f32 %v7525_v15, %v5544_v28  ;;  %v7422_v33 = vadd.f32 %v10439_v29, %v10436_v10  ;;  %v7528_v17 = vadd.f32 %v7527_v34, %v7526_v7  ;;  %v10511_v7 = vld [vmem:[#allocation2 + $0x100] sm:$0xf0] }
 0x33b   : > { %v7426_v35 = vpop.f32.mrb[130].mxu1  ;;  %v4442_v18 = vor.u32 %v10481_v2, %v10479_v0  ;;  %v3847_v4 = vrot.slane %v10457_v12, 4  ;;  %v3848_v20 = vrot.slane %v8306_v51, 4  ;;  %v4141_v55 = vshrl.u32 %v10487_v32, 16 }
 0x33c   : > { %5952 = vmatmul.mubr.bf16.gmra.mrb[228].mxu1 %v3846_v13  ;;  %v7427_v59 = vpop.f32.mrb[131].mxu1  ;;  %v5552_v8 = vadd.f32 %v7419_v11, %v10383_v53  ;;  %v10508_v56 = vadd.f32 %v7528_v17, %v5547_v39  ;;  %v4144_v10 = vshll.u32 %v10487_v32, 16  ;;  %v4149_v29 = vshrl.u32 %v3884_v5, 16 }
 0x33d   : > { %5959 = vmatprep.mubr.bf16.mxu1 %v4139_v27  ;;  %v7529_v57 = vpop.f32.mrb[188].mxu0  ;;  %v3849_v50 = vsel %vm3068_vm6, %v3847_v4, %v3848_v20  ;;  %v4143_v36 = vrot.slane %v4141_v55, 4  ;;  %v4152_v12 = vshll.u32 %v3884_v5, 16  ;;  %v4428_v22 = vshrl.u32 %v4200_v26, 16  ;;  %v4606_v55 = vld [vmem:[#allocation2 + $0x28] sm:$0x1f] }
 0x33e   : > { %v7530_v62 = vpop.f32.mrb[189].mxu0  ;;  %v4146_v40 = vrot.slane %v4144_v10, 5  ;;  %v4151_v58 = vrot.slane %v4149_v29, 4  ;;  %v4431_v24 = vshll.u32 %v4200_v26, 16  ;;  %v4453_v9 = vshrl.u32 %v4203_v47, 16 }
 0x33f   : > { %v7532_v34 = vpop.f32.mrb[190].mxu0  ;;  %v4154_v31 = vrot.slane %v4152_v12, 5  ;;  %v4430_v43 = vrot.slane %v4428_v22, 3  ;;  %v4456_v63 = vshll.u32 %v4203_v47, 16  ;;  %v4584_v52 = vrot.slane %v10511_v7, 4 }
 0x340   : > { %v7533_v42 = vpop.f32.mrb[191].mxu0  ;;  %v4147_v1 = vor.u32 %v4146_v40, %v4143_v36  ;;  %v4433_v61 = vrot.slane %v4431_v24, 4  ;;  %v10515_v13 = vrot.slane %v4453_v9, 3  ;;  %v4585_v60 = vrot.slane %v4203_v47, 4  ;;  %v8307_v47 = vld [vmem:[#allocation2 + $0x108] sm:$0xf] }
 0x341   : > { %6105 = vmatmul.mubr.bf16.gmra.mrb[32].mxu0 %v4426_v21  ;;  %v4155_v0 = vor.u32 %v4154_v31, %v4151_v58  ;;  %v10517_v2 = vrot.slane %v4456_v63, 4  ;;  %v7425_v28 = vadd.f32 %v7424_v16, %v10475_v37  ;;  %v7531_v27 = vadd.f32 %v7530_v62, %v7529_v57  ;;  %v4202_v21 = vld [vmem:[#allocation2 + $0x100] sm:$0xf8] }
 0x342   : > { %6112 = vmatprep.mubr.bf16.mxu0 %v4583_v45  ;;  %v5555_v15 = vadd.f32 %v7422_v33, %v10383_v53  ;;  %v4434_v39 = vor.u32 %v4433_v61, %v4430_v43  ;;  %v7428_v45 = vadd.f32 %v7427_v59, %v7426_v35  ;;  %v7534_v5 = vadd.f32 %v7533_v42, %v7532_v34  ;;  %v8308_v34 = vld [vmem:[#allocation2 + $0x20] sm:$0xf0] }
 0x343   : > { %v4156_v26 = vsel %vm307_vm2, %v4147_v1, %v4155_v0  ;;  %v4459_v4 = vor.u32 %v10517_v2, %v10515_v13  ;;  %v4586_v51 = vsel %vm3068_vm6, %v4584_v52, %v4585_v60  ;;  %v10525_v20 = vadd.f32 %v7531_v27, %v5552_v8 }
 0x344   : > { %5960 = vmatmul.mubr.bf16.gmra.mrb[232].mxu1 %v3849_v50  ;;  %v4443_v16 = vsel %vm2731_vm7, %v4434_v39, %v4442_v18  ;;  %v5560_v33 = vadd.f32 %v7425_v28, %v10383_v53  ;;  %v10529_v35 = vadd.f32 %v7534_v5, %v5555_v15  ;;  %v3850_v59 = vrot.slane %v10487_v32, 4  ;;  %v4205_v18 = vld [vmem:[#allocation2 + $0x118] sm:$0xf]  ;;  %v10534_v28 = vld [vmem:[#allocation2 + $0x110] sm:$0xf0] }
 0x345   : > { %v7429_v11 = vpop.f32.mrb[132].mxu1  ;;  %5967 = vmatprep.mubr.bf16.mxu1 %v4156_v26  ;;  %v3851_v62 = vrot.slane %v8307_v47, 4  ;;  %v4445_v10 = vshrl.u32 %v4202_v21, 16  ;;  %v4448_v29 = vshll.u32 %v4202_v21, 16  ;;  %v4623_v50 = vshrl.u32 %v8308_v34, 16 }
 0x346   : > { %v7430_v17 = vpop.f32.mrb[133].mxu1  ;;  %v4626_v8 = vshll.u32 %v8308_v34, 16  ;;  %v4631_v36 = vshrl.u32 %v4606_v55, 16  ;;  %v4634_v12 = vshll.u32 %v4606_v55, 16  ;;  %v5563_v31 = vadd.f32 %v7428_v45, %v10383_v53  ;;  %v4607_v5 = vld [vmem:[#allocation2 + $0x38] sm:$0x1f] }
 0x347   : > { %v7432_v37 = vpop.f32.mrb[134].mxu1  ;;  %v7431_v22 = vadd.f32 %v7430_v17, %v7429_v11  ;;  %v3852_v40 = vsel %vm3068_vm6, %v3850_v59, %v3851_v62  ;;  %v4447_v58 = vrot.slane %v4445_v10, 3  ;;  %v4450_v24 = vrot.slane %v4448_v29, 4 }
 0x348   : > { %v7433_v57 = vpop.f32.mrb[135].mxu1  ;;  %v4625_v32 = vrot.slane %v4623_v50, 4  ;;  %v4628_v43 = vrot.slane %v4626_v8, 5  ;;  %v4633_v63 = vrot.slane %v4631_v36, 4  ;;  %v4636_v52 = vrot.slane %v4634_v12, 5 }
 0x349   : > { %6113 = vmatmul.mubr.bf16.gmra.mrb[36].mxu0 %v4443_v16  ;;  %v7535_v42 = vpop.f32.mrb[192].mxu0  ;;  %v4451_v61 = vor.u32 %v4450_v24, %v4447_v58  ;;  %v7434_v60 = vadd.f32 %v7433_v57, %v7432_v37  ;;  %v4470_v2 = vshrl.u32 %v4205_v18, 16  ;;  %v4473_v39 = vshll.u32 %v4205_v18, 16 }
 0x34a   : > { %6120 = vmatprep.mubr.bf16.mxu0 %v4586_v51  ;;  %v7536_v9 = vpop.f32.mrb[193].mxu0  ;;  %v4629_v27 = vor.u32 %v4628_v43, %v4625_v32  ;;  %v4637_v11 = vor.u32 %v4636_v52, %v4633_v63  ;;  %v4642_v45 = vrot.slane %v4640_v6, 4  ;;  %v4645_v17 = vrot.slane %v4643_v14, 5  ;;  %v4204_v51 = vld [vmem:[#allocation2 + $0x110] sm:$0xf8] }
 0x34b   : > { %v7538_v1 = vpop.f32.mrb[194].mxu0  ;;  %v7537_v13 = vadd.f32 %v7536_v9, %v7535_v42  ;;  %v4782_v37 = vor.u32 %v10493_v54, %v10491_v30  ;;  %v4587_v57 = vrot.slane %v10534_v28, 4  ;;  %v4460_v62 = vsel %vm2731_vm7, %v4451_v61, %v4459_v4  ;;  %v8309_v9 = vld [vmem:[#allocation2 + $0x40] sm:$0xf0]  ;;  %v4620_v54 = vld [vmem:[#allocation2 + $0x108] sm:$0x1f] }
 0x34c   : > { %5968 = vmatmul.mubr.bf16.gmra.mrb[236].mxu1 %v3852_v40  ;;  %v7539_v0 = vpop.f32.mrb[195].mxu0  ;;  %v4638_v16 = vsel %vm307_vm2, %v4629_v27, %v4637_v11  ;;  %v4472_v6 = vrot.slane %v4470_v2, 3  ;;  %v4475_v44 = vrot.slane %v4473_v39, 4  ;;  %v4588_v14 = vrot.slane %v4205_v18, 4 }
 0x34d   : > { %v7540_v15 = vadd.f32 %v7539_v0, %v7538_v1  ;;  %v10540_v26 = vadd.f32 %v7537_v13, %v5560_v33  ;;  %7943 = vmatprep.mubr.bf16.mxu1 %v4638_v16  ;;  %v4608_v33 = vld [vmem:[#allocation2 + $0x48] sm:$0x1f]  ;;  %v4810_v29 = vshrl.u32 %v10386_v19, 16  ;;  %v4648_v34 = vshrl.u32 %v4607_v5, 16 }
 0x34e   : > { %v7435_v21 = vpop.f32.mrb[136].mxu1  ;;  %v4651_v50 = vshll.u32 %v4607_v5, 16  ;;  %v4462_v8 = vshrl.u32 %v4204_v51, 16  ;;  %v5568_v12 = vadd.f32 %v7431_v22, %v10383_v53  ;;  %v4589_v42 = vsel %vm3068_vm6, %v4587_v57, %v4588_v14 }
 0x34f   : > { %v7436_v55 = vpop.f32.mrb[137].mxu1  ;;  %v10545_v59 = vadd.f32 %v7540_v15, %v5563_v31  ;;  %v4646_v40 = vor.u32 %v4645_v17, %v4642_v45  ;;  %v4465_v58 = vshll.u32 %v4204_v51, 16  ;;  %v4650_v24 = vrot.slane %v4648_v34, 4  ;;  %v8276_v45 = vld [vmem:[%s10975_s5 + $0x8] sm:$0xff]  }
 0x350   : > { %v7438_v47 = vpop.f32.mrb[138].mxu1  ;;  %v4653_v32 = vrot.slane %v4651_v50, 5  ;;  %v4464_v18 = vrot.slane %v4462_v8, 3  ;;  %v4657_v31 = vshrl.u32 %v8309_v9, 16  ;;  %v4476_v63 = vor.u32 %v4475_v44, %v4472_v6  ;;  %v4609_v6 = vld [vmem:[#allocation2 + $0x58] sm:$0x1f] }
 0x351   : > { %v7439_v10 = vpop.f32.mrb[139].mxu1  ;;  %6121 = vmatmul.mubr.bf16.gmra.mrb[40].mxu0 %v4460_v62  ;;  %v7541_v36 = vpop.f32.mrb[196].mxu0  ;;  %v4467_v52 = vrot.slane %v4465_v58, 4  ;;  %v4660_v1 = vshll.u32 %v8309_v9, 16  ;;  %v4665_v61 = vshrl.u32 %v4608_v33, 16  ;;  %v4668_v22 = vshll.u32 %v4608_v33, 16 }
 0x352   : > { %v7542_v4 = vpop.f32.mrb[197].mxu0  ;;  %6128 = vmatprep.mubr.bf16.mxu0 %v4589_v42  ;;  %v4654_v0 = vor.u32 %v4653_v32, %v4650_v24  ;;  %v4659_v2 = vrot.slane %v4657_v31, 4  ;;  %v7437_v27 = vadd.f32 %v7436_v55, %v7435_v21  ;;  %v5571_v51 = vadd.f32 %v7434_v60, %v10383_v53  ;;  %v8310_v60 = vld [vmem:[%s10975_s5] sm:$0xff]   ;;  %v4610_v42 = vld [vmem:[#allocation2 + $0x68] sm:$0x1f]  ;;  %v8277_v9 = vld [vmem:[%s10975_s5 + $0x10] sm:$0xff]  }
 0x353   : > { %v7544_v43 = vpop.f32.mrb[198].mxu0  ;;  %v4468_v11 = vor.u32 %v4467_v52, %v4464_v18  ;;  %v4662_v15 = vrot.slane %v4660_v1, 5  ;;  %v4667_v39 = vrot.slane %v4665_v61, 4  ;;  %v7543_v5 = vadd.f32 %v7542_v4, %v7541_v36  ;;  %v8312_v24 = vld [vmem:[#allocation2 + $0x60] sm:$0xf0] }
 0x354   : > { %v7545_v13 = vpop.f32.mrb[199].mxu0  ;;  %v4655_v16 = vsel %vm307_vm2, %v4646_v40, %v4654_v0  ;;  %v4670_v57 = vrot.slane %v4668_v22, 5  ;;  %v7440_v62 = vadd.f32 %v7439_v10, %v7438_v47  ;;  %v5576_v8 = vadd.f32 %v7437_v27, %v10383_v53  ;;  %v8311_v47 = vld [vmem:[#allocation2 + $0x50] sm:$0xf0] }
 0x355   : > { %7944 = vmatmul.mubr.bf16.vlgmr.msra.gmra.mrb[240].mxu1 %v4655_v16  ;;  %v4477_v21 = vsel %vm2731_vm7, %v4468_v11, %v4476_v63  ;;  %v4663_v55 = vor.u32 %v4662_v15, %v4659_v2  ;;  %v10558_v14 = vadd.f32 %v7543_v5, %v5568_v12  ;;  %v7546_v33 = vadd.f32 %v7545_v13, %v7544_v43 }
 0x356   : > { %v4671_v50 = vor.u32 %v4670_v57, %v4667_v39  ;;  %7976 = vmatpush3.bf16.msra.mxu1 %v8310_v60  ;;  %v4674_v10 = vshrl.u32 %v8311_v47, 16  ;;  %v4677_v36 = vshll.u32 %v8311_v47, 16  ;;  %v4682_v12 = vshrl.u32 %v4609_v6, 16 }
 0x357   : > { %v7441_v17 = vpop.f32.mrb[140].mxu1  ;;  %v10564_v58 = vadd.f32 %v7546_v33, %v5571_v51  ;;  %v4685_v4 = vshll.u32 %v4609_v6, 16  ;;  %7977 = vmatprep.subr.bf16.mxu1 %v8276_v45  ;;  %v4691_v32 = vshrl.u32 %v8312_v24, 16  ;;  %v4694_v52 = vshll.u32 %v8312_v24, 16 }
 0x358   : > { %v7442_v44 = vpop.f32.mrb[141].mxu1  ;;  %v4672_v31 = vsel %vm307_vm2, %v4663_v55, %v4671_v50  ;;  %v4676_v43 = vrot.slane %v4674_v10, 4  ;;  %v4679_v63 = vrot.slane %v4677_v36, 5  ;;  %v4684_v61 = vrot.slane %v4682_v12, 4  ;;  %v8278_v10 = vld [vmem:[%s10975_s5 + $0x18] sm:$0xff]  }
 0x359   : > { %v7444_v34 = vpop.f32.mrb[142].mxu1  ;;  %6129 = vmatmul.mubr.bf16.gmra.mrb[44].mxu0 %v4477_v21  ;;  %7947 = vmatprep.mubr.bf16.mxu1 %v4672_v31  ;;  %v4687_v13 = vrot.slane %v4685_v4, 5  ;;  %v4693_v0 = vrot.slane %v4691_v32, 4  ;;  %v4699_v2 = vshrl.u32 %v4610_v42, 16  ;;  %v4696_v11 = vrot.slane %v4694_v52, 5 }
 0x35a   : > { %v7445_v40 = vpop.f32.mrb[143].mxu1  ;;  %v7547_v18 = vpop.f32.mrb[200].mxu0  ;;  %v4680_v27 = vor.u32 %v4679_v63, %v4676_v43  ;;  %v4702_v15 = vshll.u32 %v4610_v42, 16  ;;  %7978 = vmatpush3.bf16.msra.mxu1 %v8276_v45  ;;  %v7443_v39 = vadd.f32 %v7442_v44, %v7441_v17  ;;  %v4611_v21 = vld [vmem:[#allocation2 + $0x78] sm:$0x1f]  ;;  %v5579_v55 = vadd.f32 %v7440_v62, %v10383_v53 }
 0x35b   : > { %v7548_v1 = vpop.f32.mrb[201].mxu0  ;;  %v4688_v51 = vor.u32 %v4687_v13, %v4684_v61  ;;  %v4701_v16 = vrot.slane %v4699_v2, 4  ;;  %v7446_v6 = vadd.f32 %v7445_v40, %v7444_v34  ;;  %7979 = vmatprep.subr.bf16.mxu1 %v8277_v9  ;;  %v4697_v33 = vor.u32 %v4696_v11, %v4693_v0  ;;  %v8313_v36 = vld [vmem:[#allocation2 + $0x70] sm:$0xf0]  ;;  %v4612_v42 = vld [vmem:[#allocation2 + $0x88] sm:$0x1f] }
 0x35c   : > { %v7550_v22 = vpop.f32.mrb[202].mxu0  ;;  %v7549_v57 = vadd.f32 %v7548_v1, %v7547_v18  ;;  %v4704_v50 = vrot.slane %v4702_v15, 5  ;;  %v5584_v17 = vadd.f32 %v7443_v39, %v10383_v53  ;;  %v4708_v34 = vshrl.u32 %v8313_v36, 16  ;;  %v8314_v43 = vld [vmem:[#allocation2 + $0x80] sm:$0xf0] }
 0x35d   : > { %v7551_v5 = vpop.f32.mrb[203].mxu0  ;;  %v4689_v45 = vsel %vm307_vm2, %v4680_v27, %v4688_v51  ;;  %v4711_v4 = vshll.u32 %v8313_v36, 16  ;;  %v4716_v24 = vshrl.u32 %v4611_v21, 16  ;;  %v4719_v31 = vshll.u32 %v4611_v21, 16  ;;  %v4613_v36 = vld [vmem:[#allocation2 + $0x98] sm:$0x1f] }
 0x35e   : > { %v7552_v60 = vadd.f32 %v7551_v5, %v7550_v22  ;;  %v10576_v44 = vadd.f32 %v7549_v57, %v5576_v8  ;;  %7948 = vmatmul.mubr.bf16.gmra.mrb[244].mxu1 %v4689_v45  ;;  %v4705_v62 = vor.u32 %v4704_v50, %v4701_v16  ;;  %v4710_v18 = vrot.slane %v4708_v34, 4  ;;  %v8279_v22 = vld [vmem:[%s10975_s5 + $0x20] sm:$0xff]  }
 0x35f   : > { %v4725_v63 = vshrl.u32 %v8314_v43, 16  ;;  %v4728_v52 = vshll.u32 %v8314_v43, 16  ;;  %7980 = vmatpush3.bf16.msra.mxu1 %v8277_v9  ;;  %v4713_v61 = vrot.slane %v4711_v4, 5  ;;  %v4718_v13 = vrot.slane %v4716_v24, 4  ;;  %v8315_v24 = vld [vmem:[#allocation2 + $0x90] sm:$0xf0] }
 0x360   : > { %v7447_v47 = vpop.f32.mrb[144].mxu1  ;;  %v10578_v12 = vadd.f32 %v7552_v60, %v5579_v55  ;;  %v4706_v8 = vsel %vm307_vm2, %v4697_v33, %v4705_v62  ;;  %v4733_v0 = vshrl.u32 %v4612_v42, 16  ;;  %7981 = vmatprep.subr.bf16.mxu1 %v8278_v10  ;;  %v4721_v27 = vrot.slane %v4719_v31, 5  ;;  %v4614_v43 = vld [vmem:[#allocation2 + $0xa8] sm:$0x1f] }
 0x361   : > { %v7448_v40 = vpop.f32.mrb[145].mxu1  ;;  %7951 = vmatprep.mubr.bf16.mxu1 %v4706_v8  ;;  %v4727_v11 = vrot.slane %v4725_v63, 4  ;;  %v4730_v15 = vrot.slane %v4728_v52, 5  ;;  %v4736_v39 = vshll.u32 %v4612_v42, 16  ;;  %v4714_v51 = vor.u32 %v4713_v61, %v4710_v18 }
 0x362   : > { %v7450_v32 = vpop.f32.mrb[146].mxu1  ;;  %v4735_v9 = vrot.slane %v4733_v0, 4  ;;  %v7449_v16 = vadd.f32 %v7448_v40, %v7447_v47  ;;  %v4722_v55 = vor.u32 %v4721_v27, %v4718_v13  ;;  %v5587_v34 = vadd.f32 %v7446_v6, %v10383_v53  ;;  %v8280_v47 = vld [vmem:[%s10975_s5 + $0x28] sm:$0xff]   ;;  %v8316_v13 = vld [vmem:[#allocation2 + $0xa0] sm:$0xf0] }
 0x363   : > { %v7451_v1 = vpop.f32.mrb[147].mxu1  ;;  %v7553_v2 = vpop.f32.mrb[204].mxu0  ;;  %v4731_v33 = vor.u32 %v4730_v15, %v4727_v11  ;;  %v4738_v50 = vrot.slane %v4736_v39, 5  ;;  %7982 = vmatpush3.bf16.msra.mxu1 %v8278_v10  ;;  %v4742_v42 = vshrl.u32 %v8315_v24, 16  ;;  %v4813_v40 = vshll.u32 %v10386_v19, 16 }
 0x364   : > { %v7554_v5 = vpop.f32.mrb[205].mxu0  ;;  %v7452_v60 = vadd.f32 %v7451_v1, %v7450_v32  ;;  %7983 = vmatprep.subr.bf16.mxu1 %v8279_v22  ;;  %v4723_v18 = vsel %vm307_vm2, %v4714_v51, %v4722_v55  ;;  %v4745_v31 = vshll.u32 %v8315_v24, 16  ;;  %v4750_v63 = vshrl.u32 %v4613_v36, 16  ;;  %v4615_v11 = vld [vmem:[#allocation2 + $0xb8] sm:$0x1f] }
 0x365   : > { %v7555_v57 = vadd.f32 %v7554_v5, %v7553_v2  ;;  %v7556_v21 = vpop.f32.mrb[206].mxu0  ;;  %v4739_v32 = vor.u32 %v4738_v50, %v4735_v9  ;;  %v4753_v52 = vshll.u32 %v4613_v36, 16  ;;  %v4759_v0 = vshrl.u32 %v8316_v13, 16 }
 0x366   : > { %v7557_v45 = vpop.f32.mrb[207].mxu0  ;;  %7952 = vmatmul.mubr.bf16.gmra.mrb[248].mxu1 %v4723_v18  ;;  %v4747_v61 = vrot.slane %v4745_v31, 5  ;;  %v4762_v2 = vshll.u32 %v8316_v13, 16  ;;  %v4752_v15 = vrot.slane %v4750_v63, 4  ;;  %v4767_v5 = vshrl.u32 %v4614_v43, 16  ;;  %v8282_v13 = vld [vmem:[%s10975_s5 + $0x38] sm:$0xff]  }
 0x367   : > { %v10585_v62 = vadd.f32 %v7555_v57, %v5584_v17  ;;  %v7558_v4 = vadd.f32 %v7557_v45, %v7556_v21  ;;  %v4744_v17 = vrot.slane %v4742_v42, 4  ;;  %v4740_v8 = vsel %vm307_vm2, %v4731_v33, %v4739_v32  ;;  %7984 = vmatpush3.bf16.msra.mxu1 %v8279_v22  ;;  %v8281_v57 = vld [vmem:[%s10975_s5 + $0x30] sm:$0xff]   ;;  %v4616_v63 = vld [vmem:[#allocation2 + $0xc8] sm:$0x1f] }
 0x368   : > { %7955 = vmatprep.mubr.bf16.mxu1 %v4740_v8  ;;  %v4755_v39 = vrot.slane %v4753_v52, 5  ;;  %v4770_v51 = vshll.u32 %v4614_v43, 16  ;;  %7985 = vmatprep.subr.bf16.mxu1 %v8280_v47  ;;  %v4761_v55 = vrot.slane %v4759_v0, 4  ;;  %v4764_v33 = vrot.slane %v4762_v2, 5 }
 0x369   : > { %v7453_v10 = vpop.f32.mrb[148].mxu1  ;;  %v10592_v6 = vadd.f32 %v7558_v4, %v5587_v34  ;;  %v4748_v21 = vor.u32 %v4747_v61, %v4744_v17  ;;  %v4769_v34 = vrot.slane %v4767_v5, 4  ;;  %v5592_v42 = vadd.f32 %v7449_v16, %v10383_v53  ;;  %v4617_v61 = vld [vmem:[#allocation2 + $0xd8] sm:$0x1f] }
 0x36a   : > { %v7454_v1 = vpop.f32.mrb[149].mxu1  ;;  %v4756_v36 = vor.u32 %v4755_v39, %v4752_v15  ;;  %v4772_v4 = vrot.slane %v4770_v51, 5  ;;  %v4765_v18 = vor.u32 %v4764_v33, %v4761_v55  ;;  %v4784_v43 = vshrl.u32 %v4615_v11, 16 }
 0x36b   : > { %v7456_v27 = vpop.f32.mrb[150].mxu1  ;;  %v7455_v50 = vadd.f32 %v7454_v1, %v7453_v10  ;;  %7986 = vmatpush3.bf16.msra.mxu1 %v8280_v47  ;;  %v5595_v52 = vadd.f32 %v7452_v60, %v10383_v53  ;;  %v4787_v1 = vshll.u32 %v4615_v11, 16  ;;  %v4796_v15 = vshll.u32 %v10356_v46, 16 }
 0x36c   : > { %v7457_v9 = vpop.f32.mrb[151].mxu1  ;;  %v7559_v45 = vpop.f32.mrb[208].mxu0  ;;  %v4757_v17 = vsel %vm307_vm2, %v4748_v21, %v4756_v36  ;;  %v4773_v8 = vor.u32 %v4772_v4, %v4769_v34  ;;  %7987 = vmatprep.subr.bf16.mxu1 %v8281_v57  ;;  %v4786_v2 = vrot.slane %v4784_v43, 4  ;;  %v4801_v39 = vshrl.u32 %v4616_v63, 16 }
 0x36d   : > { %v7560_v22 = vpop.f32.mrb[209].mxu0  ;;  %v7458_v24 = vadd.f32 %v7457_v9, %v7456_v27  ;;  %v4793_v27 = vshrl.u32 %v10356_v46, 16  ;;  %v4789_v47 = vrot.slane %v4787_v1, 5  ;;  %v4804_v9 = vshll.u32 %v4616_v63, 16 }
 0x36e   : > { %v7561_v32 = vadd.f32 %v7560_v22, %v7559_v45  ;;  %v7562_v31 = vpop.f32.mrb[210].mxu0  ;;  %7956 = vmatmul.mubr.bf16.gmra.mrb[252].mxu1 %v4757_v17  ;;  %v4774_v60 = vsel %vm307_vm2, %v4765_v18, %v4773_v8  ;;  %v4818_v55 = vshrl.u32 %v4617_v61, 16  ;;  %v10613_v33 = vrot.slane %v4810_v29, 4 }
 0x36f   : > { %v7563_v10 = vpop.f32.mrb[211].mxu0  ;;  %7959 = vmatprep.mubr.bf16.mxu1 %v4774_v60  ;;  %v4795_v51 = vrot.slane %v4793_v27, 4  ;;  %7988 = vmatpush3.bf16.msra.mxu1 %v8281_v57  ;;  %v4798_v45 = vrot.slane %v4796_v15, 5  ;;  %v4803_v36 = vrot.slane %v4801_v39, 4  ;;  %v4790_v46 = vor.u32 %v4789_v47, %v4786_v2  ;;  %v4619_v15 = vld [vmem:[#allocation2 + $0xf8] sm:$0x1f] }
 0x370   : > { %v10604_v16 = vadd.f32 %v7561_v32, %v5592_v42  ;;  %v7564_v0 = vadd.f32 %v7563_v10, %v7562_v31  ;;  %7989 = vmatprep.subr.bf16.mxu1 %v8282_v13  ;;  %v4806_v22 = vrot.slane %v4804_v9, 5  ;;  %v4821_v18 = vshll.u32 %v4617_v61, 16  ;;  %v4618_v32 = vld [vmem:[#allocation2 + $0xe8] sm:$0x1f] }
 0x371   : > { %v4827_v31 = vshrl.u32 %v10430_v38, 16  ;;  %v4815_v57 = vrot.slane %v4813_v40, 5  ;;  %v5600_v43 = vadd.f32 %v7455_v50, %v10383_v53  ;;  %v4799_v29 = vor.u32 %v4798_v45, %v4795_v51 }
 0x372   : > { %v7459_v11 = vpop.f32.mrb[152].mxu1  ;;  %v10609_v5 = vadd.f32 %v7564_v0, %v5595_v52  ;;  %v5603_v17 = vadd.f32 %v7458_v24, %v10383_v53  ;;  %v4807_v8 = vor.u32 %v4806_v22, %v4803_v36  ;;  %v4820_v1 = vrot.slane %v4818_v55, 4 }
 0x373   : > { %v7460_v21 = vpop.f32.mrb[153].mxu1  ;;  %v4830_v0 = vshll.u32 %v10430_v38, 16  ;;  %7990 = vmatpush3.bf16.msra.mxu1 %v8282_v13  ;;  %v4823_v27 = vrot.slane %v4821_v18, 5  ;;  %v4835_v60 = vshrl.u32 %v4618_v32, 16  ;;  %v4838_v47 = vshll.u32 %v4618_v32, 16 }
 0x374   : > { %v10615_v34 = vadd.f32 %v7460_v21, %v7459_v11  ;;  %v7462_v4 = vpop.f32.mrb[154].mxu1  ;;  %v4791_v19 = vsel %vm307_vm2, %v4782_v37, %v4790_v46  ;;  %v4808_v40 = vsel %vm307_vm2, %v4799_v29, %v4807_v8  ;;  %v4829_v53 = vrot.slane %v4827_v31, 4 }
 0x375   : > { %v7463_v42 = vpop.f32.mrb[155].mxu1  ;;  %v7565_v63 = vpop.f32.mrb[212].mxu0  ;;  %v4832_v24 = vrot.slane %v4830_v0, 5  ;;  %v4837_v13 = vrot.slane %v4835_v60, 4  ;;  %v4840_v11 = vrot.slane %v4838_v47, 5  ;;  %v4844_v51 = vshrl.u32 %v10472_v49, 16 }
 0x376   : > { %v7464_v52 = vadd.f32 %v7463_v42, %v7462_v4  ;;  %v7566_v10 = vpop.f32.mrb[213].mxu0  ;;  %7960 = vmatmul.mubr.bf16.gmra.mrb[0].mxu1 %v4791_v19  ;;  %v4847_v9 = vshll.u32 %v10472_v49, 16  ;;  %v4816_v37 = vor.u32 %v4815_v57, %v10613_v33  ;;  %v4824_v55 = vor.u32 %v4823_v27, %v4820_v1  ;;  %v10642_v1 = vld [vmem:[%s10974_s4] ss:$0 sm:$0xff]  ;;  %v4621_v27 = vld [vmem:[#allocation2 + $0x118] sm:$0x1f] }
 0x377   : > { %v7567_v61 = vadd.f32 %v7566_v10, %v7565_v63  ;;  %v7568_v2 = vpop.f32.mrb[214].mxu0  ;;  %7963 = vmatprep.mubr.bf16.mxu1 %v4808_v40  ;;  %v4852_v36 = vshrl.u32 %v4619_v15, 16  ;;  %v4833_v4 = vor.u32 %v4832_v24, %v4829_v53  ;;  %v4841_v46 = vor.u32 %v4840_v11, %v4837_v13 }
 0x378   : > { %v7569_v50 = vpop.f32.mrb[215].mxu0  ;;  %v4855_v18 = vshll.u32 %v4619_v15, 16  ;;  %v4861_v31 = vshrl.u32 %v10511_v7, 16  ;;  %v4864_v49 = vshll.u32 %v10511_v7, 16  ;;  %v4872_v29 = vshll.u32 %v4620_v54, 16 }
 0x379   : > { %v10628_v39 = vadd.f32 %v7567_v61, %v5600_v43  ;;  %v7570_v38 = vadd.f32 %v7569_v50, %v7568_v2  ;;  %v4869_v43 = vshrl.u32 %v4620_v54, 16  ;;  %v4846_v63 = vrot.slane %v4844_v51, 4 }
 0x37a   : > { %v4849_v8 = vrot.slane %v4847_v9, 5  ;;  %v4878_v33 = vshrl.u32 %v10534_v28, 16  ;;  %v4881_v10 = vshll.u32 %v10534_v28, 16  ;;  %v5608_v0 = vadd.f32 %v10642_v1, %v10615_v34 }
 0x37b   : > { %v7465_v30 = vpop.f32.mrb[156].mxu1  ;;  %v10633_v21 = vadd.f32 %v7570_v38, %v5603_v17  ;;  %v5611_v7 = vadd.f32 %v10642_v1, %v7464_v52  ;;  %v4825_v61 = vsel %vm307_vm2, %v4816_v37, %v4824_v55  ;;  %v4842_v60 = vsel %vm307_vm2, %v4833_v4, %v4841_v46 }
 0x37c   : > { %v7466_v45 = vpop.f32.mrb[157].mxu1  ;;  %v4854_v40 = vrot.slane %v4852_v36, 4  ;;  %v4857_v28 = vrot.slane %v4855_v18, 5  ;;  %v4863_v53 = vrot.slane %v4861_v31, 4  ;;  %v4866_v24 = vrot.slane %v4864_v49, 5 }
 0x37d   : > { %v7467_v22 = vadd.f32 %v7466_v45, %v7465_v30  ;;  %v7468_v42 = vpop.f32.mrb[158].mxu1  ;;  %v4871_v15 = vrot.slane %v4869_v43, 4  ;;  %v4874_v38 = vrot.slane %v4872_v29, 5  ;;  %v4886_v13 = vshrl.u32 %v4621_v27, 16 }
 0x37e   : > { %v7469_v32 = vpop.f32.mrb[159].mxu1  ;;  %v7571_v57 = vpop.f32.mrb[216].mxu0  ;;  %7964 = vmatmul.mubr.bf16.gmra.mrb[4].mxu1 %v4825_v61  ;;  %v4889_v11 = vshll.u32 %v4621_v27, 16  ;;  %v4850_v9 = vor.u32 %v4849_v8, %v4846_v63  ;;  %v4858_v54 = vor.u32 %v4857_v28, %v4854_v40  ;;  %v4867_v55 = vor.u32 %v4866_v24, %v4863_v53 }
 0x37f   : > { %v7470_v17 = vadd.f32 %v7469_v32, %v7468_v42  ;;  %v7572_v2 = vpop.f32.mrb[217].mxu0  ;;  %7967 = vmatprep.mubr.bf16.mxu1 %v4842_v60  ;;  %v4875_v45 = vor.u32 %v4874_v38, %v4871_v15  ;;  %v4880_v46 = vrot.slane %v4878_v33, 4  ;;  %v4883_v42 = vrot.slane %v4881_v10, 5 }
 0x380   : > { %v7573_v47 = vadd.f32 %v7572_v2, %v7571_v57  ;;  %v7574_v19 = vpop.f32.mrb[218].mxu0  ;;  %v4888_v32 = vrot.slane %v4886_v13, 4  ;;  %v4891_v31 = vrot.slane %v4889_v11, 5  ;;  %v4859_v29 = vsel %vm307_vm2, %v4850_v9, %v4858_v54  ;;  %v11060_v11 = vld [vmem:[#allocation3_spill] sm:$0xff] }
 0x381   : > { %v7575_v50 = vpop.f32.mrb[219].mxu0  ;;  %v5616_v63 = vadd.f32 %v10642_v1, %v7467_v22  ;;  %v4876_v8 = vsel %vm307_vm2, %v4867_v55, %v4875_v45  ;;  %v4884_v61 = vor.u32 %v4883_v42, %v4880_v46  ;;  %v5619_v10 = vadd.f32 %v10642_v1, %v7470_v17 }
 0x382   : > { %v10649_v34 = vadd.f32 %v7573_v47, %v5608_v0  ;;  %v7576_v52 = vadd.f32 %v7575_v50, %v7574_v19  ;;  %v4892_v33 = vor.u32 %v4891_v31, %v4888_v32  ;;  %v11061_v32 = vld [vmem:[#allocation4_spill] sm:$0xff] }
 0x384   : > { %v7471_v51 = vpop.f32.mrb[160].mxu1  ;;  %v10651_v30 = vadd.f32 %v7576_v52, %v5611_v7  ;;  %v4893_v22 = vsel %vm307_vm2, %v4884_v61, %v4892_v33 }
 0x385   : > { %v7472_v37 = vpop.f32.mrb[161].mxu1 }
 0x386   : > { %v7473_v36 = vadd.f32 %v7472_v37, %v7471_v51  ;;  %v7474_v4 = vpop.f32.mrb[162].mxu1  ;;  %7968 = vmatmul.mubr.bf16.gmra.mrb[8].mxu1 %v4859_v29  ;;  %v11062_v29 = vld [vmem:[#allocation5_spill] sm:$0xff] }
 0x387   : > { %v7475_v18 = vpop.f32.mrb[163].mxu1  ;;  %v7577_v49 = vpop.f32.mrb[220].mxu0  ;;  %7971 = vmatprep.mubr.bf16.mxu1 %v4876_v8 }
 0x388   : > { %v7476_v43 = vadd.f32 %v7475_v18, %v7474_v4  ;;  %v7578_v57 = vpop.f32.mrb[221].mxu0  ;;  %v5624_v52 = vadd.f32 %v10642_v1, %v7473_v36 }
 0x389   : > { %v7579_v0 = vadd.f32 %v7578_v57, %v7577_v49  ;;  %v7580_v7 = vpop.f32.mrb[222].mxu0 }
 0x38a   : > { %v7581_v2 = vpop.f32.mrb[223].mxu0  ;;  %v5627_v9 = vadd.f32 %v10642_v1, %v7476_v43 }
 0x38b   : > { %v10657_v27 = vadd.f32 %v7579_v0, %v5616_v63  ;;  %v7582_v60 = vadd.f32 %v7581_v2, %v7580_v7 }
 0x38d   : > { %v7477_v47 = vpop.f32.mrb[164].mxu1  ;;  %v10659_v19 = vadd.f32 %v7582_v60, %v5619_v10 }
 0x38e   : > { %v7478_v40 = vpop.f32.mrb[165].mxu1  ;;  %7972 = vmatmul.mubr.bf16.gmra.mrb[12].mxu1 %v4893_v22 }
 0x38f   : > { %v7479_v28 = vadd.f32 %v7478_v40, %v7477_v47  ;;  %v7480_v50 = vpop.f32.mrb[166].mxu1  ;;  %7991 = vmatprep.mubr.bf16.mxu1 %v11060_v11  ;;  %v11063_v40 = vld [vmem:[#allocation6_spill] sm:$0xff] }
 0x390   : > { %v7481_v53 = vpop.f32.mrb[167].mxu1  ;;  %v7583_v24 = vpop.f32.mrb[224].mxu0 }
 0x391   : > { %v7482_v15 = vadd.f32 %v7481_v53, %v7480_v50  ;;  %v7584_v38 = vpop.f32.mrb[225].mxu0  ;;  %v5632_v57 = vadd.f32 %v10642_v1, %v7479_v28 }
 0x392   : > { %v7585_v13 = vadd.f32 %v7584_v38, %v7583_v24  ;;  %v7586_v17 = vpop.f32.mrb[226].mxu0  ;;  %v11064_v24 = vld [vmem:[#allocation8_spill] sm:$0xff] }
 0x393   : > { %v7587_v51 = vpop.f32.mrb[227].mxu0  ;;  %v5635_v0 = vadd.f32 %v10642_v1, %v7482_v15 }
 0x394   : > { %v10665_v54 = vadd.f32 %v7585_v13, %v5624_v52  ;;  %v7588_v37 = vadd.f32 %v7587_v51, %v7586_v17 }
 0x396   : > { %v7483_v55 = vpop.f32.mrb[168].mxu1  ;;  %v10667_v45 = vadd.f32 %v7588_v37, %v5627_v9  ;;  %7992 = vmatmul.mubr.bf16.vlgmr.msra.gmra.mrb[240].mxu1 %v11061_v32 }
 0x397   : > { %v7484_v4 = vpop.f32.mrb[169].mxu1  ;;  %7995 = vmatprep.mubr.bf16.mxu1 %v11062_v29  ;;  %v11066_v29 = vld [vmem:[#allocation12_spill] sm:$0xff] }
 0x398   : > { %v7485_v46 = vadd.f32 %v7484_v4, %v7483_v55  ;;  %v7486_v42 = vpop.f32.mrb[170].mxu1 }
 0x399   : > { %v7487_v18 = vpop.f32.mrb[171].mxu1  ;;  %v7589_v36 = vpop.f32.mrb[228].mxu0 }
 0x39a   : > { %v7488_v31 = vadd.f32 %v7487_v18, %v7486_v42  ;;  %v7590_v49 = vpop.f32.mrb[229].mxu0  ;;  %v5640_v38 = vadd.f32 %v10642_v1, %v7485_v46  ;;  %v11065_v18 = vld [vmem:[#allocation11_spill] sm:$0xff] }
 0x39b   : > { %v7591_v43 = vadd.f32 %v7590_v49, %v7589_v36  ;;  %v7592_v63 = vpop.f32.mrb[230].mxu0 }
 0x39c   : > { %v7593_v8 = vpop.f32.mrb[231].mxu0  ;;  %v5643_v17 = vadd.f32 %v10642_v1, %v7488_v31 }
 0x39d   : > { %v10673_v7 = vadd.f32 %v7591_v43, %v5632_v57  ;;  %v7594_v61 = vadd.f32 %v7593_v8, %v7592_v63 }
 0x39e   : > { %7996 = vmatmul.mubr.bf16.gmra.mrb[244].mxu1 %v11063_v40 }
 0x39f   : > { %v7489_v2 = vpop.f32.mrb[172].mxu1  ;;  %v10675_v33 = vadd.f32 %v7594_v61, %v5635_v0  ;;  %7999 = vmatprep.mubr.bf16.mxu1 %v11064_v24 }
 0x3a0   : > { %v7490_v10 = vpop.f32.mrb[173].mxu1 }
 0x3a1   : > { %v7491_v60 = vadd.f32 %v7490_v10, %v7489_v2  ;;  %v7492_v47 = vpop.f32.mrb[174].mxu1  ;;  %v7595_v22 = vpop.f32.mrb[232].mxu0 }
 0x3a2   : > { %v7493_v50 = vpop.f32.mrb[175].mxu1  ;;  %v7596_v53 = vpop.f32.mrb[233].mxu0 }
 0x3a3   : > { %v7494_v28 = vadd.f32 %v7493_v50, %v7492_v47  ;;  %v7597_v15 = vadd.f32 %v7596_v53, %v7595_v22  ;;  %v7598_v52 = vpop.f32.mrb[234].mxu0  ;;  %v5648_v57 = vadd.f32 %v10642_v1, %v7491_v60  ;;  %v11067_v53 = vld [vmem:[#allocation16_spill] sm:$0xff] }
 0x3a4   : > { %v7599_v13 = vpop.f32.mrb[235].mxu0 }
 0x3a5   : > { %v10681_v11 = vadd.f32 %v7597_v15, %v5640_v38  ;;  %v7600_v51 = vadd.f32 %v7599_v13, %v7598_v52  ;;  %v5651_v61 = vadd.f32 %v10642_v1, %v7494_v28 }
 0x3a6   : > { %8000 = vmatmul.mubr.bf16.gmra.mrb[248].mxu1 %v11065_v18  ;;  %v11069_v18 = vld [vmem:[#allocation20_spill] sm:$0xff] }
 0x3a7   : > { %v7623_v9 = vpop.f32.mrb[176].mxu1  ;;  %v10683_v37 = vadd.f32 %v7600_v51, %v5643_v17  ;;  %8003 = vmatprep.mubr.bf16.mxu1 %v11066_v29 }
 0x3a8   : > { %v7624_v55 = vpop.f32.mrb[177].mxu1 }
 0x3a9   : > { %v7625_v4 = vadd.f32 %v7624_v55, %v7623_v9  ;;  %v7626_v42 = vpop.f32.mrb[178].mxu1 }
 0x3aa   : > { %v7627_v32 = vpop.f32.mrb[179].mxu1 }
 0x3ab   : > { %v7601_v36 = vpop.f32.mrb[236].mxu0  ;;  %v10687_v46 = vadd.f32 %v7625_v4, %v10417_v3  ;;  %v7628_v49 = vadd.f32 %v7627_v32, %v7626_v42 }
 0x3ac   : > { %v7602_v31 = vpop.f32.mrb[237].mxu0 }
 0x3ad   : > { %v7603_v43 = vadd.f32 %v7602_v31, %v7601_v36  ;;  %v7604_v63 = vpop.f32.mrb[238].mxu0  ;;  %v10692_v8 = vadd.f32 %v7628_v49, %v10427_v25  ;;  %v11068_v25 = vld [vmem:[#allocation18_spill] sm:$0xff] }
 0x3ae   : > { %v7605_v0 = vpop.f32.mrb[239].mxu0  ;;  %8004 = vmatmul.mubr.bf16.gmra.mrb[252].mxu1 %v11067_v53 }
 0x3af   : > { %v10695_v2 = vadd.f32 %v7603_v43, %v5648_v57  ;;  %v7606_v10 = vadd.f32 %v7605_v0, %v7604_v63  ;;  %v7629_v47 = vpop.f32.mrb[180].mxu1  ;;  %8007 = vmatprep.mubr.bf16.mxu1 %v11068_v25 }
 0x3b0   : > { %v7630_v3 = vpop.f32.mrb[181].mxu1 }
 0x3b1   : > { %v10697_v40 = vadd.f32 %v7606_v10, %v5651_v61  ;;  %v7631_v22 = vadd.f32 %v7630_v3, %v7629_v47  ;;  %v7632_v50 = vpop.f32.mrb[182].mxu1 }
 0x3b2   : > { %v7633_v60 = vpop.f32.mrb[183].mxu1 }
 0x3b3   : > { %v5858_v24 = vadd.f32 %v7631_v22, %v10462_v23  ;;  %v7634_v38 = vadd.f32 %v7633_v60, %v7632_v50  ;;  %v11072_v60 = vld [vmem:[#allocation24_spill] sm:$0xff] }
 0x3b4   : > { %v7735_v15 = vpop.f32.mrb[240].mxu0 }
 0x3b5   : > { %v10703_v1 = vadd.f32 %v7634_v38, %v10467_v41  ;;  %v7736_v28 = vpop.f32.mrb[241].mxu0  ;;  %v11070_v41 = vld [vmem:[#allocation21_spill] sm:$0xff] }
 0x3b6   : > { %v10705_v52 = vadd.f32 %v7736_v28, %v7735_v15  ;;  %v7738_v13 = vpop.f32.mrb[242].mxu0  ;;  %8008 = vmatmul.mubr.bf16.gmra.mrb[0].mxu1 %v11069_v18 }
 0x3b7   : > { %v7635_v17 = vpop.f32.mrb[184].mxu1  ;;  %v7739_v51 = vpop.f32.mrb[243].mxu0  ;;  %8011 = vmatprep.mubr.bf16.mxu1 %v11070_v41 }
 0x3b8   : > { %v7636_v9 = vpop.f32.mrb[185].mxu1  ;;  %v10707_v55 = vadd.f32 %v7739_v51, %v7738_v13 }
 0x3b9   : > { %v7637_v4 = vadd.f32 %v7636_v9, %v7635_v17  ;;  %v7638_v42 = vpop.f32.mrb[186].mxu1 }
 0x3ba   : > { %v7639_v23 = vpop.f32.mrb[187].mxu1 }
 0x3bb   : > { %v10711_v32 = vadd.f32 %v7637_v4, %v10499_v48  ;;  %v7640_v36 = vadd.f32 %v7639_v23, %v7638_v42  ;;  %v11071_v48 = vld [vmem:[#allocation23_spill] sm:$0xff] }
 0x3bc   : > { %v7741_v49 = vpop.f32.mrb[244].mxu0 }
 0x3bd   : > { %v10715_v29 = vadd.f32 %v7640_v36, %v10508_v56  ;;  %v7742_v31 = vpop.f32.mrb[245].mxu0 }
 0x3be   : > { %v7743_v57 = vadd.f32 %v7742_v31, %v7741_v49  ;;  %v7744_v43 = vpop.f32.mrb[246].mxu0  ;;  %8012 = vmatmul.mubr.bf16.gmra.mrb[4].mxu1 %v11071_v48 }
 0x3bf   : > { %v7641_v63 = vpop.f32.mrb[188].mxu1  ;;  %v7745_v0 = vpop.f32.mrb[247].mxu0  ;;  %8015 = vmatprep.mubr.bf16.mxu1 %v11072_v60 }
 0x3c0   : > { %v7642_v61 = vpop.f32.mrb[189].mxu1  ;;  %v10717_v10 = vadd.f32 %v7745_v0, %v7744_v43  ;;  %v10719_v22 = vadd.f32 %v7743_v57, %v5858_v24 }
 0x3c1   : > { %v7643_v47 = vadd.f32 %v7642_v61, %v7641_v63  ;;  %v7644_v3 = vpop.f32.mrb[190].mxu1 }
 0x3c2   : > { %v7645_v50 = vpop.f32.mrb[191].mxu1 }
 0x3c3   : > { %v10723_v53 = vadd.f32 %v7643_v47, %v10525_v20  ;;  %v7646_v56 = vadd.f32 %v7645_v50, %v7644_v3  ;;  %v11073_v20 = vld [vmem:[#allocation25_spill] sm:$0xff] }
 0x3c4   : > { %v7747_v38 = vpop.f32.mrb[248].mxu0 }
 0x3c5   : > { %v10727_v25 = vadd.f32 %v7646_v56, %v10529_v35  ;;  %v7748_v15 = vpop.f32.mrb[249].mxu0  ;;  %v11074_v35 = vld [vmem:[#allocation26_spill] sm:$0xff] }
 0x3c6   : > { %v10729_v28 = vadd.f32 %v7748_v15, %v7747_v38  ;;  %v7750_v13 = vpop.f32.mrb[250].mxu0  ;;  %8016 = vmatmul.mubr.bf16.gmra.mrb[8].mxu1 %v11073_v20 }
 0x3c7   : > { %v7647_v17 = vpop.f32.mrb[192].mxu1  ;;  %v7751_v24 = vpop.f32.mrb[251].mxu0  ;;  %8019 = vmatprep.mubr.bf16.mxu1 %v11074_v35 }
 0x3c8   : > { %v7648_v51 = vpop.f32.mrb[193].mxu1  ;;  %v10731_v9 = vadd.f32 %v7751_v24, %v7750_v13 }
 0x3c9   : > { %v7649_v4 = vadd.f32 %v7648_v51, %v7647_v17  ;;  %v7650_v42 = vpop.f32.mrb[194].mxu1 }
 0x3ca   : > { %v7651_v18 = vpop.f32.mrb[195].mxu1 }
 0x3cb   : > { %v10735_v23 = vadd.f32 %v7649_v4, %v10540_v26  ;;  %v7652_v36 = vadd.f32 %v7651_v18, %v7650_v42  ;;  %v11075_v26 = vld [vmem:[#allocation14_spill] sm:$0xff] }
 0x3cc   : > { %v7753_v41 = vpop.f32.mrb[252].mxu0 }
 0x3cd   : > { %v10739_v49 = vadd.f32 %v7652_v36, %v10545_v59  ;;  %v7754_v31 = vpop.f32.mrb[253].mxu0 }
 0x3ce   : > { %v10741_v57 = vadd.f32 %v7754_v31, %v7753_v41  ;;  %v7756_v43 = vpop.f32.mrb[254].mxu0  ;;  %8020 = vmatmul.mubr.bf16.gmra.mrb[12].mxu1 %v11075_v26 }
 0x3cf   : > { %v7653_v63 = vpop.f32.mrb[196].mxu1  ;;  %v7757_v0 = vpop.f32.mrb[255].mxu0 }
 0x3d0   : > { %v7654_v61 = vpop.f32.mrb[197].mxu1  ;;  %v10743_v47 = vadd.f32 %v7757_v0, %v7756_v43 }
 0x3d1   : > { %v7655_v3 = vadd.f32 %v7654_v61, %v7653_v63  ;;  %v7656_v48 = vpop.f32.mrb[198].mxu1 }
 0x3d2   : > { %v7657_v50 = vpop.f32.mrb[199].mxu1 }
 0x3d3   : > { %v10747_v56 = vadd.f32 %v7655_v3, %v10558_v14  ;;  %v7658_v60 = vadd.f32 %v7657_v50, %v7656_v48 }
 0x3d4   : > { %v7759_v59 = vpop.f32.mrb[0].mxu0 }
 0x3d5   : > { %v10750_v38 = vadd.f32 %v7658_v60, %v10564_v58  ;;  %v7760_v15 = vpop.f32.mrb[1].mxu0 }
 0x3d6   : > { %v10752_v13 = vadd.f32 %v7760_v15, %v7759_v59  ;;  %v7762_v17 = vpop.f32.mrb[2].mxu0 }
 0x3d7   : > { %v7659_v24 = vpop.f32.mrb[200].mxu1  ;;  %v7763_v51 = vpop.f32.mrb[3].mxu0 }
 0x3d8   : > { %v7660_v4 = vpop.f32.mrb[201].mxu1  ;;  %v10754_v42 = vadd.f32 %v7763_v51, %v7762_v17 }
 0x3d9   : > { %v7661_v20 = vadd.f32 %v7660_v4, %v7659_v24  ;;  %v7662_v18 = vpop.f32.mrb[202].mxu1 }
 0x3da   : > { %v7663_v36 = vpop.f32.mrb[203].mxu1 }
 0x3db   : > { %v10757_v14 = vadd.f32 %v7661_v20, %v10576_v44  ;;  %v7664_v35 = vadd.f32 %v7663_v36, %v7662_v18 }
 0x3dc   : > { %v7765_v41 = vpop.f32.mrb[4].mxu0 }
 0x3dd   : > { %v10760_v58 = vadd.f32 %v7664_v35, %v10578_v12  ;;  %v7766_v31 = vpop.f32.mrb[5].mxu0 }
 0x3de   : > { %v7767_v43 = vadd.f32 %v7766_v31, %v7765_v41  ;;  %v7768_v63 = vpop.f32.mrb[6].mxu0 }
 0x3df   : > { %v7665_v0 = vpop.f32.mrb[204].mxu1  ;;  %v7769_v61 = vpop.f32.mrb[7].mxu0 }
 0x3e0   : > { %v7666_v3 = vpop.f32.mrb[205].mxu1  ;;  %v10762_v48 = vadd.f32 %v7769_v61, %v7768_v63 }
 0x3e1   : > { %v7667_v26 = vadd.f32 %v7666_v3, %v7665_v0  ;;  %v7668_v50 = vpop.f32.mrb[206].mxu1 }
 0x3e2   : > { %v7669_v60 = vpop.f32.mrb[207].mxu1 }
 0x3e3   : > { %v10765_v59 = vadd.f32 %v7667_v26, %v10585_v62  ;;  %v7670_v44 = vadd.f32 %v7669_v60, %v7668_v50 }
 0x3e4   : > { %v7771_v15 = vpop.f32.mrb[8].mxu0 }
 0x3e5   : > { %v10768_v17 = vadd.f32 %v7670_v44, %v10592_v6  ;;  %v7772_v12 = vpop.f32.mrb[9].mxu0 }
 0x3e6   : > { %v10770_v24 = vadd.f32 %v7772_v12, %v7771_v15  ;;  %v7774_v51 = vpop.f32.mrb[10].mxu0 }
 0x3e7   : > { %v7671_v4 = vpop.f32.mrb[208].mxu1  ;;  %v7775_v20 = vpop.f32.mrb[11].mxu0 }
 0x3e8   : > { %v7672_v18 = vpop.f32.mrb[209].mxu1  ;;  %v10772_v36 = vadd.f32 %v7775_v20, %v7774_v51  ;;  %v10782_v20 = vadd.f32 %v10705_v52, %v10687_v46 }
 0x3e9   : > { %v7673_v35 = vadd.f32 %v7672_v18, %v7671_v4  ;;  %v7674_v41 = vpop.f32.mrb[210].mxu1 }
 0x3ea   : > { %v7675_v31 = vpop.f32.mrb[211].mxu1 }
 0x3eb   : > { %v10775_v62 = vadd.f32 %v7673_v35, %v10604_v16  ;;  %v7676_v63 = vadd.f32 %v7675_v31, %v7674_v41  ;;  %v10791_v35 = vadd.f32 %v10707_v55, %v10692_v8  ;;  %v10804_v55 = vadd.f32 %v10729_v28, %v10711_v32 }
 0x3ec   : > { %v7777_v0 = vpop.f32.mrb[12].mxu0 }
 0x3ed   : > { %v10778_v6 = vadd.f32 %v7676_v63, %v10609_v5  ;;  %v7778_v61 = vpop.f32.mrb[13].mxu0  ;;  %v10787_v5 = vadd.f32 %v10717_v10, %v10703_v1  ;;  %v10798_v63 = vadd.f32 %v10741_v57, %v10723_v53  ;;  %v10811_v57 = vadd.f32 %v10743_v47, %v10727_v25 }
 0x3ee   : > { %v7779_v3 = vadd.f32 %v7778_v61, %v7777_v0  ;;  %v7780_v26 = vpop.f32.mrb[14].mxu0 }
 0x3ef   : > { %v7677_v50 = vpop.f32.mrb[212].mxu1  ;;  %v7781_v60 = vpop.f32.mrb[15].mxu0 }
 0x3f0   : > { %v7678_v44 = vpop.f32.mrb[213].mxu1  ;;  %v7782_v15 = vadd.f32 %v7781_v60, %v7780_v26  ;;  %v10815_v60 = vadd.f32 %v10731_v9, %v10715_v29  ;;  %v10825_v29 = vadd.f32 %v10752_v13, %v10735_v23 }
 0x3f1   : > { %v7679_v12 = vadd.f32 %v7678_v44, %v7677_v50  ;;  %v7680_v51 = vpop.f32.mrb[214].mxu1 }
 0x3f2   : > { %v7681_v4 = vpop.f32.mrb[215].mxu1 }
 0x3f3   : > { %v5922_v16 = vadd.f32 %v7679_v12, %v10628_v39  ;;  %v7682_v18 = vadd.f32 %v7681_v4, %v7680_v51  ;;  %v10821_v51 = vadd.f32 %v7767_v43, %v10747_v56  ;;  %v10830_v56 = vadd.f32 %v10762_v48, %v10750_v38 }
 0x3f4   : > { %v7783_v41 = vpop.f32.mrb[16].mxu0  ;;  %v10834_v43 = vadd.f32 %v10754_v42, %v10739_v49  ;;  %v10842_v49 = vadd.f32 %v10770_v24, %v10757_v14 }
 0x3f5   : > { %v10794_v31 = vadd.f32 %v7682_v18, %v10633_v21  ;;  %v7784_v46 = vpop.f32.mrb[17].mxu0 }
 0x3f6   : > { %v10800_v52 = vadd.f32 %v7784_v46, %v7783_v41  ;;  %v7786_v39 = vpop.f32.mrb[18].mxu0 }
 0x3f7   : > { %v7683_v0 = vpop.f32.mrb[216].mxu1  ;;  %v7787_v61 = vpop.f32.mrb[19].mxu0 }
 0x3f8   : > { %v7684_v1 = vpop.f32.mrb[217].mxu1  ;;  %v7788_v10 = vadd.f32 %v7787_v61, %v7786_v39 }
 0x3f9   : > { %v7685_v26 = vadd.f32 %v7684_v1, %v7683_v0  ;;  %v7686_v50 = vpop.f32.mrb[218].mxu1  ;;  %v10838_v1 = vadd.f32 %v7779_v3, %v10765_v59  ;;  %v10846_v59 = vadd.f32 %v7782_v15, %v10768_v17  ;;  %v10850_v3 = vadd.f32 %v10772_v36, %v10760_v58 }
 0x3fa   : > { %v7687_v8 = vpop.f32.mrb[219].mxu1  ;;  %v10857_v15 = vadd.f32 %v10800_v52, %v10775_v62 }
 0x3fb   : > { %v10807_v21 = vadd.f32 %v7685_v26, %v10649_v34  ;;  %v7688_v53 = vadd.f32 %v7687_v8, %v7686_v50 }
 0x3fc   : > { %v7789_v44 = vpop.f32.mrb[20].mxu0 }
 0x3fd   : > { %v10818_v12 = vadd.f32 %v7688_v53, %v10651_v30  ;;  %v7790_v32 = vpop.f32.mrb[21].mxu0 }
 0x3fe   : > { %v7791_v28 = vadd.f32 %v7790_v32, %v7789_v44  ;;  %v7792_v34 = vpop.f32.mrb[22].mxu0 }
 0x3ff   : > { %v7689_v4 = vpop.f32.mrb[220].mxu1  ;;  %v7793_v18 = vpop.f32.mrb[23].mxu0 }
 0x400   : > { %v7690_v41 = vpop.f32.mrb[221].mxu1  ;;  %v7794_v46 = vadd.f32 %v7793_v18, %v7792_v34 }
 0x401   : > { %v7691_v25 = vadd.f32 %v7690_v41, %v7689_v4  ;;  %v7692_v47 = vpop.f32.mrb[222].mxu1  ;;  %v10853_v4 = vadd.f32 %v7791_v28, %v5922_v16  ;;  %v10864_v16 = vadd.f32 %v7788_v10, %v10778_v6 }
 0x402   : > { %v7693_v39 = vpop.f32.mrb[223].mxu1 }
 0x403   : > { %v5938_v30 = vadd.f32 %v7691_v25, %v10657_v27  ;;  %v7694_v9 = vadd.f32 %v7693_v39, %v7692_v47 }
 0x404   : > { %v7795_v0 = vpop.f32.mrb[24].mxu0 }
 0x405   : > { %v5941_v61 = vadd.f32 %v7694_v9, %v10659_v19  ;;  %v7796_v26 = vpop.f32.mrb[25].mxu0 }
 0x406   : > { %v7797_v23 = vadd.f32 %v7796_v26, %v7795_v0  ;;  %v7798_v13 = vpop.f32.mrb[26].mxu0 }
 0x407   : > { %v7695_v50 = vpop.f32.mrb[224].mxu1  ;;  %v7799_v27 = vpop.f32.mrb[27].mxu0 }
 0x408   : > { %v7696_v8 = vpop.f32.mrb[225].mxu1  ;;  %v7800_v53 = vadd.f32 %v7799_v27, %v7798_v13 }
 0x409   : > { %v7697_v44 = vadd.f32 %v7696_v8, %v7695_v50  ;;  %v7698_v38 = vpop.f32.mrb[226].mxu1 }
 0x40a   : > { %v7699_v48 = vpop.f32.mrb[227].mxu1 }
 0x40b   : > { %v5946_v42 = vadd.f32 %v7697_v44, %v10665_v54  ;;  %v7700_v19 = vadd.f32 %v7699_v48, %v7698_v38 }
 0x40c   : > { %v7801_v32 = vpop.f32.mrb[28].mxu0 }
 0x40d   : > { %v5949_v34 = vadd.f32 %v7700_v19, %v10667_v45  ;;  %v7802_v18 = vpop.f32.mrb[29].mxu0  ;;  %v10861_v45 = vadd.f32 %v7794_v46, %v10794_v31  ;;  %v10870_v31 = vadd.f32 %v7797_v23, %v10807_v21 }
 0x40e   : > { %v7803_v41 = vadd.f32 %v7802_v18, %v7801_v32  ;;  %v7804_v25 = vpop.f32.mrb[30].mxu0 }
 0x40f   : > { %v7701_v14 = vpop.f32.mrb[228].mxu1  ;;  %v7805_v24 = vpop.f32.mrb[31].mxu0 }
 0x410   : > { %v7702_v47 = vpop.f32.mrb[229].mxu1  ;;  %v7806_v54 = vadd.f32 %v7805_v24, %v7804_v25  ;;  %v10867_v26 = vadd.f32 %v7803_v41, %v5938_v30 }
 0x411   : > { %v7703_v39 = vadd.f32 %v7702_v47, %v7701_v14  ;;  %v7704_v9 = vpop.f32.mrb[230].mxu1 }
 0x412   : > { %v7705_v17 = vpop.f32.mrb[231].mxu1  ;;  %v10873_v46 = vadd.f32 %v7806_v54, %v5941_v61 }
 0x413   : > { %v5954_v58 = vadd.f32 %v7703_v39, %v10673_v7  ;;  %v7706_v36 = vadd.f32 %v7705_v17, %v7704_v9 }
 0x414   : > { %v7807_v28 = vpop.f32.mrb[32].mxu0 }
 0x415   : > { %v5957_v0 = vadd.f32 %v7706_v36, %v10675_v33  ;;  %v7808_v13 = vpop.f32.mrb[33].mxu0  ;;  %v10876_v33 = vadd.f32 %v7800_v53, %v10818_v12 }
 0x416   : > { %v7809_v50 = vadd.f32 %v7808_v13, %v7807_v28  ;;  %v7810_v27 = vpop.f32.mrb[34].mxu0 }
 0x417   : > { %v7707_v8 = vpop.f32.mrb[232].mxu1  ;;  %v7811_v62 = vpop.f32.mrb[35].mxu0 }
 0x418   : > { %v7708_v52 = vpop.f32.mrb[233].mxu1  ;;  %v7812_v44 = vadd.f32 %v7811_v62, %v7810_v27  ;;  %v10881_v61 = vadd.f32 %v7809_v50, %v5946_v42 }
 0x419   : > { %v7709_v7 = vadd.f32 %v7708_v52, %v7707_v8  ;;  %v7710_v38 = vpop.f32.mrb[234].mxu1 }
 0x41a   : > { %v7711_v48 = vpop.f32.mrb[235].mxu1 }
 0x41b   : > { %v5962_v6 = vadd.f32 %v7709_v7, %v10681_v11  ;;  %v7712_v10 = vadd.f32 %v7711_v48, %v7710_v38 }
 0x41c   : > { %v7813_v30 = vpop.f32.mrb[36].mxu0 }
 0x41d   : > { %v5965_v19 = vadd.f32 %v7712_v10, %v10683_v37  ;;  %v7814_v32 = vpop.f32.mrb[37].mxu0  ;;  %v10886_v37 = vadd.f32 %v7812_v44, %v5949_v34 }
 0x41e   : > { %v7815_v18 = vadd.f32 %v7814_v32, %v7813_v30  ;;  %v7816_v41 = vpop.f32.mrb[38].mxu0 }
 0x41f   : > { %v7713_v25 = vpop.f32.mrb[236].mxu1  ;;  %v7817_v14 = vpop.f32.mrb[39].mxu0 }
 0x420   : > { %v7714_v24 = vpop.f32.mrb[237].mxu1  ;;  %v7818_v47 = vadd.f32 %v7817_v14, %v7816_v41  ;;  %v10879_v39 = vadd.f32 %v7815_v18, %v5954_v58 }
 0x421   : > { %v7715_v21 = vadd.f32 %v7714_v24, %v7713_v25  ;;  %v7716_v23 = vpop.f32.mrb[238].mxu1 }
 0x422   : > { %v7717_v11 = vpop.f32.mrb[239].mxu1  ;;  %v10884_v54 = vadd.f32 %v7818_v47, %v5957_v0 }
 0x423   : > { %v5970_v12 = vadd.f32 %v7715_v21, %v10695_v2  ;;  %v7718_v53 = vadd.f32 %v7717_v11, %v7716_v23 }
 0x424   : > { %v7819_v9 = vpop.f32.mrb[40].mxu0 }
 0x425   : > { %v5973_v17 = vadd.f32 %v7718_v53, %v10697_v40  ;;  %v7820_v36 = vpop.f32.mrb[41].mxu0 }
 0x426   : > { %v7821_v28 = vadd.f32 %v7820_v36, %v7819_v9  ;;  %v7822_v13 = vpop.f32.mrb[42].mxu0 }
 0x427   : > { %v7823_v27 = vpop.f32.mrb[43].mxu0 }
 0x428   : > { %v7824_v58 = vadd.f32 %v7823_v27, %v7822_v13  ;;  %v10889_v8 = vadd.f32 %v7821_v28, %v5962_v6 }
 0x42a   : > { %v10891_v42 = vadd.f32 %v7824_v58, %v5965_v19 }
 0x42c   : > { %v7825_v50 = vpop.f32.mrb[44].mxu0 }
 0x42d   : > { %v7826_v2 = vpop.f32.mrb[45].mxu0 }
 0x42e   : > { %v7827_v62 = vadd.f32 %v7826_v2, %v7825_v50  ;;  %v7828_v0 = vpop.f32.mrb[46].mxu0 }
 0x42f   : > { %v7829_v52 = vpop.f32.mrb[47].mxu0 }
 0x430   : > { %v7830_v34 = vadd.f32 %v7829_v52, %v7828_v0  ;;  %v10893_v44 = vadd.f32 %v7827_v62, %v5970_v12 }
 0x432   : > { %v10895_v7 = vadd.f32 %v7830_v34, %v5973_v17 }
 0x469   : > { %v7993_v40 = vpop.f32.mrb[240].mxu1 }
 0x46a   : > { %v8039_v38 = vadd.f32 %v7993_v40, %v10719_v22  ;;  %v6396_v48 = vpop.f32.mrb[241].mxu1 }
 0x46b   : > { %v8040_v6 = vadd.f32 %v6396_v48, %v10782_v20  ;;  %v7994_v10 = vpop.f32.mrb[242].mxu1 }
 0x46c   : > { %v6557_v30 = vmax.f32 %v8039_v38, 0.0  ;;  %v8041_v19 = vadd.f32 %v7994_v10, %v10787_v5  ;;  %v6399_v32 = vpop.f32.mrb[243].mxu1 }
 0x46d   : > { %v6555_v18 = vmax.f32 %v8040_v6, 0.0  ;;  %v8042_v22 = vadd.f32 %v6399_v32, %v10791_v35 }
 0x46e   : > { %6589 = vst [vmem:[%s10902_s17 + $0x10] sm:$0xff] %v6557_v30  ;;  %v6558_v41 = vmax.f32 %v8041_v19, 0.0 }
 0x46f   : > { %6587 = vst [vmem:[%s10902_s17] sm:$0xff] %v6555_v18  ;;  %v6556_v25 = vmax.f32 %v8042_v22, 0.0 }
 0x470   : > { %6590 = vst [vmem:[%s10902_s17 + $0x18] sm:$0xff] %v6558_v41 }
 0x471   : > { %6588 = vst [vmem:[%s10902_s17 + $0x8] sm:$0xff] %v6556_v25  ;;  %v7997_v14 = vpop.f32.mrb[244].mxu1 }
 0x472   : > { %v8043_v20 = vadd.f32 %v7997_v14, %v10798_v63  ;;  %v6412_v24 = vpop.f32.mrb[245].mxu1 }
 0x473   : > { %v8044_v5 = vadd.f32 %v6412_v24, %v10804_v55  ;;  %v7998_v47 = vpop.f32.mrb[246].mxu1 }
 0x474   : > { %v6561_v21 = vmax.f32 %v8043_v20, 0.0  ;;  %v8045_v35 = vadd.f32 %v7998_v47, %v10811_v57  ;;  %v6415_v23 = vpop.f32.mrb[247].mxu1 }
 0x475   : > { %v6559_v11 = vmax.f32 %v8044_v5, 0.0  ;;  %v8046_v12 = vadd.f32 %v6415_v23, %v10815_v60 }
 0x476   : > { %6593 = vst [vmem:[%s10902_s17 + $0x30] sm:$0xff] %v6561_v21  ;;  %v6562_v53 = vmax.f32 %v8045_v35, 0.0 }
 0x477   : > { %6591 = vst [vmem:[%s10902_s17 + $0x20] sm:$0xff] %v6559_v11  ;;  %v6560_v9 = vmax.f32 %v8046_v12, 0.0 }
 0x478   : > { %6594 = vst [vmem:[%s10902_s17 + $0x38] sm:$0xff] %v6562_v53 }
 0x479   : > { %6592 = vst [vmem:[%s10902_s17 + $0x28] sm:$0xff] %v6560_v9  ;;  %v8001_v63 = vpop.f32.mrb[248].mxu1 }
 0x47a   : > { %v8047_v55 = vadd.f32 %v8001_v63, %v10821_v51  ;;  %v6428_v17 = vpop.f32.mrb[249].mxu1 }
 0x47b   : > { %v8048_v57 = vadd.f32 %v6428_v17, %v10825_v29  ;;  %v8002_v36 = vpop.f32.mrb[250].mxu1 }
 0x47c   : > { %v6565_v28 = vmax.f32 %v8047_v55, 0.0  ;;  %v8049_v60 = vadd.f32 %v8002_v36, %v10830_v56  ;;  %v6431_v13 = vpop.f32.mrb[251].mxu1 }
 0x47d   : > { %v6563_v27 = vmax.f32 %v8048_v57, 0.0  ;;  %v8050_v58 = vadd.f32 %v6431_v13, %v10834_v43 }
 0x47e   : > { %6597 = vst [vmem:[%s10902_s17 + $0x50] sm:$0xff] %v6565_v28  ;;  %v6566_v50 = vmax.f32 %v8049_v60, 0.0 }
 0x47f   : > { %6595 = vst [vmem:[%s10902_s17 + $0x40] sm:$0xff] %v6563_v27  ;;  %v6564_v2 = vmax.f32 %v8050_v58, 0.0 }
 0x480   : > { %6598 = vst [vmem:[%s10902_s17 + $0x58] sm:$0xff] %v6566_v50 }
 0x481   : > { %6596 = vst [vmem:[%s10902_s17 + $0x48] sm:$0xff] %v6564_v2  ;;  %v8005_v51 = vpop.f32.mrb[252].mxu1 }
 0x482   : > { %v8051_v29 = vadd.f32 %v8005_v51, %v10838_v1  ;;  %v6444_v62 = vpop.f32.mrb[253].mxu1 }
 0x483   : > { %v8052_v56 = vadd.f32 %v6444_v62, %v10842_v49  ;;  %v8006_v0 = vpop.f32.mrb[254].mxu1 }
 0x484   : > { %v6569_v52 = vmax.f32 %v8051_v29, 0.0  ;;  %v8053_v43 = vadd.f32 %v8006_v0, %v10846_v59  ;;  %v6447_v34 = vpop.f32.mrb[255].mxu1 }
 0x485   : > { %v6567_v40 = vmax.f32 %v8052_v56, 0.0  ;;  %v8054_v38 = vadd.f32 %v6447_v34, %v10850_v3 }
 0x486   : > { %6601 = vst [vmem:[%s10902_s17 + $0x70] sm:$0xff] %v6569_v52  ;;  %v6570_v48 = vmax.f32 %v8053_v43, 0.0 }
 0x487   : > { %6599 = vst [vmem:[%s10902_s17 + $0x60] sm:$0xff] %v6567_v40  ;;  %v6568_v6 = vmax.f32 %v8054_v38, 0.0 }
 0x488   : > { %6602 = vst [vmem:[%s10902_s17 + $0x78] sm:$0xff] %v6570_v48 }
 0x489   : > { %6600 = vst [vmem:[%s10902_s17 + $0x68] sm:$0xff] %v6568_v6  ;;  %v8009_v1 = vpop.f32.mrb[0].mxu1 }
 0x48a   : > { %v8055_v49 = vadd.f32 %v8009_v1, %v10853_v4  ;;  %v6460_v10 = vpop.f32.mrb[1].mxu1 }
 0x48b   : > { %v8056_v59 = vadd.f32 %v6460_v10, %v10857_v15  ;;  %v8010_v30 = vpop.f32.mrb[2].mxu1 }
 0x48c   : > { %v6573_v19 = vmax.f32 %v8055_v49, 0.0  ;;  %v8057_v3 = vadd.f32 %v8010_v30, %v10861_v45  ;;  %v6463_v32 = vpop.f32.mrb[3].mxu1 }
 0x48d   : > { %v6571_v18 = vmax.f32 %v8056_v59, 0.0  ;;  %v8058_v22 = vadd.f32 %v6463_v32, %v10864_v16 }
 0x48e   : > { %6605 = vst [vmem:[%s10902_s17 + $0x90] sm:$0xff] %v6573_v19  ;;  %v6574_v41 = vmax.f32 %v8057_v3, 0.0 }
 0x48f   : > { %6603 = vst [vmem:[%s10902_s17 + $0x80] sm:$0xff] %v6571_v18  ;;  %v6572_v25 = vmax.f32 %v8058_v22, 0.0 }
 0x490   : > { %6606 = vst [vmem:[%s10902_s17 + $0x98] sm:$0xff] %v6574_v41 }
 0x491   : > { %6604 = vst [vmem:[%s10902_s17 + $0x88] sm:$0xff] %v6572_v25  ;;  %v8013_v4 = vpop.f32.mrb[4].mxu1 }
 0x492   : > { %v8059_v15 = vadd.f32 %v8013_v4, %v10867_v26  ;;  %v6476_v14 = vpop.f32.mrb[5].mxu1 }
 0x493   : > { %v8060_v45 = vadd.f32 %v6476_v14, %v10870_v31  ;;  %v8014_v20 = vpop.f32.mrb[6].mxu1 }
 0x494   : > { %v6577_v24 = vmax.f32 %v8059_v15, 0.0  ;;  %v8061_v16 = vadd.f32 %v8014_v20, %v10873_v46  ;;  %v6479_v5 = vpop.f32.mrb[7].mxu1 }
 0x495   : > { %v6575_v47 = vmax.f32 %v8060_v45, 0.0  ;;  %v8062_v21 = vadd.f32 %v6479_v5, %v10876_v33 }
 0x496   : > { %6609 = vst [vmem:[%s10902_s17 + $0xb0] sm:$0xff] %v6577_v24  ;;  %v6578_v35 = vmax.f32 %v8061_v16, 0.0 }
 0x497   : > { %6607 = vst [vmem:[%s10902_s17 + $0xa0] sm:$0xff] %v6575_v47  ;;  %v6576_v23 = vmax.f32 %v8062_v21, 0.0 }
 0x498   : > { %6610 = vst [vmem:[%s10902_s17 + $0xb8] sm:$0xff] %v6578_v35 }
 0x499   : > { %6608 = vst [vmem:[%s10902_s17 + $0xa8] sm:$0xff] %v6576_v23  ;;  %v8017_v26 = vpop.f32.mrb[8].mxu1 }
 0x49a   : > { %v8063_v31 = vadd.f32 %v8017_v26, %v10879_v39  ;;  %v6492_v11 = vpop.f32.mrb[9].mxu1 }
 0x49b   : > { %v8064_v46 = vadd.f32 %v6492_v11, %v10881_v61  ;;  %v8018_v12 = vpop.f32.mrb[10].mxu1 }
 0x49c   : > { %v6581_v53 = vmax.f32 %v8063_v31, 0.0  ;;  %v8065_v33 = vadd.f32 %v8018_v12, %v10884_v54  ;;  %v6495_v9 = vpop.f32.mrb[11].mxu1 }
 0x49d   : > { %v6579_v63 = vmax.f32 %v8064_v46, 0.0  ;;  %v8066_v55 = vadd.f32 %v6495_v9, %v10886_v37 }
 0x49e   : > { %6613 = vst [vmem:[%s10902_s17 + $0xd0] sm:$0xff] %v6581_v53  ;;  %v6582_v17 = vmax.f32 %v8065_v33, 0.0 }
 0x49f   : > { %6611 = vst [vmem:[%s10902_s17 + $0xc0] sm:$0xff] %v6579_v63  ;;  %v6580_v57 = vmax.f32 %v8066_v55, 0.0 }
 0x4a0   : > { %6614 = vst [vmem:[%s10902_s17 + $0xd8] sm:$0xff] %v6582_v17 }
 0x4a1   : > { %6612 = vst [vmem:[%s10902_s17 + $0xc8] sm:$0xff] %v6580_v57  ;;  %v8021_v39 = vpop.f32.mrb[12].mxu1 }
 0x4a2   : > { %v8067_v61 = vadd.f32 %v8021_v39, %v10893_v44  ;;  %v6508_v36 = vpop.f32.mrb[13].mxu1 }
 0x4a3   : > { %v8068_v54 = vadd.f32 %v6508_v36, %v10889_v8  ;;  %v8022_v28 = vpop.f32.mrb[14].mxu1 }
 0x4a4   : > { %v6585_v60 = vmax.f32 %v8067_v61, 0.0  ;;  %v8069_v37 = vadd.f32 %v8022_v28, %v10895_v7  ;;  %v6511_v13 = vpop.f32.mrb[15].mxu1 }
 0x4a5   : > { %v6583_v27 = vmax.f32 %v8068_v54, 0.0  ;;  %v8070_v58 = vadd.f32 %v6511_v13, %v10891_v42 }
 0x4a6   : > { %6617 = vst [vmem:[%s10902_s17 + $0xf0] sm:$0xff] %v6585_v60  ;;  %v6586_v50 = vmax.f32 %v8069_v37, 0.0 }
 0x4a7   : > { %6615 = vst [vmem:[%s10902_s17 + $0xe0] sm:$0xff] %v6583_v27  ;;  %v6584_v2 = vmax.f32 %v8070_v58, 0.0 }
 0x4a8   : > { %6618 = vst [vmem:[%s10902_s17 + $0xf8] sm:$0xff] %v6586_v50 }
 0x4a9   : > { %6616 = vst [vmem:[%s10902_s17 + $0xe8] sm:$0xff] %v6584_v2 }
 0x4aa PF: > { %s16_s21 = sadd.s32 1, %s8324_s21  }
 0x4ab   : > { %p13_p4 = scmp.ge.s32.totalorder %s16_s21, 4  }
 0x4ad   :  { %15 = sbr.rel (!%p13_p4) target bundleno = 1 (0x1), region = 77 }

</bundles_post_ra>
